<compile_context>
chip_gen: v5e
topology: v5e:2x2
jax: 0.10.0
libtpu: 0.0.40
codegen_flags: <defaults>
</compile_context>

<pallas_src>
import math
import jax
import jax.numpy as jnp
from jax.experimental import pallas as pl
from jax.experimental.pallas import tpu as pltpu

# ---------------- model dims (small, consistent with the module) -------------
D_MODEL = 32
N_HEAD = 4
HEAD_DIM = D_MODEL // N_HEAD
D_FF = 64
NUM_LAYERS = 2
LN_EPS = 1e-5
NEG_INF = -1e9

# packed small-vector slab layout (one row per per-layer vector, padded to VEC_W)
VEC_W = D_FF                      # 64 >= D_MODEL
V_BO, V_B1, V_B2, V_G1, V_BE1, V_G2, V_BE2 = range(7)
NUM_VECS = 7


def _layernorm(x, gamma, beta):
    mu = jnp.mean(x, axis=-1, keepdims=True)
    var = jnp.mean(jnp.square(x - mu), axis=-1, keepdims=True)
    return (x - mu) * jax.lax.rsqrt(var + LN_EPS) * gamma + beta


# ------------------------------ Pallas kernel --------------------------------
def fused_encoder_kernel(x_ref, bias_ref,
                         wqkv_ref, bqkv_ref, wo_ref, w1_ref, w2_ref, vec_ref,
                         o_ref):
    # x_ref:    (N, D)            flattened batch-major tokens (N = B*S)
    # bias_ref: (N, N)            additive attention bias (0 / -1e9): key
    #                             padding + block-diagonal same-batch mask
    # wqkv_ref: (L*3*H, D, Dh)    per-head Q/K/V weights, x-major, softmax scale
    #                             folded into the Q part on the host
    # bqkv_ref: (L*3*H, 1, Dh)    per-head Q/K/V biases (Q part pre-scaled)
    # wo_ref:   (L*H, Dh, D)      per-head rows of the output projection (x-major)
    # w1_ref:   (L, D, F)         FFN in  (x-major)
    # w2_ref:   (L, F, D)         FFN out (x-major)
    # vec_ref:  (L, NUM_VECS, VEC_W)  packed bo / b1 / b2 / g1 / be1 / g2 / be2
    n_layers = w1_ref.shape[0]

    x = x_ref[...].astype(jnp.float32)          # (N, D)
    bias = bias_ref[...]                        # (N, N)

    # TODO(synk): for NUM_LAYERS >= ~6 replace this static unroll with
    # lax.fori_loop over the stacked-weight leading axis to bound vreg live
    # ranges and code size.
    for l in range(n_layers):                   # static unroll over layers
        vl = vec_ref[l]                         # (NUM_VECS, VEC_W) constants
        bo  = vl[V_BO:V_BO + 1,  :D_MODEL]
        b1  = vl[V_B1:V_B1 + 1,  :D_FF]
        b2  = vl[V_B2:V_B2 + 1,  :D_MODEL]
        g1  = vl[V_G1:V_G1 + 1,  :D_MODEL]
        be1 = vl[V_BE1:V_BE1 + 1, :D_MODEL]
        g2  = vl[V_G2:V_G2 + 1,  :D_MODEL]
        be2 = vl[V_BE2:V_BE2 + 1, :D_MODEL]

        # ---- multi-head self-attention ----
        # Per-head weights are indexed on the leading ref axis: no lane-slicing
        # of activations, no fused-QKV split, no concat of head outputs
        # (concat_h(head_h) @ Wo == sum_h head_h @ Wo_rows[h]).
        attn = None
        for h in range(N_HEAD):                 # static loop over heads
            iq = (l * 3 + 0) * N_HEAD + h
            ik = (l * 3 + 1) * N_HEAD + h
            iv = (l * 3 + 2) * N_HEAD + h
            qh = jnp.dot(x, wqkv_ref[iq], preferred_element_type=jnp.float32) + bqkv_ref[iq]
            kh = jnp.dot(x, wqkv_ref[ik], preferred_element_type=jnp.float32) + bqkv_ref[ik]
            vh = jnp.dot(x, wqkv_ref[iv], preferred_element_type=jnp.float32) + bqkv_ref[iv]

            # scores: last-vs-last contraction -> no kh.T relayout; softmax
            # scale already folded into the Q weights/bias on the host.
            s = jax.lax.dot_general(qh, kh, (((1,), (1,)), ((), ())),
                                    preferred_element_type=jnp.float32) + bias
            s = s - jnp.max(s, axis=-1, keepdims=True)
            p = jnp.exp(s)
            denom = jnp.sum(p, axis=-1, keepdims=True)
            # EUP approx reciprocal + one Newton step (full f32 accuracy, no
            # VALU divide; the multiplies co-issue with the MXU pushes).
            r = pl.reciprocal(denom, approx=True)
            r = r * (2.0 - denom * r)
            p = p * r

            head = jnp.dot(p, vh, preferred_element_type=jnp.float32)       # (N, Dh)
            contrib = jnp.dot(head, wo_ref[l * N_HEAD + h],
                              preferred_element_type=jnp.float32)           # (N, D)
            attn = contrib if attn is None else attn + contrib
        attn = attn + bo                        # (1, D) broadcast

        # ---- residual + LayerNorm1 (post-norm, dropout = identity) ----
        x = _layernorm(x + attn, g1, be1)

        # ---- feed-forward ----
        hdn = jnp.dot(x, w1_ref[l], preferred_element_type=jnp.float32) + b1
        hdn = jnp.maximum(hdn, 0.0)             # ReLU
        ffn = jnp.dot(hdn, w2_ref[l], preferred_element_type=jnp.float32) + b2

        # ---- residual + LayerNorm2 ----
        x = _layernorm(x + ffn, g2, be2)

    # TODO(synk): with D_MODEL=32 every store uses 32/128 lanes; when scaled,
    # present a lane-dense (last-dim multiple of 128) output, build the (N,N)
    # bias in-kernel from (N,) vectors (O(N^2) DMA), add a 'parallel' token-row
    # grid axis for v7x megacore, and re-derive VMEM tiling against 64 MiB.
    o_ref[...] = x.astype(o_ref.dtype)


# -------------------- one-time host-side parameter packing -------------------
def pack_params(layer_params):
    """Stack layers, pre-transpose to x-major, split per head, fold the
    1/sqrt(HEAD_DIM) softmax scale into the Q projection, and pack all small
    per-layer vectors into one slab.  Called ONCE at init, not per forward."""
    scale = 1.0 / math.sqrt(HEAD_DIM)
    wqkv_l, bqkv_l, wo_l, w1_l, w2_l, vec_l = [], [], [], [], [], []

    def pad_row(v):
        v = v.reshape(-1)
        return jnp.pad(v, (0, VEC_W - v.shape[0]))

    for (wqkv, bqkv, wo, bo, w1, b1, w2, b2, g1, be1, g2, be2) in layer_params:
        # wqkv: torch layout (3D, D) -> per-head x-major (3, H, D, Dh)
        w = wqkv.reshape(3, N_HEAD, HEAD_DIM, D_MODEL).transpose(0, 1, 3, 2)
        w = w.at[0].multiply(scale)                       # fold scale into Q
        b = bqkv.reshape(3, N_HEAD, 1, HEAD_DIM)
        b = b.at[0].multiply(scale)
        wqkv_l.append(w.reshape(3 * N_HEAD, D_MODEL, HEAD_DIM))
        bqkv_l.append(b.reshape(3 * N_HEAD, 1, HEAD_DIM))
        # wo: torch layout (D, D); x-major rows grouped by head -> (H, Dh, D)
        wo_l.append(wo.T.reshape(N_HEAD, HEAD_DIM, D_MODEL))
        w1_l.append(w1.T)                                  # (D, F)
        w2_l.append(w2.T)                                  # (F, D)
        vec_l.append(jnp.stack([pad_row(bo), pad_row(b1), pad_row(b2),
                                pad_row(g1), pad_row(be1),
                                pad_row(g2), pad_row(be2)], axis=0))

    L = len(layer_params)
    return (jnp.stack(wqkv_l).reshape(L * 3 * N_HEAD, D_MODEL, HEAD_DIM),
            jnp.stack(bqkv_l).reshape(L * 3 * N_HEAD, 1, HEAD_DIM),
            jnp.stack(wo_l).reshape(L * N_HEAD, HEAD_DIM, D_MODEL),
            jnp.stack(w1_l),
            jnp.stack(w2_l),
            jnp.stack(vec_l))


# ------------------------- HF_TransformerEncoder forward ---------------------
@jax.jit
def hf_transformer_encoder(src, padding_mask, packed):
    """src: (S, B, D) seq-first (PyTorch convention); padding_mask: (B, S) bool,
    True = padding; packed: output of pack_params (built once at init)."""
    S, B, D = src.shape
    N = B * S

    # per-call-necessary layout plumbing only (weights are already packed)
    x = jnp.transpose(src, (1, 0, 2)).astype(jnp.float32).reshape(N, D)

    # combined additive bias: key padding + block-diagonal same-batch mask
    tok_batch = jnp.repeat(jnp.arange(B), S)                     # (N,)
    key_ok = jnp.logical_not(padding_mask.reshape(N))            # (N,)
    allow = (tok_batch[:, None] == tok_batch[None, :]) & key_ok[None, :]
    bias = jnp.where(allow, 0.0, NEG_INF).astype(jnp.float32)    # (N, N)

    ops = (x, bias) + tuple(packed)

    def full_spec(shape):
        nd = len(shape)
        return pl.BlockSpec(shape, lambda i, nd=nd: (0,) * nd)

    out = pl.pallas_call(
        fused_encoder_kernel,
        out_shape=jax.ShapeDtypeStruct((N, D), jnp.float32),
        grid=(1,),                               # whole problem fits VMEM (KBs)
        in_specs=[full_spec(o.shape) for o in ops],
        out_specs=full_spec((N, D)),
        compiler_params=pltpu.CompilerParams(dimension_semantics=("arbitrary",)),
    )(*ops)

    return jnp.transpose(out.reshape(B, S, D), (1, 0, 2))        # back to (S, B, D)


# ------------------------------ parameter init --------------------------------
def init_layer_params(key):
    ks = jax.random.split(key, 8)

    def uni(k, shape, fan_in):
        bound = 1.0 / math.sqrt(fan_in)
        return jax.random.uniform(k, shape, jnp.float32, -bound, bound)

    wqkv = uni(ks[0], (3 * D_MODEL, D_MODEL), D_MODEL)
    bqkv = uni(ks[1], (1, 3 * D_MODEL), D_MODEL)
    wo = uni(ks[2], (D_MODEL, D_MODEL), D_MODEL)
    bo = uni(ks[3], (1, D_MODEL), D_MODEL)
    w1 = uni(ks[4], (D_FF, D_MODEL), D_MODEL)
    b1 = uni(ks[5], (1, D_FF), D_MODEL)
    w2 = uni(ks[6], (D_MODEL, D_FF), D_FF)
    b2 = uni(ks[7], (1, D_MODEL), D_FF)
    g1 = jnp.ones((1, D_MODEL), jnp.float32)
    be1 = jnp.zeros((1, D_MODEL), jnp.float32)
    g2 = jnp.ones((1, D_MODEL), jnp.float32)
    be2 = jnp.zeros((1, D_MODEL), jnp.float32)
    return (wqkv, bqkv, wo, bo, w1, b1, w2, b2, g1, be1, g2, be2)


# ------------------------------ pure-JAX reference ----------------------------
def ref_encoder(src, padding_mask, layer_params):
    x = jnp.transpose(src, (1, 0, 2)).astype(jnp.float32)
    B, S, D = x.shape
    bias = jnp.where(padding_mask, NEG_INF, 0.0)[:, None, None, :]       # (B,1,1,S)
    for (wqkv, bqkv, wo, bo, w1, b1, w2, b2, g1, be1, g2, be2) in layer_params:
        qkv = x @ wqkv.T + bqkv[0]
        q, k, v = jnp.split(qkv, 3, axis=-1)
        hsplit = lambda t: t.reshape(B, S, N_HEAD, HEAD_DIM).transpose(0, 2, 1, 3)
        qh, kh, vh = hsplit(q), hsplit(k), hsplit(v)
        s = jnp.einsum('bhqd,bhkd->bhqk', qh, kh) / math.sqrt(HEAD_DIM) + bias
        p = jax.nn.softmax(s, axis=-1)
        a = jnp.einsum('bhqk,bhkd->bhqd', p, vh).transpose(0, 2, 1, 3).reshape(B, S, D)
        a = a @ wo.T + bo[0]
        x = _layernorm(x + a, g1[0], be1[0])
        h = jax.nn.relu(x @ w1.T + b1[0])
        h = h @ w2.T + b2[0]
        x = _layernorm(x + h, g2[0], be2[0])
    return jnp.transpose(x, (1, 0, 2))


# ----------------------------------- main -------------------------------------
if __name__ == "__main__":
    key = jax.random.PRNGKey(0)
    k_src, k_par = jax.random.split(key, 2)

    S, B = 8, 2
    src = jax.random.normal(k_src, (S, B, D_MODEL), jnp.float32)         # (seq, batch, d_model)
    # padding mask: batch 0 has 6 valid tokens, batch 1 has 7 (True = padding)
    padding_mask = jnp.arange(S)[None, :] >= jnp.array([6, 7])[:, None]  # (B, S) bool

    layer_params = [init_layer_params(k) for k in jax.random.split(k_par, NUM_LAYERS)]
    packed = pack_params(layer_params)        # one-time weight packing (not per call)

    out = hf_transformer_encoder(src, padding_mask, packed)
    out = jax.block_until_ready(out)

    ref = ref_encoder(src, padding_mask, layer_params)
    assert out.shape == (S, B, D_MODEL)
    assert jnp.allclose(out, ref, atol=1e-4, rtol=1e-4), float(jnp.max(jnp.abs(out - ref)))
    print("KERNEL_OK")
</pallas_src>

<mosaic_0001>
module attributes {stable_mosaic.version = 11 : i64} {
  func.func @fused_encoder_kernel(%arg0: i32, %arg1: memref<16x32xf32, #tpu.memory_space<vmem>>, %arg2: memref<16x16xf32, #tpu.memory_space<vmem>>, %arg3: memref<24x32x8xf32, #tpu.memory_space<vmem>>, %arg4: memref<24x1x8xf32, #tpu.memory_space<vmem>>, %arg5: memref<8x8x32xf32, #tpu.memory_space<vmem>>, %arg6: memref<2x32x64xf32, #tpu.memory_space<vmem>>, %arg7: memref<2x64x32xf32, #tpu.memory_space<vmem>>, %arg8: memref<2x7x64xf32, #tpu.memory_space<vmem>>, %arg9: memref<16x32xf32, #tpu.memory_space<vmem>>) attributes {dimension_semantics = [#tpu.dimension_semantics<arbitrary>], iteration_bounds = array<i64: 1>, scalar_prefetch = 0 : i64, scratch_operands = 0 : i64, tpu.core_type = #tpu.core_type<tc>, window_params = [{pipeline_mode = #tpu.pipeline_mode<synchronous>, transform_indices = @transform_0, window_bounds = array<i64: 16, 32>}, {pipeline_mode = #tpu.pipeline_mode<synchronous>, transform_indices = @transform_1, window_bounds = array<i64: 16, 16>}, {pipeline_mode = #tpu.pipeline_mode<synchronous>, transform_indices = @transform_2, window_bounds = array<i64: 24, 32, 8>}, {pipeline_mode = #tpu.pipeline_mode<synchronous>, transform_indices = @transform_3, window_bounds = array<i64: 24, 1, 8>}, {pipeline_mode = #tpu.pipeline_mode<synchronous>, transform_indices = @transform_4, window_bounds = array<i64: 8, 8, 32>}, {pipeline_mode = #tpu.pipeline_mode<synchronous>, transform_indices = @transform_5, window_bounds = array<i64: 2, 32, 64>}, {pipeline_mode = #tpu.pipeline_mode<synchronous>, transform_indices = @transform_6, window_bounds = array<i64: 2, 64, 32>}, {pipeline_mode = #tpu.pipeline_mode<synchronous>, transform_indices = @transform_7, window_bounds = array<i64: 2, 7, 64>}, {pipeline_mode = #tpu.pipeline_mode<synchronous>, transform_indices = @transform_8, window_bounds = array<i64: 16, 32>}]} {
    %c0 = arith.constant 0 : index
    %c0_0 = arith.constant 0 : index
    %0 = vector.load %arg1[%c0, %c0_0] : memref<16x32xf32, #tpu.memory_space<vmem>>, vector<16x32xf32>
    %c0_1 = arith.constant 0 : index
    %c0_2 = arith.constant 0 : index
    %1 = vector.load %arg2[%c0_1, %c0_2] : memref<16x16xf32, #tpu.memory_space<vmem>>, vector<16x16xf32>
    %c0_3 = arith.constant 0 : index
    %c0_4 = arith.constant 0 : index
    %c0_5 = arith.constant 0 : index
    %2 = vector.load %arg8[%c0_3, %c0_4, %c0_5] : memref<2x7x64xf32, #tpu.memory_space<vmem>>, vector<1x7x64xf32>
    %3 = vector.shape_cast %2 : vector<1x7x64xf32> to vector<7x64xf32>
    %4 = vector.extract_strided_slice %3 {offsets = [0, 0], sizes = [1, 32], strides = [1, 1]} : vector<7x64xf32> to vector<1x32xf32>
    %5 = vector.extract_strided_slice %3 {offsets = [1, 0], sizes = [1, 64], strides = [1, 1]} : vector<7x64xf32> to vector<1x64xf32>
    %6 = vector.extract_strided_slice %3 {offsets = [2, 0], sizes = [1, 32], strides = [1, 1]} : vector<7x64xf32> to vector<1x32xf32>
    %7 = vector.extract_strided_slice %3 {offsets = [3, 0], sizes = [1, 32], strides = [1, 1]} : vector<7x64xf32> to vector<1x32xf32>
    %8 = vector.extract_strided_slice %3 {offsets = [4, 0], sizes = [1, 32], strides = [1, 1]} : vector<7x64xf32> to vector<1x32xf32>
    %9 = vector.extract_strided_slice %3 {offsets = [5, 0], sizes = [1, 32], strides = [1, 1]} : vector<7x64xf32> to vector<1x32xf32>
    %10 = vector.extract_strided_slice %3 {offsets = [6, 0], sizes = [1, 32], strides = [1, 1]} : vector<7x64xf32> to vector<1x32xf32>
    %c0_6 = arith.constant 0 : index
    %c0_7 = arith.constant 0 : index
    %c0_8 = arith.constant 0 : index
    %11 = vector.load %arg3[%c0_6, %c0_7, %c0_8] : memref<24x32x8xf32, #tpu.memory_space<vmem>>, vector<1x32x8xf32>
    %12 = vector.shape_cast %11 : vector<1x32x8xf32> to vector<32x8xf32>
    %cst = arith.constant dense<0.000000e+00> : vector<16x8xf32>
    %13 = tpu.matmul %0, %12, %cst {dimension_numbers = #tpu.dot_dimension_numbers<[1], [0], [0], [1], [0, 0, 1, 1], [], []>} : vector<16x32xf32>, vector<32x8xf32>, vector<16x8xf32> -> vector<16x8xf32>
    %c0_9 = arith.constant 0 : index
    %c0_10 = arith.constant 0 : index
    %c0_11 = arith.constant 0 : index
    %14 = vector.load %arg4[%c0_9, %c0_10, %c0_11] : memref<24x1x8xf32, #tpu.memory_space<vmem>>, vector<1x1x8xf32>
    %15 = vector.shape_cast %14 : vector<1x1x8xf32> to vector<1x8xf32>
    %16 = vector.broadcast %15 : vector<1x8xf32> to vector<16x8xf32>
    %17 = arith.addf %13, %16 : vector<16x8xf32>
    %c4 = arith.constant 4 : index
    %c0_12 = arith.constant 0 : index
    %c0_13 = arith.constant 0 : index
    %18 = vector.load %arg3[%c4, %c0_12, %c0_13] : memref<24x32x8xf32, #tpu.memory_space<vmem>>, vector<1x32x8xf32>
    %19 = vector.shape_cast %18 : vector<1x32x8xf32> to vector<32x8xf32>
    %cst_14 = arith.constant dense<0.000000e+00> : vector<16x8xf32>
    %20 = tpu.matmul %0, %19, %cst_14 {dimension_numbers = #tpu.dot_dimension_numbers<[1], [0], [0], [1], [0, 0, 1, 1], [], []>} : vector<16x32xf32>, vector<32x8xf32>, vector<16x8xf32> -> vector<16x8xf32>
    %c4_15 = arith.constant 4 : index
    %c0_16 = arith.constant 0 : index
    %c0_17 = arith.constant 0 : index
    %21 = vector.load %arg4[%c4_15, %c0_16, %c0_17] : memref<24x1x8xf32, #tpu.memory_space<vmem>>, vector<1x1x8xf32>
    %22 = vector.shape_cast %21 : vector<1x1x8xf32> to vector<1x8xf32>
    %23 = vector.broadcast %22 : vector<1x8xf32> to vector<16x8xf32>
    %24 = arith.addf %20, %23 : vector<16x8xf32>
    %c8 = arith.constant 8 : index
    %c0_18 = arith.constant 0 : index
    %c0_19 = arith.constant 0 : index
    %25 = vector.load %arg3[%c8, %c0_18, %c0_19] : memref<24x32x8xf32, #tpu.memory_space<vmem>>, vector<1x32x8xf32>
    %26 = vector.shape_cast %25 : vector<1x32x8xf32> to vector<32x8xf32>
    %cst_20 = arith.constant dense<0.000000e+00> : vector<16x8xf32>
    %27 = tpu.matmul %0, %26, %cst_20 {dimension_numbers = #tpu.dot_dimension_numbers<[1], [0], [0], [1], [0, 0, 1, 1], [], []>} : vector<16x32xf32>, vector<32x8xf32>, vector<16x8xf32> -> vector<16x8xf32>
    %c8_21 = arith.constant 8 : index
    %c0_22 = arith.constant 0 : index
    %c0_23 = arith.constant 0 : index
    %28 = vector.load %arg4[%c8_21, %c0_22, %c0_23] : memref<24x1x8xf32, #tpu.memory_space<vmem>>, vector<1x1x8xf32>
    %29 = vector.shape_cast %28 : vector<1x1x8xf32> to vector<1x8xf32>
    %30 = vector.broadcast %29 : vector<1x8xf32> to vector<16x8xf32>
    %31 = arith.addf %27, %30 : vector<16x8xf32>
    %cst_24 = arith.constant dense<0.000000e+00> : vector<16x16xf32>
    %32 = tpu.matmul %17, %24, %cst_24 {dimension_numbers = #tpu.dot_dimension_numbers<[1], [1], [0], [0], [0, 0, 1, 0], [], []>} : vector<16x8xf32>, vector<16x8xf32>, vector<16x16xf32> -> vector<16x16xf32>
    %33 = arith.addf %32, %1 : vector<16x16xf32>
    %cst_25 = arith.constant dense<0xFF800000> : vector<16xf32>
    %34 = vector.multi_reduction <maximumf>, %33, %cst_25 [1] : vector<16x16xf32> to vector<16xf32>
    %35 = vector.shape_cast %34 : vector<16xf32> to vector<16x1xf32>
    %36 = vector.broadcast %35 : vector<16x1xf32> to vector<16x16xf32>
    %37 = arith.subf %33, %36 : vector<16x16xf32>
    %38 = math.exp %37 : vector<16x16xf32>
    %cst_26 = arith.constant dense<0.000000e+00> : vector<16xf32>
    %39 = vector.multi_reduction <add>, %38, %cst_26 [1] : vector<16x16xf32> to vector<16xf32>
    %40 = vector.shape_cast %39 : vector<16xf32> to vector<16x1xf32>
    %41 = tpu.reciprocal %40 {approx = true} : vector<16x1xf32> -> vector<16x1xf32>
    %42 = arith.mulf %40, %41 : vector<16x1xf32>
    %cst_27 = arith.constant 2.000000e+00 : f32
    %43 = vector.broadcast %cst_27 : f32 to vector<16x1xf32>
    %44 = arith.subf %43, %42 : vector<16x1xf32>
    %45 = arith.mulf %41, %44 : vector<16x1xf32>
    %46 = vector.broadcast %45 : vector<16x1xf32> to vector<16x16xf32>
    %47 = arith.mulf %38, %46 : vector<16x16xf32>
    %cst_28 = arith.constant dense<0.000000e+00> : vector<16x8xf32>
    %48 = tpu.matmul %47, %31, %cst_28 {dimension_numbers = #tpu.dot_dimension_numbers<[1], [0], [0], [1], [0, 0, 1, 1], [], []>} : vector<16x16xf32>, vector<16x8xf32>, vector<16x8xf32> -> vector<16x8xf32>
    %c0_29 = arith.constant 0 : index
    %c0_30 = arith.constant 0 : index
    %c0_31 = arith.constant 0 : index
    %49 = vector.load %arg5[%c0_29, %c0_30, %c0_31] : memref<8x8x32xf32, #tpu.memory_space<vmem>>, vector<1x8x32xf32>
    %50 = vector.shape_cast %49 : vector<1x8x32xf32> to vector<8x32xf32>
    %cst_32 = arith.constant dense<0.000000e+00> : vector<16x32xf32>
    %51 = tpu.matmul %48, %50, %cst_32 {dimension_numbers = #tpu.dot_dimension_numbers<[1], [0], [0], [1], [0, 0, 1, 1], [], []>} : vector<16x8xf32>, vector<8x32xf32>, vector<16x32xf32> -> vector<16x32xf32>
    %c1 = arith.constant 1 : index
    %c0_33 = arith.constant 0 : index
    %c0_34 = arith.constant 0 : index
    %52 = vector.load %arg3[%c1, %c0_33, %c0_34] : memref<24x32x8xf32, #tpu.memory_space<vmem>>, vector<1x32x8xf32>
    %53 = vector.shape_cast %52 : vector<1x32x8xf32> to vector<32x8xf32>
    %cst_35 = arith.constant dense<0.000000e+00> : vector<16x8xf32>
    %54 = tpu.matmul %0, %53, %cst_35 {dimension_numbers = #tpu.dot_dimension_numbers<[1], [0], [0], [1], [0, 0, 1, 1], [], []>} : vector<16x32xf32>, vector<32x8xf32>, vector<16x8xf32> -> vector<16x8xf32>
    %c1_36 = arith.constant 1 : index
    %c0_37 = arith.constant 0 : index
    %c0_38 = arith.constant 0 : index
    %55 = vector.load %arg4[%c1_36, %c0_37, %c0_38] : memref<24x1x8xf32, #tpu.memory_space<vmem>>, vector<1x1x8xf32>
    %56 = vector.shape_cast %55 : vector<1x1x8xf32> to vector<1x8xf32>
    %57 = vector.broadcast %56 : vector<1x8xf32> to vector<16x8xf32>
    %58 = arith.addf %54, %57 : vector<16x8xf32>
    %c5 = arith.constant 5 : index
    %c0_39 = arith.constant 0 : index
    %c0_40 = arith.constant 0 : index
    %59 = vector.load %arg3[%c5, %c0_39, %c0_40] : memref<24x32x8xf32, #tpu.memory_space<vmem>>, vector<1x32x8xf32>
    %60 = vector.shape_cast %59 : vector<1x32x8xf32> to vector<32x8xf32>
    %cst_41 = arith.constant dense<0.000000e+00> : vector<16x8xf32>
    %61 = tpu.matmul %0, %60, %cst_41 {dimension_numbers = #tpu.dot_dimension_numbers<[1], [0], [0], [1], [0, 0, 1, 1], [], []>} : vector<16x32xf32>, vector<32x8xf32>, vector<16x8xf32> -> vector<16x8xf32>
    %c5_42 = arith.constant 5 : index
    %c0_43 = arith.constant 0 : index
    %c0_44 = arith.constant 0 : index
    %62 = vector.load %arg4[%c5_42, %c0_43, %c0_44] : memref<24x1x8xf32, #tpu.memory_space<vmem>>, vector<1x1x8xf32>
    %63 = vector.shape_cast %62 : vector<1x1x8xf32> to vector<1x8xf32>
    %64 = vector.broadcast %63 : vector<1x8xf32> to vector<16x8xf32>
    %65 = arith.addf %61, %64 : vector<16x8xf32>
    %c9 = arith.constant 9 : index
    %c0_45 = arith.constant 0 : index
    %c0_46 = arith.constant 0 : index
    %66 = vector.load %arg3[%c9, %c0_45, %c0_46] : memref<24x32x8xf32, #tpu.memory_space<vmem>>, vector<1x32x8xf32>
    %67 = vector.shape_cast %66 : vector<1x32x8xf32> to vector<32x8xf32>
    %cst_47 = arith.constant dense<0.000000e+00> : vector<16x8xf32>
    %68 = tpu.matmul %0, %67, %cst_47 {dimension_numbers = #tpu.dot_dimension_numbers<[1], [0], [0], [1], [0, 0, 1, 1], [], []>} : vector<16x32xf32>, vector<32x8xf32>, vector<16x8xf32> -> vector<16x8xf32>
    %c9_48 = arith.constant 9 : index
    %c0_49 = arith.constant 0 : index
    %c0_50 = arith.constant 0 : index
    %69 = vector.load %arg4[%c9_48, %c0_49, %c0_50] : memref<24x1x8xf32, #tpu.memory_space<vmem>>, vector<1x1x8xf32>
    %70 = vector.shape_cast %69 : vector<1x1x8xf32> to vector<1x8xf32>
    %71 = vector.broadcast %70 : vector<1x8xf32> to vector<16x8xf32>
    %72 = arith.addf %68, %71 : vector<16x8xf32>
    %cst_51 = arith.constant dense<0.000000e+00> : vector<16x16xf32>
    %73 = tpu.matmul %58, %65, %cst_51 {dimension_numbers = #tpu.dot_dimension_numbers<[1], [1], [0], [0], [0, 0, 1, 0], [], []>} : vector<16x8xf32>, vector<16x8xf32>, vector<16x16xf32> -> vector<16x16xf32>
    %74 = arith.addf %73, %1 : vector<16x16xf32>
    %cst_52 = arith.constant dense<0xFF800000> : vector<16xf32>
    %75 = vector.multi_reduction <maximumf>, %74, %cst_52 [1] : vector<16x16xf32> to vector<16xf32>
    %76 = vector.shape_cast %75 : vector<16xf32> to vector<16x1xf32>
    %77 = vector.broadcast %76 : vector<16x1xf32> to vector<16x16xf32>
    %78 = arith.subf %74, %77 : vector<16x16xf32>
    %79 = math.exp %78 : vector<16x16xf32>
    %cst_53 = arith.constant dense<0.000000e+00> : vector<16xf32>
    %80 = vector.multi_reduction <add>, %79, %cst_53 [1] : vector<16x16xf32> to vector<16xf32>
    %81 = vector.shape_cast %80 : vector<16xf32> to vector<16x1xf32>
    %82 = tpu.reciprocal %81 {approx = true} : vector<16x1xf32> -> vector<16x1xf32>
    %83 = arith.mulf %81, %82 : vector<16x1xf32>
    %cst_54 = arith.constant 2.000000e+00 : f32
    %84 = vector.broadcast %cst_54 : f32 to vector<16x1xf32>
    %85 = arith.subf %84, %83 : vector<16x1xf32>
    %86 = arith.mulf %82, %85 : vector<16x1xf32>
    %87 = vector.broadcast %86 : vector<16x1xf32> to vector<16x16xf32>
    %88 = arith.mulf %79, %87 : vector<16x16xf32>
    %cst_55 = arith.constant dense<0.000000e+00> : vector<16x8xf32>
    %89 = tpu.matmul %88, %72, %cst_55 {dimension_numbers = #tpu.dot_dimension_numbers<[1], [0], [0], [1], [0, 0, 1, 1], [], []>} : vector<16x16xf32>, vector<16x8xf32>, vector<16x8xf32> -> vector<16x8xf32>
    %c1_56 = arith.constant 1 : index
    %c0_57 = arith.constant 0 : index
    %c0_58 = arith.constant 0 : index
    %90 = vector.load %arg5[%c1_56, %c0_57, %c0_58] : memref<8x8x32xf32, #tpu.memory_space<vmem>>, vector<1x8x32xf32>
    %91 = vector.shape_cast %90 : vector<1x8x32xf32> to vector<8x32xf32>
    %cst_59 = arith.constant dense<0.000000e+00> : vector<16x32xf32>
    %92 = tpu.matmul %89, %91, %cst_59 {dimension_numbers = #tpu.dot_dimension_numbers<[1], [0], [0], [1], [0, 0, 1, 1], [], []>} : vector<16x8xf32>, vector<8x32xf32>, vector<16x32xf32> -> vector<16x32xf32>
    %93 = arith.addf %51, %92 : vector<16x32xf32>
    %c2 = arith.constant 2 : index
    %c0_60 = arith.constant 0 : index
    %c0_61 = arith.constant 0 : index
    %94 = vector.load %arg3[%c2, %c0_60, %c0_61] : memref<24x32x8xf32, #tpu.memory_space<vmem>>, vector<1x32x8xf32>
    %95 = vector.shape_cast %94 : vector<1x32x8xf32> to vector<32x8xf32>
    %cst_62 = arith.constant dense<0.000000e+00> : vector<16x8xf32>
    %96 = tpu.matmul %0, %95, %cst_62 {dimension_numbers = #tpu.dot_dimension_numbers<[1], [0], [0], [1], [0, 0, 1, 1], [], []>} : vector<16x32xf32>, vector<32x8xf32>, vector<16x8xf32> -> vector<16x8xf32>
    %c2_63 = arith.constant 2 : index
    %c0_64 = arith.constant 0 : index
    %c0_65 = arith.constant 0 : index
    %97 = vector.load %arg4[%c2_63, %c0_64, %c0_65] : memref<24x1x8xf32, #tpu.memory_space<vmem>>, vector<1x1x8xf32>
    %98 = vector.shape_cast %97 : vector<1x1x8xf32> to vector<1x8xf32>
    %99 = vector.broadcast %98 : vector<1x8xf32> to vector<16x8xf32>
    %100 = arith.addf %96, %99 : vector<16x8xf32>
    %c6 = arith.constant 6 : index
    %c0_66 = arith.constant 0 : index
    %c0_67 = arith.constant 0 : index
    %101 = vector.load %arg3[%c6, %c0_66, %c0_67] : memref<24x32x8xf32, #tpu.memory_space<vmem>>, vector<1x32x8xf32>
    %102 = vector.shape_cast %101 : vector<1x32x8xf32> to vector<32x8xf32>
    %cst_68 = arith.constant dense<0.000000e+00> : vector<16x8xf32>
    %103 = tpu.matmul %0, %102, %cst_68 {dimension_numbers = #tpu.dot_dimension_numbers<[1], [0], [0], [1], [0, 0, 1, 1], [], []>} : vector<16x32xf32>, vector<32x8xf32>, vector<16x8xf32> -> vector<16x8xf32>
    %c6_69 = arith.constant 6 : index
    %c0_70 = arith.constant 0 : index
    %c0_71 = arith.constant 0 : index
    %104 = vector.load %arg4[%c6_69, %c0_70, %c0_71] : memref<24x1x8xf32, #tpu.memory_space<vmem>>, vector<1x1x8xf32>
    %105 = vector.shape_cast %104 : vector<1x1x8xf32> to vector<1x8xf32>
    %106 = vector.broadcast %105 : vector<1x8xf32> to vector<16x8xf32>
    %107 = arith.addf %103, %106 : vector<16x8xf32>
    %c10 = arith.constant 10 : index
    %c0_72 = arith.constant 0 : index
    %c0_73 = arith.constant 0 : index
    %108 = vector.load %arg3[%c10, %c0_72, %c0_73] : memref<24x32x8xf32, #tpu.memory_space<vmem>>, vector<1x32x8xf32>
    %109 = vector.shape_cast %108 : vector<1x32x8xf32> to vector<32x8xf32>
    %cst_74 = arith.constant dense<0.000000e+00> : vector<16x8xf32>
    %110 = tpu.matmul %0, %109, %cst_74 {dimension_numbers = #tpu.dot_dimension_numbers<[1], [0], [0], [1], [0, 0, 1, 1], [], []>} : vector<16x32xf32>, vector<32x8xf32>, vector<16x8xf32> -> vector<16x8xf32>
    %c10_75 = arith.constant 10 : index
    %c0_76 = arith.constant 0 : index
    %c0_77 = arith.constant 0 : index
    %111 = vector.load %arg4[%c10_75, %c0_76, %c0_77] : memref<24x1x8xf32, #tpu.memory_space<vmem>>, vector<1x1x8xf32>
    %112 = vector.shape_cast %111 : vector<1x1x8xf32> to vector<1x8xf32>
    %113 = vector.broadcast %112 : vector<1x8xf32> to vector<16x8xf32>
    %114 = arith.addf %110, %113 : vector<16x8xf32>
    %cst_78 = arith.constant dense<0.000000e+00> : vector<16x16xf32>
    %115 = tpu.matmul %100, %107, %cst_78 {dimension_numbers = #tpu.dot_dimension_numbers<[1], [1], [0], [0], [0, 0, 1, 0], [], []>} : vector<16x8xf32>, vector<16x8xf32>, vector<16x16xf32> -> vector<16x16xf32>
    %116 = arith.addf %115, %1 : vector<16x16xf32>
    %cst_79 = arith.constant dense<0xFF800000> : vector<16xf32>
    %117 = vector.multi_reduction <maximumf>, %116, %cst_79 [1] : vector<16x16xf32> to vector<16xf32>
    %118 = vector.shape_cast %117 : vector<16xf32> to vector<16x1xf32>
    %119 = vector.broadcast %118 : vector<16x1xf32> to vector<16x16xf32>
    %120 = arith.subf %116, %119 : vector<16x16xf32>
    %121 = math.exp %120 : vector<16x16xf32>
    %cst_80 = arith.constant dense<0.000000e+00> : vector<16xf32>
    %122 = vector.multi_reduction <add>, %121, %cst_80 [1] : vector<16x16xf32> to vector<16xf32>
    %123 = vector.shape_cast %122 : vector<16xf32> to vector<16x1xf32>
    %124 = tpu.reciprocal %123 {approx = true} : vector<16x1xf32> -> vector<16x1xf32>
    %125 = arith.mulf %123, %124 : vector<16x1xf32>
    %cst_81 = arith.constant 2.000000e+00 : f32
    %126 = vector.broadcast %cst_81 : f32 to vector<16x1xf32>
    %127 = arith.subf %126, %125 : vector<16x1xf32>
    %128 = arith.mulf %124, %127 : vector<16x1xf32>
    %129 = vector.broadcast %128 : vector<16x1xf32> to vector<16x16xf32>
    %130 = arith.mulf %121, %129 : vector<16x16xf32>
    %cst_82 = arith.constant dense<0.000000e+00> : vector<16x8xf32>
    %131 = tpu.matmul %130, %114, %cst_82 {dimension_numbers = #tpu.dot_dimension_numbers<[1], [0], [0], [1], [0, 0, 1, 1], [], []>} : vector<16x16xf32>, vector<16x8xf32>, vector<16x8xf32> -> vector<16x8xf32>
    %c2_83 = arith.constant 2 : index
    %c0_84 = arith.constant 0 : index
    %c0_85 = arith.constant 0 : index
    %132 = vector.load %arg5[%c2_83, %c0_84, %c0_85] : memref<8x8x32xf32, #tpu.memory_space<vmem>>, vector<1x8x32xf32>
    %133 = vector.shape_cast %132 : vector<1x8x32xf32> to vector<8x32xf32>
    %cst_86 = arith.constant dense<0.000000e+00> : vector<16x32xf32>
    %134 = tpu.matmul %131, %133, %cst_86 {dimension_numbers = #tpu.dot_dimension_numbers<[1], [0], [0], [1], [0, 0, 1, 1], [], []>} : vector<16x8xf32>, vector<8x32xf32>, vector<16x32xf32> -> vector<16x32xf32>
    %135 = arith.addf %93, %134 : vector<16x32xf32>
    %c3 = arith.constant 3 : index
    %c0_87 = arith.constant 0 : index
    %c0_88 = arith.constant 0 : index
    %136 = vector.load %arg3[%c3, %c0_87, %c0_88] : memref<24x32x8xf32, #tpu.memory_space<vmem>>, vector<1x32x8xf32>
    %137 = vector.shape_cast %136 : vector<1x32x8xf32> to vector<32x8xf32>
    %cst_89 = arith.constant dense<0.000000e+00> : vector<16x8xf32>
    %138 = tpu.matmul %0, %137, %cst_89 {dimension_numbers = #tpu.dot_dimension_numbers<[1], [0], [0], [1], [0, 0, 1, 1], [], []>} : vector<16x32xf32>, vector<32x8xf32>, vector<16x8xf32> -> vector<16x8xf32>
    %c3_90 = arith.constant 3 : index
    %c0_91 = arith.constant 0 : index
    %c0_92 = arith.constant 0 : index
    %139 = vector.load %arg4[%c3_90, %c0_91, %c0_92] : memref<24x1x8xf32, #tpu.memory_space<vmem>>, vector<1x1x8xf32>
    %140 = vector.shape_cast %139 : vector<1x1x8xf32> to vector<1x8xf32>
    %141 = vector.broadcast %140 : vector<1x8xf32> to vector<16x8xf32>
    %142 = arith.addf %138, %141 : vector<16x8xf32>
    %c7 = arith.constant 7 : index
    %c0_93 = arith.constant 0 : index
    %c0_94 = arith.constant 0 : index
    %143 = vector.load %arg3[%c7, %c0_93, %c0_94] : memref<24x32x8xf32, #tpu.memory_space<vmem>>, vector<1x32x8xf32>
    %144 = vector.shape_cast %143 : vector<1x32x8xf32> to vector<32x8xf32>
    %cst_95 = arith.constant dense<0.000000e+00> : vector<16x8xf32>
    %145 = tpu.matmul %0, %144, %cst_95 {dimension_numbers = #tpu.dot_dimension_numbers<[1], [0], [0], [1], [0, 0, 1, 1], [], []>} : vector<16x32xf32>, vector<32x8xf32>, vector<16x8xf32> -> vector<16x8xf32>
    %c7_96 = arith.constant 7 : index
    %c0_97 = arith.constant 0 : index
    %c0_98 = arith.constant 0 : index
    %146 = vector.load %arg4[%c7_96, %c0_97, %c0_98] : memref<24x1x8xf32, #tpu.memory_space<vmem>>, vector<1x1x8xf32>
    %147 = vector.shape_cast %146 : vector<1x1x8xf32> to vector<1x8xf32>
    %148 = vector.broadcast %147 : vector<1x8xf32> to vector<16x8xf32>
    %149 = arith.addf %145, %148 : vector<16x8xf32>
    %c11 = arith.constant 11 : index
    %c0_99 = arith.constant 0 : index
    %c0_100 = arith.constant 0 : index
    %150 = vector.load %arg3[%c11, %c0_99, %c0_100] : memref<24x32x8xf32, #tpu.memory_space<vmem>>, vector<1x32x8xf32>
    %151 = vector.shape_cast %150 : vector<1x32x8xf32> to vector<32x8xf32>
    %cst_101 = arith.constant dense<0.000000e+00> : vector<16x8xf32>
    %152 = tpu.matmul %0, %151, %cst_101 {dimension_numbers = #tpu.dot_dimension_numbers<[1], [0], [0], [1], [0, 0, 1, 1], [], []>} : vector<16x32xf32>, vector<32x8xf32>, vector<16x8xf32> -> vector<16x8xf32>
    %c11_102 = arith.constant 11 : index
    %c0_103 = arith.constant 0 : index
    %c0_104 = arith.constant 0 : index
    %153 = vector.load %arg4[%c11_102, %c0_103, %c0_104] : memref<24x1x8xf32, #tpu.memory_space<vmem>>, vector<1x1x8xf32>
    %154 = vector.shape_cast %153 : vector<1x1x8xf32> to vector<1x8xf32>
    %155 = vector.broadcast %154 : vector<1x8xf32> to vector<16x8xf32>
    %156 = arith.addf %152, %155 : vector<16x8xf32>
    %cst_105 = arith.constant dense<0.000000e+00> : vector<16x16xf32>
    %157 = tpu.matmul %142, %149, %cst_105 {dimension_numbers = #tpu.dot_dimension_numbers<[1], [1], [0], [0], [0, 0, 1, 0], [], []>} : vector<16x8xf32>, vector<16x8xf32>, vector<16x16xf32> -> vector<16x16xf32>
    %158 = arith.addf %157, %1 : vector<16x16xf32>
    %cst_106 = arith.constant dense<0xFF800000> : vector<16xf32>
    %159 = vector.multi_reduction <maximumf>, %158, %cst_106 [1] : vector<16x16xf32> to vector<16xf32>
    %160 = vector.shape_cast %159 : vector<16xf32> to vector<16x1xf32>
    %161 = vector.broadcast %160 : vector<16x1xf32> to vector<16x16xf32>
    %162 = arith.subf %158, %161 : vector<16x16xf32>
    %163 = math.exp %162 : vector<16x16xf32>
    %cst_107 = arith.constant dense<0.000000e+00> : vector<16xf32>
    %164 = vector.multi_reduction <add>, %163, %cst_107 [1] : vector<16x16xf32> to vector<16xf32>
    %165 = vector.shape_cast %164 : vector<16xf32> to vector<16x1xf32>
    %166 = tpu.reciprocal %165 {approx = true} : vector<16x1xf32> -> vector<16x1xf32>
    %167 = arith.mulf %165, %166 : vector<16x1xf32>
    %cst_108 = arith.constant 2.000000e+00 : f32
    %168 = vector.broadcast %cst_108 : f32 to vector<16x1xf32>
    %169 = arith.subf %168, %167 : vector<16x1xf32>
    %170 = arith.mulf %166, %169 : vector<16x1xf32>
    %171 = vector.broadcast %170 : vector<16x1xf32> to vector<16x16xf32>
    %172 = arith.mulf %163, %171 : vector<16x16xf32>
    %cst_109 = arith.constant dense<0.000000e+00> : vector<16x8xf32>
    %173 = tpu.matmul %172, %156, %cst_109 {dimension_numbers = #tpu.dot_dimension_numbers<[1], [0], [0], [1], [0, 0, 1, 1], [], []>} : vector<16x16xf32>, vector<16x8xf32>, vector<16x8xf32> -> vector<16x8xf32>
    %c3_110 = arith.constant 3 : index
    %c0_111 = arith.constant 0 : index
    %c0_112 = arith.constant 0 : index
    %174 = vector.load %arg5[%c3_110, %c0_111, %c0_112] : memref<8x8x32xf32, #tpu.memory_space<vmem>>, vector<1x8x32xf32>
    %175 = vector.shape_cast %174 : vector<1x8x32xf32> to vector<8x32xf32>
    %cst_113 = arith.constant dense<0.000000e+00> : vector<16x32xf32>
    %176 = tpu.matmul %173, %175, %cst_113 {dimension_numbers = #tpu.dot_dimension_numbers<[1], [0], [0], [1], [0, 0, 1, 1], [], []>} : vector<16x8xf32>, vector<8x32xf32>, vector<16x32xf32> -> vector<16x32xf32>
    %177 = arith.addf %135, %176 : vector<16x32xf32>
    %178 = vector.broadcast %4 : vector<1x32xf32> to vector<16x32xf32>
    %179 = arith.addf %177, %178 : vector<16x32xf32>
    %180 = arith.addf %0, %179 : vector<16x32xf32>
    %cst_114 = arith.constant dense<0.000000e+00> : vector<16xf32>
    %181 = vector.multi_reduction <add>, %180, %cst_114 [1] : vector<16x32xf32> to vector<16xf32>
    %182 = vector.shape_cast %181 : vector<16xf32> to vector<16x1xf32>
    %cst_115 = arith.constant 3.200000e+01 : f32
    %183 = vector.broadcast %cst_115 : f32 to vector<16x1xf32>
    %184 = arith.divf %182, %183 : vector<16x1xf32>
    %185 = vector.broadcast %184 : vector<16x1xf32> to vector<16x32xf32>
    %186 = arith.subf %180, %185 : vector<16x32xf32>
    %187 = arith.mulf %186, %186 : vector<16x32xf32>
    %cst_116 = arith.constant dense<0.000000e+00> : vector<16xf32>
    %188 = vector.multi_reduction <add>, %187, %cst_116 [1] : vector<16x32xf32> to vector<16xf32>
    %189 = vector.shape_cast %188 : vector<16xf32> to vector<16x1xf32>
    %cst_117 = arith.constant 3.200000e+01 : f32
    %190 = vector.broadcast %cst_117 : f32 to vector<16x1xf32>
    %191 = arith.divf %189, %190 : vector<16x1xf32>
    %192 = vector.broadcast %184 : vector<16x1xf32> to vector<16x32xf32>
    %193 = arith.subf %180, %192 : vector<16x32xf32>
    %cst_118 = arith.constant 9.99999974E-6 : f32
    %194 = vector.broadcast %cst_118 : f32 to vector<16x1xf32>
    %195 = arith.addf %191, %194 : vector<16x1xf32>
    %196 = math.rsqrt %195 : vector<16x1xf32>
    %197 = vector.broadcast %196 : vector<16x1xf32> to vector<16x32xf32>
    %198 = arith.mulf %193, %197 : vector<16x32xf32>
    %199 = vector.broadcast %7 : vector<1x32xf32> to vector<16x32xf32>
    %200 = arith.mulf %198, %199 : vector<16x32xf32>
    %201 = vector.broadcast %8 : vector<1x32xf32> to vector<16x32xf32>
    %202 = arith.addf %200, %201 : vector<16x32xf32>
    %c0_119 = arith.constant 0 : index
    %c0_120 = arith.constant 0 : index
    %c0_121 = arith.constant 0 : index
    %203 = vector.load %arg6[%c0_119, %c0_120, %c0_121] : memref<2x32x64xf32, #tpu.memory_space<vmem>>, vector<1x32x64xf32>
    %204 = vector.shape_cast %203 : vector<1x32x64xf32> to vector<32x64xf32>
    %cst_122 = arith.constant dense<0.000000e+00> : vector<16x64xf32>
    %205 = tpu.matmul %202, %204, %cst_122 {dimension_numbers = #tpu.dot_dimension_numbers<[1], [0], [0], [1], [0, 0, 1, 1], [], []>} : vector<16x32xf32>, vector<32x64xf32>, vector<16x64xf32> -> vector<16x64xf32>
    %206 = vector.broadcast %5 : vector<1x64xf32> to vector<16x64xf32>
    %207 = arith.addf %205, %206 : vector<16x64xf32>
    %cst_123 = arith.constant 0.000000e+00 : f32
    %208 = vector.broadcast %cst_123 : f32 to vector<16x64xf32>
    %209 = arith.maximumf %207, %208 : vector<16x64xf32>
    %c0_124 = arith.constant 0 : index
    %c0_125 = arith.constant 0 : index
    %c0_126 = arith.constant 0 : index
    %210 = vector.load %arg7[%c0_124, %c0_125, %c0_126] : memref<2x64x32xf32, #tpu.memory_space<vmem>>, vector<1x64x32xf32>
    %211 = vector.shape_cast %210 : vector<1x64x32xf32> to vector<64x32xf32>
    %cst_127 = arith.constant dense<0.000000e+00> : vector<16x32xf32>
    %212 = tpu.matmul %209, %211, %cst_127 {dimension_numbers = #tpu.dot_dimension_numbers<[1], [0], [0], [1], [0, 0, 1, 1], [], []>} : vector<16x64xf32>, vector<64x32xf32>, vector<16x32xf32> -> vector<16x32xf32>
    %213 = vector.broadcast %6 : vector<1x32xf32> to vector<16x32xf32>
    %214 = arith.addf %212, %213 : vector<16x32xf32>
    %215 = arith.addf %202, %214 : vector<16x32xf32>
    %cst_128 = arith.constant dense<0.000000e+00> : vector<16xf32>
    %216 = vector.multi_reduction <add>, %215, %cst_128 [1] : vector<16x32xf32> to vector<16xf32>
    %217 = vector.shape_cast %216 : vector<16xf32> to vector<16x1xf32>
    %cst_129 = arith.constant 3.200000e+01 : f32
    %218 = vector.broadcast %cst_129 : f32 to vector<16x1xf32>
    %219 = arith.divf %217, %218 : vector<16x1xf32>
    %220 = vector.broadcast %219 : vector<16x1xf32> to vector<16x32xf32>
    %221 = arith.subf %215, %220 : vector<16x32xf32>
    %222 = arith.mulf %221, %221 : vector<16x32xf32>
    %cst_130 = arith.constant dense<0.000000e+00> : vector<16xf32>
    %223 = vector.multi_reduction <add>, %222, %cst_130 [1] : vector<16x32xf32> to vector<16xf32>
    %224 = vector.shape_cast %223 : vector<16xf32> to vector<16x1xf32>
    %cst_131 = arith.constant 3.200000e+01 : f32
    %225 = vector.broadcast %cst_131 : f32 to vector<16x1xf32>
    %226 = arith.divf %224, %225 : vector<16x1xf32>
    %227 = vector.broadcast %219 : vector<16x1xf32> to vector<16x32xf32>
    %228 = arith.subf %215, %227 : vector<16x32xf32>
    %cst_132 = arith.constant 9.99999974E-6 : f32
    %229 = vector.broadcast %cst_132 : f32 to vector<16x1xf32>
    %230 = arith.addf %226, %229 : vector<16x1xf32>
    %231 = math.rsqrt %230 : vector<16x1xf32>
    %232 = vector.broadcast %231 : vector<16x1xf32> to vector<16x32xf32>
    %233 = arith.mulf %228, %232 : vector<16x32xf32>
    %234 = vector.broadcast %9 : vector<1x32xf32> to vector<16x32xf32>
    %235 = arith.mulf %233, %234 : vector<16x32xf32>
    %236 = vector.broadcast %10 : vector<1x32xf32> to vector<16x32xf32>
    %237 = arith.addf %235, %236 : vector<16x32xf32>
    %c1_133 = arith.constant 1 : index
    %c0_134 = arith.constant 0 : index
    %c0_135 = arith.constant 0 : index
    %238 = vector.load %arg8[%c1_133, %c0_134, %c0_135] : memref<2x7x64xf32, #tpu.memory_space<vmem>>, vector<1x7x64xf32>
    %239 = vector.shape_cast %238 : vector<1x7x64xf32> to vector<7x64xf32>
    %240 = vector.extract_strided_slice %239 {offsets = [0, 0], sizes = [1, 32], strides = [1, 1]} : vector<7x64xf32> to vector<1x32xf32>
    %241 = vector.extract_strided_slice %239 {offsets = [1, 0], sizes = [1, 64], strides = [1, 1]} : vector<7x64xf32> to vector<1x64xf32>
    %242 = vector.extract_strided_slice %239 {offsets = [2, 0], sizes = [1, 32], strides = [1, 1]} : vector<7x64xf32> to vector<1x32xf32>
    %243 = vector.extract_strided_slice %239 {offsets = [3, 0], sizes = [1, 32], strides = [1, 1]} : vector<7x64xf32> to vector<1x32xf32>
    %244 = vector.extract_strided_slice %239 {offsets = [4, 0], sizes = [1, 32], strides = [1, 1]} : vector<7x64xf32> to vector<1x32xf32>
    %245 = vector.extract_strided_slice %239 {offsets = [5, 0], sizes = [1, 32], strides = [1, 1]} : vector<7x64xf32> to vector<1x32xf32>
    %246 = vector.extract_strided_slice %239 {offsets = [6, 0], sizes = [1, 32], strides = [1, 1]} : vector<7x64xf32> to vector<1x32xf32>
    %c12 = arith.constant 12 : index
    %c0_136 = arith.constant 0 : index
    %c0_137 = arith.constant 0 : index
    %247 = vector.load %arg3[%c12, %c0_136, %c0_137] : memref<24x32x8xf32, #tpu.memory_space<vmem>>, vector<1x32x8xf32>
    %248 = vector.shape_cast %247 : vector<1x32x8xf32> to vector<32x8xf32>
    %cst_138 = arith.constant dense<0.000000e+00> : vector<16x8xf32>
    %249 = tpu.matmul %237, %248, %cst_138 {dimension_numbers = #tpu.dot_dimension_numbers<[1], [0], [0], [1], [0, 0, 1, 1], [], []>} : vector<16x32xf32>, vector<32x8xf32>, vector<16x8xf32> -> vector<16x8xf32>
    %c12_139 = arith.constant 12 : index
    %c0_140 = arith.constant 0 : index
    %c0_141 = arith.constant 0 : index
    %250 = vector.load %arg4[%c12_139, %c0_140, %c0_141] : memref<24x1x8xf32, #tpu.memory_space<vmem>>, vector<1x1x8xf32>
    %251 = vector.shape_cast %250 : vector<1x1x8xf32> to vector<1x8xf32>
    %252 = vector.broadcast %251 : vector<1x8xf32> to vector<16x8xf32>
    %253 = arith.addf %249, %252 : vector<16x8xf32>
    %c16 = arith.constant 16 : index
    %c0_142 = arith.constant 0 : index
    %c0_143 = arith.constant 0 : index
    %254 = vector.load %arg3[%c16, %c0_142, %c0_143] : memref<24x32x8xf32, #tpu.memory_space<vmem>>, vector<1x32x8xf32>
    %255 = vector.shape_cast %254 : vector<1x32x8xf32> to vector<32x8xf32>
    %cst_144 = arith.constant dense<0.000000e+00> : vector<16x8xf32>
    %256 = tpu.matmul %237, %255, %cst_144 {dimension_numbers = #tpu.dot_dimension_numbers<[1], [0], [0], [1], [0, 0, 1, 1], [], []>} : vector<16x32xf32>, vector<32x8xf32>, vector<16x8xf32> -> vector<16x8xf32>
    %c16_145 = arith.constant 16 : index
    %c0_146 = arith.constant 0 : index
    %c0_147 = arith.constant 0 : index
    %257 = vector.load %arg4[%c16_145, %c0_146, %c0_147] : memref<24x1x8xf32, #tpu.memory_space<vmem>>, vector<1x1x8xf32>
    %258 = vector.shape_cast %257 : vector<1x1x8xf32> to vector<1x8xf32>
    %259 = vector.broadcast %258 : vector<1x8xf32> to vector<16x8xf32>
    %260 = arith.addf %256, %259 : vector<16x8xf32>
    %c20 = arith.constant 20 : index
    %c0_148 = arith.constant 0 : index
    %c0_149 = arith.constant 0 : index
    %261 = vector.load %arg3[%c20, %c0_148, %c0_149] : memref<24x32x8xf32, #tpu.memory_space<vmem>>, vector<1x32x8xf32>
    %262 = vector.shape_cast %261 : vector<1x32x8xf32> to vector<32x8xf32>
    %cst_150 = arith.constant dense<0.000000e+00> : vector<16x8xf32>
    %263 = tpu.matmul %237, %262, %cst_150 {dimension_numbers = #tpu.dot_dimension_numbers<[1], [0], [0], [1], [0, 0, 1, 1], [], []>} : vector<16x32xf32>, vector<32x8xf32>, vector<16x8xf32> -> vector<16x8xf32>
    %c20_151 = arith.constant 20 : index
    %c0_152 = arith.constant 0 : index
    %c0_153 = arith.constant 0 : index
    %264 = vector.load %arg4[%c20_151, %c0_152, %c0_153] : memref<24x1x8xf32, #tpu.memory_space<vmem>>, vector<1x1x8xf32>
    %265 = vector.shape_cast %264 : vector<1x1x8xf32> to vector<1x8xf32>
    %266 = vector.broadcast %265 : vector<1x8xf32> to vector<16x8xf32>
    %267 = arith.addf %263, %266 : vector<16x8xf32>
    %cst_154 = arith.constant dense<0.000000e+00> : vector<16x16xf32>
    %268 = tpu.matmul %253, %260, %cst_154 {dimension_numbers = #tpu.dot_dimension_numbers<[1], [1], [0], [0], [0, 0, 1, 0], [], []>} : vector<16x8xf32>, vector<16x8xf32>, vector<16x16xf32> -> vector<16x16xf32>
    %269 = arith.addf %268, %1 : vector<16x16xf32>
    %cst_155 = arith.constant dense<0xFF800000> : vector<16xf32>
    %270 = vector.multi_reduction <maximumf>, %269, %cst_155 [1] : vector<16x16xf32> to vector<16xf32>
    %271 = vector.shape_cast %270 : vector<16xf32> to vector<16x1xf32>
    %272 = vector.broadcast %271 : vector<16x1xf32> to vector<16x16xf32>
    %273 = arith.subf %269, %272 : vector<16x16xf32>
    %274 = math.exp %273 : vector<16x16xf32>
    %cst_156 = arith.constant dense<0.000000e+00> : vector<16xf32>
    %275 = vector.multi_reduction <add>, %274, %cst_156 [1] : vector<16x16xf32> to vector<16xf32>
    %276 = vector.shape_cast %275 : vector<16xf32> to vector<16x1xf32>
    %277 = tpu.reciprocal %276 {approx = true} : vector<16x1xf32> -> vector<16x1xf32>
    %278 = arith.mulf %276, %277 : vector<16x1xf32>
    %cst_157 = arith.constant 2.000000e+00 : f32
    %279 = vector.broadcast %cst_157 : f32 to vector<16x1xf32>
    %280 = arith.subf %279, %278 : vector<16x1xf32>
    %281 = arith.mulf %277, %280 : vector<16x1xf32>
    %282 = vector.broadcast %281 : vector<16x1xf32> to vector<16x16xf32>
    %283 = arith.mulf %274, %282 : vector<16x16xf32>
    %cst_158 = arith.constant dense<0.000000e+00> : vector<16x8xf32>
    %284 = tpu.matmul %283, %267, %cst_158 {dimension_numbers = #tpu.dot_dimension_numbers<[1], [0], [0], [1], [0, 0, 1, 1], [], []>} : vector<16x16xf32>, vector<16x8xf32>, vector<16x8xf32> -> vector<16x8xf32>
    %c4_159 = arith.constant 4 : index
    %c0_160 = arith.constant 0 : index
    %c0_161 = arith.constant 0 : index
    %285 = vector.load %arg5[%c4_159, %c0_160, %c0_161] : memref<8x8x32xf32, #tpu.memory_space<vmem>>, vector<1x8x32xf32>
    %286 = vector.shape_cast %285 : vector<1x8x32xf32> to vector<8x32xf32>
    %cst_162 = arith.constant dense<0.000000e+00> : vector<16x32xf32>
    %287 = tpu.matmul %284, %286, %cst_162 {dimension_numbers = #tpu.dot_dimension_numbers<[1], [0], [0], [1], [0, 0, 1, 1], [], []>} : vector<16x8xf32>, vector<8x32xf32>, vector<16x32xf32> -> vector<16x32xf32>
    %c13 = arith.constant 13 : index
    %c0_163 = arith.constant 0 : index
    %c0_164 = arith.constant 0 : index
    %288 = vector.load %arg3[%c13, %c0_163, %c0_164] : memref<24x32x8xf32, #tpu.memory_space<vmem>>, vector<1x32x8xf32>
    %289 = vector.shape_cast %288 : vector<1x32x8xf32> to vector<32x8xf32>
    %cst_165 = arith.constant dense<0.000000e+00> : vector<16x8xf32>
    %290 = tpu.matmul %237, %289, %cst_165 {dimension_numbers = #tpu.dot_dimension_numbers<[1], [0], [0], [1], [0, 0, 1, 1], [], []>} : vector<16x32xf32>, vector<32x8xf32>, vector<16x8xf32> -> vector<16x8xf32>
    %c13_166 = arith.constant 13 : index
    %c0_167 = arith.constant 0 : index
    %c0_168 = arith.constant 0 : index
    %291 = vector.load %arg4[%c13_166, %c0_167, %c0_168] : memref<24x1x8xf32, #tpu.memory_space<vmem>>, vector<1x1x8xf32>
    %292 = vector.shape_cast %291 : vector<1x1x8xf32> to vector<1x8xf32>
    %293 = vector.broadcast %292 : vector<1x8xf32> to vector<16x8xf32>
    %294 = arith.addf %290, %293 : vector<16x8xf32>
    %c17 = arith.constant 17 : index
    %c0_169 = arith.constant 0 : index
    %c0_170 = arith.constant 0 : index
    %295 = vector.load %arg3[%c17, %c0_169, %c0_170] : memref<24x32x8xf32, #tpu.memory_space<vmem>>, vector<1x32x8xf32>
    %296 = vector.shape_cast %295 : vector<1x32x8xf32> to vector<32x8xf32>
    %cst_171 = arith.constant dense<0.000000e+00> : vector<16x8xf32>
    %297 = tpu.matmul %237, %296, %cst_171 {dimension_numbers = #tpu.dot_dimension_numbers<[1], [0], [0], [1], [0, 0, 1, 1], [], []>} : vector<16x32xf32>, vector<32x8xf32>, vector<16x8xf32> -> vector<16x8xf32>
    %c17_172 = arith.constant 17 : index
    %c0_173 = arith.constant 0 : index
    %c0_174 = arith.constant 0 : index
    %298 = vector.load %arg4[%c17_172, %c0_173, %c0_174] : memref<24x1x8xf32, #tpu.memory_space<vmem>>, vector<1x1x8xf32>
    %299 = vector.shape_cast %298 : vector<1x1x8xf32> to vector<1x8xf32>
    %300 = vector.broadcast %299 : vector<1x8xf32> to vector<16x8xf32>
    %301 = arith.addf %297, %300 : vector<16x8xf32>
    %c21 = arith.constant 21 : index
    %c0_175 = arith.constant 0 : index
    %c0_176 = arith.constant 0 : index
    %302 = vector.load %arg3[%c21, %c0_175, %c0_176] : memref<24x32x8xf32, #tpu.memory_space<vmem>>, vector<1x32x8xf32>
    %303 = vector.shape_cast %302 : vector<1x32x8xf32> to vector<32x8xf32>
    %cst_177 = arith.constant dense<0.000000e+00> : vector<16x8xf32>
    %304 = tpu.matmul %237, %303, %cst_177 {dimension_numbers = #tpu.dot_dimension_numbers<[1], [0], [0], [1], [0, 0, 1, 1], [], []>} : vector<16x32xf32>, vector<32x8xf32>, vector<16x8xf32> -> vector<16x8xf32>
    %c21_178 = arith.constant 21 : index
    %c0_179 = arith.constant 0 : index
    %c0_180 = arith.constant 0 : index
    %305 = vector.load %arg4[%c21_178, %c0_179, %c0_180] : memref<24x1x8xf32, #tpu.memory_space<vmem>>, vector<1x1x8xf32>
    %306 = vector.shape_cast %305 : vector<1x1x8xf32> to vector<1x8xf32>
    %307 = vector.broadcast %306 : vector<1x8xf32> to vector<16x8xf32>
    %308 = arith.addf %304, %307 : vector<16x8xf32>
    %cst_181 = arith.constant dense<0.000000e+00> : vector<16x16xf32>
    %309 = tpu.matmul %294, %301, %cst_181 {dimension_numbers = #tpu.dot_dimension_numbers<[1], [1], [0], [0], [0, 0, 1, 0], [], []>} : vector<16x8xf32>, vector<16x8xf32>, vector<16x16xf32> -> vector<16x16xf32>
    %310 = arith.addf %309, %1 : vector<16x16xf32>
    %cst_182 = arith.constant dense<0xFF800000> : vector<16xf32>
    %311 = vector.multi_reduction <maximumf>, %310, %cst_182 [1] : vector<16x16xf32> to vector<16xf32>
    %312 = vector.shape_cast %311 : vector<16xf32> to vector<16x1xf32>
    %313 = vector.broadcast %312 : vector<16x1xf32> to vector<16x16xf32>
    %314 = arith.subf %310, %313 : vector<16x16xf32>
    %315 = math.exp %314 : vector<16x16xf32>
    %cst_183 = arith.constant dense<0.000000e+00> : vector<16xf32>
    %316 = vector.multi_reduction <add>, %315, %cst_183 [1] : vector<16x16xf32> to vector<16xf32>
    %317 = vector.shape_cast %316 : vector<16xf32> to vector<16x1xf32>
    %318 = tpu.reciprocal %317 {approx = true} : vector<16x1xf32> -> vector<16x1xf32>
    %319 = arith.mulf %317, %318 : vector<16x1xf32>
    %cst_184 = arith.constant 2.000000e+00 : f32
    %320 = vector.broadcast %cst_184 : f32 to vector<16x1xf32>
    %321 = arith.subf %320, %319 : vector<16x1xf32>
    %322 = arith.mulf %318, %321 : vector<16x1xf32>
    %323 = vector.broadcast %322 : vector<16x1xf32> to vector<16x16xf32>
    %324 = arith.mulf %315, %323 : vector<16x16xf32>
    %cst_185 = arith.constant dense<0.000000e+00> : vector<16x8xf32>
    %325 = tpu.matmul %324, %308, %cst_185 {dimension_numbers = #tpu.dot_dimension_numbers<[1], [0], [0], [1], [0, 0, 1, 1], [], []>} : vector<16x16xf32>, vector<16x8xf32>, vector<16x8xf32> -> vector<16x8xf32>
    %c5_186 = arith.constant 5 : index
    %c0_187 = arith.constant 0 : index
    %c0_188 = arith.constant 0 : index
    %326 = vector.load %arg5[%c5_186, %c0_187, %c0_188] : memref<8x8x32xf32, #tpu.memory_space<vmem>>, vector<1x8x32xf32>
    %327 = vector.shape_cast %326 : vector<1x8x32xf32> to vector<8x32xf32>
    %cst_189 = arith.constant dense<0.000000e+00> : vector<16x32xf32>
    %328 = tpu.matmul %325, %327, %cst_189 {dimension_numbers = #tpu.dot_dimension_numbers<[1], [0], [0], [1], [0, 0, 1, 1], [], []>} : vector<16x8xf32>, vector<8x32xf32>, vector<16x32xf32> -> vector<16x32xf32>
    %329 = arith.addf %287, %328 : vector<16x32xf32>
    %c14 = arith.constant 14 : index
    %c0_190 = arith.constant 0 : index
    %c0_191 = arith.constant 0 : index
    %330 = vector.load %arg3[%c14, %c0_190, %c0_191] : memref<24x32x8xf32, #tpu.memory_space<vmem>>, vector<1x32x8xf32>
    %331 = vector.shape_cast %330 : vector<1x32x8xf32> to vector<32x8xf32>
    %cst_192 = arith.constant dense<0.000000e+00> : vector<16x8xf32>
    %332 = tpu.matmul %237, %331, %cst_192 {dimension_numbers = #tpu.dot_dimension_numbers<[1], [0], [0], [1], [0, 0, 1, 1], [], []>} : vector<16x32xf32>, vector<32x8xf32>, vector<16x8xf32> -> vector<16x8xf32>
    %c14_193 = arith.constant 14 : index
    %c0_194 = arith.constant 0 : index
    %c0_195 = arith.constant 0 : index
    %333 = vector.load %arg4[%c14_193, %c0_194, %c0_195] : memref<24x1x8xf32, #tpu.memory_space<vmem>>, vector<1x1x8xf32>
    %334 = vector.shape_cast %333 : vector<1x1x8xf32> to vector<1x8xf32>
    %335 = vector.broadcast %334 : vector<1x8xf32> to vector<16x8xf32>
    %336 = arith.addf %332, %335 : vector<16x8xf32>
    %c18 = arith.constant 18 : index
    %c0_196 = arith.constant 0 : index
    %c0_197 = arith.constant 0 : index
    %337 = vector.load %arg3[%c18, %c0_196, %c0_197] : memref<24x32x8xf32, #tpu.memory_space<vmem>>, vector<1x32x8xf32>
    %338 = vector.shape_cast %337 : vector<1x32x8xf32> to vector<32x8xf32>
    %cst_198 = arith.constant dense<0.000000e+00> : vector<16x8xf32>
    %339 = tpu.matmul %237, %338, %cst_198 {dimension_numbers = #tpu.dot_dimension_numbers<[1], [0], [0], [1], [0, 0, 1, 1], [], []>} : vector<16x32xf32>, vector<32x8xf32>, vector<16x8xf32> -> vector<16x8xf32>
    %c18_199 = arith.constant 18 : index
    %c0_200 = arith.constant 0 : index
    %c0_201 = arith.constant 0 : index
    %340 = vector.load %arg4[%c18_199, %c0_200, %c0_201] : memref<24x1x8xf32, #tpu.memory_space<vmem>>, vector<1x1x8xf32>
    %341 = vector.shape_cast %340 : vector<1x1x8xf32> to vector<1x8xf32>
    %342 = vector.broadcast %341 : vector<1x8xf32> to vector<16x8xf32>
    %343 = arith.addf %339, %342 : vector<16x8xf32>
    %c22 = arith.constant 22 : index
    %c0_202 = arith.constant 0 : index
    %c0_203 = arith.constant 0 : index
    %344 = vector.load %arg3[%c22, %c0_202, %c0_203] : memref<24x32x8xf32, #tpu.memory_space<vmem>>, vector<1x32x8xf32>
    %345 = vector.shape_cast %344 : vector<1x32x8xf32> to vector<32x8xf32>
    %cst_204 = arith.constant dense<0.000000e+00> : vector<16x8xf32>
    %346 = tpu.matmul %237, %345, %cst_204 {dimension_numbers = #tpu.dot_dimension_numbers<[1], [0], [0], [1], [0, 0, 1, 1], [], []>} : vector<16x32xf32>, vector<32x8xf32>, vector<16x8xf32> -> vector<16x8xf32>
    %c22_205 = arith.constant 22 : index
    %c0_206 = arith.constant 0 : index
    %c0_207 = arith.constant 0 : index
    %347 = vector.load %arg4[%c22_205, %c0_206, %c0_207] : memref<24x1x8xf32, #tpu.memory_space<vmem>>, vector<1x1x8xf32>
    %348 = vector.shape_cast %347 : vector<1x1x8xf32> to vector<1x8xf32>
    %349 = vector.broadcast %348 : vector<1x8xf32> to vector<16x8xf32>
    %350 = arith.addf %346, %349 : vector<16x8xf32>
    %cst_208 = arith.constant dense<0.000000e+00> : vector<16x16xf32>
    %351 = tpu.matmul %336, %343, %cst_208 {dimension_numbers = #tpu.dot_dimension_numbers<[1], [1], [0], [0], [0, 0, 1, 0], [], []>} : vector<16x8xf32>, vector<16x8xf32>, vector<16x16xf32> -> vector<16x16xf32>
    %352 = arith.addf %351, %1 : vector<16x16xf32>
    %cst_209 = arith.constant dense<0xFF800000> : vector<16xf32>
    %353 = vector.multi_reduction <maximumf>, %352, %cst_209 [1] : vector<16x16xf32> to vector<16xf32>
    %354 = vector.shape_cast %353 : vector<16xf32> to vector<16x1xf32>
    %355 = vector.broadcast %354 : vector<16x1xf32> to vector<16x16xf32>
    %356 = arith.subf %352, %355 : vector<16x16xf32>
    %357 = math.exp %356 : vector<16x16xf32>
    %cst_210 = arith.constant dense<0.000000e+00> : vector<16xf32>
    %358 = vector.multi_reduction <add>, %357, %cst_210 [1] : vector<16x16xf32> to vector<16xf32>
    %359 = vector.shape_cast %358 : vector<16xf32> to vector<16x1xf32>
    %360 = tpu.reciprocal %359 {approx = true} : vector<16x1xf32> -> vector<16x1xf32>
    %361 = arith.mulf %359, %360 : vector<16x1xf32>
    %cst_211 = arith.constant 2.000000e+00 : f32
    %362 = vector.broadcast %cst_211 : f32 to vector<16x1xf32>
    %363 = arith.subf %362, %361 : vector<16x1xf32>
    %364 = arith.mulf %360, %363 : vector<16x1xf32>
    %365 = vector.broadcast %364 : vector<16x1xf32> to vector<16x16xf32>
    %366 = arith.mulf %357, %365 : vector<16x16xf32>
    %cst_212 = arith.constant dense<0.000000e+00> : vector<16x8xf32>
    %367 = tpu.matmul %366, %350, %cst_212 {dimension_numbers = #tpu.dot_dimension_numbers<[1], [0], [0], [1], [0, 0, 1, 1], [], []>} : vector<16x16xf32>, vector<16x8xf32>, vector<16x8xf32> -> vector<16x8xf32>
    %c6_213 = arith.constant 6 : index
    %c0_214 = arith.constant 0 : index
    %c0_215 = arith.constant 0 : index
    %368 = vector.load %arg5[%c6_213, %c0_214, %c0_215] : memref<8x8x32xf32, #tpu.memory_space<vmem>>, vector<1x8x32xf32>
    %369 = vector.shape_cast %368 : vector<1x8x32xf32> to vector<8x32xf32>
    %cst_216 = arith.constant dense<0.000000e+00> : vector<16x32xf32>
    %370 = tpu.matmul %367, %369, %cst_216 {dimension_numbers = #tpu.dot_dimension_numbers<[1], [0], [0], [1], [0, 0, 1, 1], [], []>} : vector<16x8xf32>, vector<8x32xf32>, vector<16x32xf32> -> vector<16x32xf32>
    %371 = arith.addf %329, %370 : vector<16x32xf32>
    %c15 = arith.constant 15 : index
    %c0_217 = arith.constant 0 : index
    %c0_218 = arith.constant 0 : index
    %372 = vector.load %arg3[%c15, %c0_217, %c0_218] : memref<24x32x8xf32, #tpu.memory_space<vmem>>, vector<1x32x8xf32>
    %373 = vector.shape_cast %372 : vector<1x32x8xf32> to vector<32x8xf32>
    %cst_219 = arith.constant dense<0.000000e+00> : vector<16x8xf32>
    %374 = tpu.matmul %237, %373, %cst_219 {dimension_numbers = #tpu.dot_dimension_numbers<[1], [0], [0], [1], [0, 0, 1, 1], [], []>} : vector<16x32xf32>, vector<32x8xf32>, vector<16x8xf32> -> vector<16x8xf32>
    %c15_220 = arith.constant 15 : index
    %c0_221 = arith.constant 0 : index
    %c0_222 = arith.constant 0 : index
    %375 = vector.load %arg4[%c15_220, %c0_221, %c0_222] : memref<24x1x8xf32, #tpu.memory_space<vmem>>, vector<1x1x8xf32>
    %376 = vector.shape_cast %375 : vector<1x1x8xf32> to vector<1x8xf32>
    %377 = vector.broadcast %376 : vector<1x8xf32> to vector<16x8xf32>
    %378 = arith.addf %374, %377 : vector<16x8xf32>
    %c19 = arith.constant 19 : index
    %c0_223 = arith.constant 0 : index
    %c0_224 = arith.constant 0 : index
    %379 = vector.load %arg3[%c19, %c0_223, %c0_224] : memref<24x32x8xf32, #tpu.memory_space<vmem>>, vector<1x32x8xf32>
    %380 = vector.shape_cast %379 : vector<1x32x8xf32> to vector<32x8xf32>
    %cst_225 = arith.constant dense<0.000000e+00> : vector<16x8xf32>
    %381 = tpu.matmul %237, %380, %cst_225 {dimension_numbers = #tpu.dot_dimension_numbers<[1], [0], [0], [1], [0, 0, 1, 1], [], []>} : vector<16x32xf32>, vector<32x8xf32>, vector<16x8xf32> -> vector<16x8xf32>
    %c19_226 = arith.constant 19 : index
    %c0_227 = arith.constant 0 : index
    %c0_228 = arith.constant 0 : index
    %382 = vector.load %arg4[%c19_226, %c0_227, %c0_228] : memref<24x1x8xf32, #tpu.memory_space<vmem>>, vector<1x1x8xf32>
    %383 = vector.shape_cast %382 : vector<1x1x8xf32> to vector<1x8xf32>
    %384 = vector.broadcast %383 : vector<1x8xf32> to vector<16x8xf32>
    %385 = arith.addf %381, %384 : vector<16x8xf32>
    %c23 = arith.constant 23 : index
    %c0_229 = arith.constant 0 : index
    %c0_230 = arith.constant 0 : index
    %386 = vector.load %arg3[%c23, %c0_229, %c0_230] : memref<24x32x8xf32, #tpu.memory_space<vmem>>, vector<1x32x8xf32>
    %387 = vector.shape_cast %386 : vector<1x32x8xf32> to vector<32x8xf32>
    %cst_231 = arith.constant dense<0.000000e+00> : vector<16x8xf32>
    %388 = tpu.matmul %237, %387, %cst_231 {dimension_numbers = #tpu.dot_dimension_numbers<[1], [0], [0], [1], [0, 0, 1, 1], [], []>} : vector<16x32xf32>, vector<32x8xf32>, vector<16x8xf32> -> vector<16x8xf32>
    %c23_232 = arith.constant 23 : index
    %c0_233 = arith.constant 0 : index
    %c0_234 = arith.constant 0 : index
    %389 = vector.load %arg4[%c23_232, %c0_233, %c0_234] : memref<24x1x8xf32, #tpu.memory_space<vmem>>, vector<1x1x8xf32>
    %390 = vector.shape_cast %389 : vector<1x1x8xf32> to vector<1x8xf32>
    %391 = vector.broadcast %390 : vector<1x8xf32> to vector<16x8xf32>
    %392 = arith.addf %388, %391 : vector<16x8xf32>
    %cst_235 = arith.constant dense<0.000000e+00> : vector<16x16xf32>
    %393 = tpu.matmul %378, %385, %cst_235 {dimension_numbers = #tpu.dot_dimension_numbers<[1], [1], [0], [0], [0, 0, 1, 0], [], []>} : vector<16x8xf32>, vector<16x8xf32>, vector<16x16xf32> -> vector<16x16xf32>
    %394 = arith.addf %393, %1 : vector<16x16xf32>
    %cst_236 = arith.constant dense<0xFF800000> : vector<16xf32>
    %395 = vector.multi_reduction <maximumf>, %394, %cst_236 [1] : vector<16x16xf32> to vector<16xf32>
    %396 = vector.shape_cast %395 : vector<16xf32> to vector<16x1xf32>
    %397 = vector.broadcast %396 : vector<16x1xf32> to vector<16x16xf32>
    %398 = arith.subf %394, %397 : vector<16x16xf32>
    %399 = math.exp %398 : vector<16x16xf32>
    %cst_237 = arith.constant dense<0.000000e+00> : vector<16xf32>
    %400 = vector.multi_reduction <add>, %399, %cst_237 [1] : vector<16x16xf32> to vector<16xf32>
    %401 = vector.shape_cast %400 : vector<16xf32> to vector<16x1xf32>
    %402 = tpu.reciprocal %401 {approx = true} : vector<16x1xf32> -> vector<16x1xf32>
    %403 = arith.mulf %401, %402 : vector<16x1xf32>
    %cst_238 = arith.constant 2.000000e+00 : f32
    %404 = vector.broadcast %cst_238 : f32 to vector<16x1xf32>
    %405 = arith.subf %404, %403 : vector<16x1xf32>
    %406 = arith.mulf %402, %405 : vector<16x1xf32>
    %407 = vector.broadcast %406 : vector<16x1xf32> to vector<16x16xf32>
    %408 = arith.mulf %399, %407 : vector<16x16xf32>
    %cst_239 = arith.constant dense<0.000000e+00> : vector<16x8xf32>
    %409 = tpu.matmul %408, %392, %cst_239 {dimension_numbers = #tpu.dot_dimension_numbers<[1], [0], [0], [1], [0, 0, 1, 1], [], []>} : vector<16x16xf32>, vector<16x8xf32>, vector<16x8xf32> -> vector<16x8xf32>
    %c7_240 = arith.constant 7 : index
    %c0_241 = arith.constant 0 : index
    %c0_242 = arith.constant 0 : index
    %410 = vector.load %arg5[%c7_240, %c0_241, %c0_242] : memref<8x8x32xf32, #tpu.memory_space<vmem>>, vector<1x8x32xf32>
    %411 = vector.shape_cast %410 : vector<1x8x32xf32> to vector<8x32xf32>
    %cst_243 = arith.constant dense<0.000000e+00> : vector<16x32xf32>
    %412 = tpu.matmul %409, %411, %cst_243 {dimension_numbers = #tpu.dot_dimension_numbers<[1], [0], [0], [1], [0, 0, 1, 1], [], []>} : vector<16x8xf32>, vector<8x32xf32>, vector<16x32xf32> -> vector<16x32xf32>
    %413 = arith.addf %371, %412 : vector<16x32xf32>
    %414 = vector.broadcast %240 : vector<1x32xf32> to vector<16x32xf32>
    %415 = arith.addf %413, %414 : vector<16x32xf32>
    %416 = arith.addf %237, %415 : vector<16x32xf32>
    %cst_244 = arith.constant dense<0.000000e+00> : vector<16xf32>
    %417 = vector.multi_reduction <add>, %416, %cst_244 [1] : vector<16x32xf32> to vector<16xf32>
    %418 = vector.shape_cast %417 : vector<16xf32> to vector<16x1xf32>
    %cst_245 = arith.constant 3.200000e+01 : f32
    %419 = vector.broadcast %cst_245 : f32 to vector<16x1xf32>
    %420 = arith.divf %418, %419 : vector<16x1xf32>
    %421 = vector.broadcast %420 : vector<16x1xf32> to vector<16x32xf32>
    %422 = arith.subf %416, %421 : vector<16x32xf32>
    %423 = arith.mulf %422, %422 : vector<16x32xf32>
    %cst_246 = arith.constant dense<0.000000e+00> : vector<16xf32>
    %424 = vector.multi_reduction <add>, %423, %cst_246 [1] : vector<16x32xf32> to vector<16xf32>
    %425 = vector.shape_cast %424 : vector<16xf32> to vector<16x1xf32>
    %cst_247 = arith.constant 3.200000e+01 : f32
    %426 = vector.broadcast %cst_247 : f32 to vector<16x1xf32>
    %427 = arith.divf %425, %426 : vector<16x1xf32>
    %428 = vector.broadcast %420 : vector<16x1xf32> to vector<16x32xf32>
    %429 = arith.subf %416, %428 : vector<16x32xf32>
    %cst_248 = arith.constant 9.99999974E-6 : f32
    %430 = vector.broadcast %cst_248 : f32 to vector<16x1xf32>
    %431 = arith.addf %427, %430 : vector<16x1xf32>
    %432 = math.rsqrt %431 : vector<16x1xf32>
    %433 = vector.broadcast %432 : vector<16x1xf32> to vector<16x32xf32>
    %434 = arith.mulf %429, %433 : vector<16x32xf32>
    %435 = vector.broadcast %243 : vector<1x32xf32> to vector<16x32xf32>
    %436 = arith.mulf %434, %435 : vector<16x32xf32>
    %437 = vector.broadcast %244 : vector<1x32xf32> to vector<16x32xf32>
    %438 = arith.addf %436, %437 : vector<16x32xf32>
    %c1_249 = arith.constant 1 : index
    %c0_250 = arith.constant 0 : index
    %c0_251 = arith.constant 0 : index
    %439 = vector.load %arg6[%c1_249, %c0_250, %c0_251] : memref<2x32x64xf32, #tpu.memory_space<vmem>>, vector<1x32x64xf32>
    %440 = vector.shape_cast %439 : vector<1x32x64xf32> to vector<32x64xf32>
    %cst_252 = arith.constant dense<0.000000e+00> : vector<16x64xf32>
    %441 = tpu.matmul %438, %440, %cst_252 {dimension_numbers = #tpu.dot_dimension_numbers<[1], [0], [0], [1], [0, 0, 1, 1], [], []>} : vector<16x32xf32>, vector<32x64xf32>, vector<16x64xf32> -> vector<16x64xf32>
    %442 = vector.broadcast %241 : vector<1x64xf32> to vector<16x64xf32>
    %443 = arith.addf %441, %442 : vector<16x64xf32>
    %cst_253 = arith.constant 0.000000e+00 : f32
    %444 = vector.broadcast %cst_253 : f32 to vector<16x64xf32>
    %445 = arith.maximumf %443, %444 : vector<16x64xf32>
    %c1_254 = arith.constant 1 : index
    %c0_255 = arith.constant 0 : index
    %c0_256 = arith.constant 0 : index
    %446 = vector.load %arg7[%c1_254, %c0_255, %c0_256] : memref<2x64x32xf32, #tpu.memory_space<vmem>>, vector<1x64x32xf32>
    %447 = vector.shape_cast %446 : vector<1x64x32xf32> to vector<64x32xf32>
    %cst_257 = arith.constant dense<0.000000e+00> : vector<16x32xf32>
    %448 = tpu.matmul %445, %447, %cst_257 {dimension_numbers = #tpu.dot_dimension_numbers<[1], [0], [0], [1], [0, 0, 1, 1], [], []>} : vector<16x64xf32>, vector<64x32xf32>, vector<16x32xf32> -> vector<16x32xf32>
    %449 = vector.broadcast %242 : vector<1x32xf32> to vector<16x32xf32>
    %450 = arith.addf %448, %449 : vector<16x32xf32>
    %451 = arith.addf %438, %450 : vector<16x32xf32>
    %cst_258 = arith.constant dense<0.000000e+00> : vector<16xf32>
    %452 = vector.multi_reduction <add>, %451, %cst_258 [1] : vector<16x32xf32> to vector<16xf32>
    %453 = vector.shape_cast %452 : vector<16xf32> to vector<16x1xf32>
    %cst_259 = arith.constant 3.200000e+01 : f32
    %454 = vector.broadcast %cst_259 : f32 to vector<16x1xf32>
    %455 = arith.divf %453, %454 : vector<16x1xf32>
    %456 = vector.broadcast %455 : vector<16x1xf32> to vector<16x32xf32>
    %457 = arith.subf %451, %456 : vector<16x32xf32>
    %458 = arith.mulf %457, %457 : vector<16x32xf32>
    %cst_260 = arith.constant dense<0.000000e+00> : vector<16xf32>
    %459 = vector.multi_reduction <add>, %458, %cst_260 [1] : vector<16x32xf32> to vector<16xf32>
    %460 = vector.shape_cast %459 : vector<16xf32> to vector<16x1xf32>
    %cst_261 = arith.constant 3.200000e+01 : f32
    %461 = vector.broadcast %cst_261 : f32 to vector<16x1xf32>
    %462 = arith.divf %460, %461 : vector<16x1xf32>
    %463 = vector.broadcast %455 : vector<16x1xf32> to vector<16x32xf32>
    %464 = arith.subf %451, %463 : vector<16x32xf32>
    %cst_262 = arith.constant 9.99999974E-6 : f32
    %465 = vector.broadcast %cst_262 : f32 to vector<16x1xf32>
    %466 = arith.addf %462, %465 : vector<16x1xf32>
    %467 = math.rsqrt %466 : vector<16x1xf32>
    %468 = vector.broadcast %467 : vector<16x1xf32> to vector<16x32xf32>
    %469 = arith.mulf %464, %468 : vector<16x32xf32>
    %470 = vector.broadcast %245 : vector<1x32xf32> to vector<16x32xf32>
    %471 = arith.mulf %469, %470 : vector<16x32xf32>
    %472 = vector.broadcast %246 : vector<1x32xf32> to vector<16x32xf32>
    %473 = arith.addf %471, %472 : vector<16x32xf32>
    %c0_263 = arith.constant 0 : index
    %c0_264 = arith.constant 0 : index
    %474 = vector.load %arg9[%c0_263, %c0_264] : memref<16x32xf32, #tpu.memory_space<vmem>>, vector<16x32xf32>
    tpu.vector_store %arg9[%c0_263, %c0_264], %473 {strides = array<i32>} : memref<16x32xf32, #tpu.memory_space<vmem>>, vector<16x32xf32>,
    return
  }
  func.func @transform_0(%arg0: i32) -> (i32, i32) {
    %c0_i32 = arith.constant 0 : i32
    %c0_i32_0 = arith.constant 0 : i32
    %c0_i32_1 = arith.constant 0 : i32
    return %c0_i32, %c0_i32_0 : i32, i32
  }
  func.func @transform_1(%arg0: i32) -> (i32, i32) {
    %c0_i32 = arith.constant 0 : i32
    %c0_i32_0 = arith.constant 0 : i32
    %c0_i32_1 = arith.constant 0 : i32
    return %c0_i32, %c0_i32_0 : i32, i32
  }
  func.func @transform_2(%arg0: i32) -> (i32, i32, i32) {
    %c0_i32 = arith.constant 0 : i32
    %c0_i32_0 = arith.constant 0 : i32
    %c0_i32_1 = arith.constant 0 : i32
    %c0_i32_2 = arith.constant 0 : i32
    return %c0_i32, %c0_i32_0, %c0_i32_1 : i32, i32, i32
  }
  func.func @transform_3(%arg0: i32) -> (i32, i32, i32) {
    %c0_i32 = arith.constant 0 : i32
    %c0_i32_0 = arith.constant 0 : i32
    %c0_i32_1 = arith.constant 0 : i32
    %c0_i32_2 = arith.constant 0 : i32
    return %c0_i32, %c0_i32_0, %c0_i32_1 : i32, i32, i32
  }
  func.func @transform_4(%arg0: i32) -> (i32, i32, i32) {
    %c0_i32 = arith.constant 0 : i32
    %c0_i32_0 = arith.constant 0 : i32
    %c0_i32_1 = arith.constant 0 : i32
    %c0_i32_2 = arith.constant 0 : i32
    return %c0_i32, %c0_i32_0, %c0_i32_1 : i32, i32, i32
  }
  func.func @transform_5(%arg0: i32) -> (i32, i32, i32) {
    %c0_i32 = arith.constant 0 : i32
    %c0_i32_0 = arith.constant 0 : i32
    %c0_i32_1 = arith.constant 0 : i32
    %c0_i32_2 = arith.constant 0 : i32
    return %c0_i32, %c0_i32_0, %c0_i32_1 : i32, i32, i32
  }
  func.func @transform_6(%arg0: i32) -> (i32, i32, i32) {
    %c0_i32 = arith.constant 0 : i32
    %c0_i32_0 = arith.constant 0 : i32
    %c0_i32_1 = arith.constant 0 : i32
    %c0_i32_2 = arith.constant 0 : i32
    return %c0_i32, %c0_i32_0, %c0_i32_1 : i32, i32, i32
  }
  func.func @transform_7(%arg0: i32) -> (i32, i32, i32) {
    %c0_i32 = arith.constant 0 : i32
    %c0_i32_0 = arith.constant 0 : i32
    %c0_i32_1 = arith.constant 0 : i32
    %c0_i32_2 = arith.constant 0 : i32
    return %c0_i32, %c0_i32_0, %c0_i32_1 : i32, i32, i32
  }
  func.func @transform_8(%arg0: i32) -> (i32, i32) {
    %c0_i32 = arith.constant 0 : i32
    %c0_i32_0 = arith.constant 0 : i32
    %c0_i32_1 = arith.constant 0 : i32
    return %c0_i32, %c0_i32_0 : i32, i32
  }
}

</mosaic_0001>

<bundles_post_ra>
// kernel: eq.8
= control target key start
LH: loop header
LB: loop body
LE: loop exit
PB: predicated region body
PF: predicated region fallthrough
CT: control target
= control target key end

     0   :  { %vm7_vm0 = vcmask 64512   ;;  %vm13_vm1 = vcmask 130112   ;;  %s39_s0 = inlined_call_operand.vmem [shape: s32[2,8], index: 0, kind: input, shape index: {}]   ;;  %s40_s1 = inlined_call_operand.vmem [shape: s32[16], index: 1, kind: output, shape index: {}]  }
   0x1   :  { %v4_v0 = vld [vmem:[%s39_s0] sm:$0x3]  ;;  %s22_s0 = smov 8  }
   0x2   :  { %5 = vst [vmem:[#allocation1] sm:$0x3] %v4_v0 }
   0x9   :  { %v10_v1 = vld [vmem:[#allocation1 + $0x1] sm:$0x1]   ;;  %v6_v2 = vld [vmem:[#allocation1] sm:$0x1]  }
   0xa   :  { %11 = vrot.lane.b32.xlu0 %v10_v1, %s22_s0  ;;  %8 = vst.msk [vmem:[#allocation0] sm:$0x1] %vm7_vm0, %v6_v2  }
  0x7c   :  { %v12_v3 = vpop.permute.xlu0 %11  }
  0x7d   :  { %14 = vst.msk [vmem:[#allocation0] sm:$0x1] %vm13_vm1, %v12_v3  }
  0x84   :  { %v17_v4 = vld [vmem:[#allocation0] sm:$0x1] }
  0x85   :  { %20 = vst [vmem:[%s40_s1] sm:$0x1] %v17_v4 }

// kernel: hf_transformer_encoder.1
= control target key start
LH: loop header
LB: loop body
LE: loop exit
PB: predicated region body
PF: predicated region fallthrough
CT: control target
= control target key end

     0   :  { %vm42_vm0 = vcmask 261120   ;;  %vm138_vm1 = vcmask 64512   ;;  %vm174_vm2 = vcmask 130048   ;;  %vm1039_vm10 = vcmask 523264   ;;  %s3433_s2 = inlined_call_operand.vmem [shape: f32[24,32,8], index: 2, kind: input, shape index: {}]   ;;  %s3434_s0 = inlined_call_operand.vmem [shape: f32[16,32], index: 0, kind: input, shape index: {}]   ;;  %s3435_s3 = inlined_call_operand.vmem [shape: f32[24,1,8], index: 3, kind: input, shape index: {}]   ;;  %s3436_s1 = inlined_call_operand.vmem [shape: f32[16,16], index: 1, kind: input, shape index: {}]   ;;  %s3437_s4 = inlined_call_operand.vmem [shape: f32[8,8,32], index: 4, kind: input, shape index: {}]   ;;  %s3438_s7 = inlined_call_operand.vmem [shape: f32[2,7,64], index: 7, kind: input, shape index: {}]   ;;  %s3439_s5 = inlined_call_operand.vmem [shape: f32[2,32,64], index: 5, kind: input, shape index: {}]   ;;  %s3440_s6 = inlined_call_operand.vmem [shape: f32[2,64,32], index: 6, kind: input, shape index: {}]   ;;  %s3441_s8 = inlined_call_operand.vmem [shape: f32[16,32], index: 8, kind: output, shape index: {}]  }
   0x1   :  { %v2215_v0 = vld [vmem:[%s3433_s2 + $0x98] sm:$0xff]  ;;  %v2214_v1 = vld [vmem:[%s3433_s2 + $0x90] sm:$0xff]  ;;  %v2213_v3 = vld [vmem:[%s3433_s2 + $0x88] sm:$0xff] }
   0x2   :  { %94 = vmatpush.msra.mxu1 %v2215_v0  ;;  %v37_v2 = vld [vmem:[%s3433_s2 + $0x18] sm:$0xff]  ;;  %v2212_v4 = vld [vmem:[%s3433_s2 + $0x80] sm:$0xff]  ;;  %v36_v5 = vld [vmem:[%s3433_s2 + $0x10] sm:$0xff] }
   0x3   :  { %61 = vmatpush.msra.mxu0 %v37_v2  ;;  %v2641_v6 = vld [vmem:[%s3434_s0] sm:$0xff]  ;;  %v35_v7 = vld [vmem:[%s3433_s2 + $0x8] sm:$0xff]  ;;  %v2222_v20 = vld [vmem:[%s3433_s2 + $0x118] sm:$0xff] }
   0x4   :  { %95 = vmatpush.msra.mxu1 %v2214_v1  ;;  %v34_v8 = vld [vmem:[%s3433_s2] sm:$0xff]  ;;  %v2656_v9 = vld [vmem:[%s3434_s0 + $0x8] sm:$0xff]  ;;  %v2221_v21 = vld [vmem:[%s3433_s2 + $0x110] sm:$0xff]  ;;  %127 = vmatpush.msra.mxu2 %v2222_v20 }
   0x5   :  { %62 = vmatpush.msra.mxu0 %v36_v5  ;;  %v2466_v11 = vld [vmem:[%s3435_s3 + $0x4] ss:$0 sm:$0xff]  ;;  %v2467_v15 = vld [vmem:[%s3435_s3] ss:$0 sm:$0xff]  ;;  %v2220_v22 = vld [vmem:[%s3433_s2 + $0x108] sm:$0xff] }
   0x6   :  { %96 = vmatpush.msra.mxu1 %v2213_v3  ;;  %128 = vmatpush.msra.mxu2 %v2221_v21  ;;  %v2219_v23 = vld [vmem:[%s3433_s2 + $0x100] sm:$0xff]  ;;  %v2242_v24 = vld [vmem:[%s3433_s2 + $0xb8] sm:$0xff]  ;;  %v2241_v25 = vld [vmem:[%s3433_s2 + $0xb0] sm:$0xff] }
   0x7   :  { %63 = vmatpush.msra.mxu0 %v35_v7  ;;  %v2240_v26 = vld [vmem:[%s3433_s2 + $0xa8] sm:$0xff]  ;;  %v2239_v27 = vld [vmem:[%s3433_s2 + $0xa0] sm:$0xff]  ;;  %v2235_v36 = vld [vmem:[%s3433_s2 + $0x38] sm:$0xff] }
   0x8   :  { %97 = vmatpush.msra.mxu1 %v2212_v4  ;;  %129 = vmatpush.msra.mxu2 %v2220_v22  ;;  %v2703_v28 = vld [vmem:[%s3436_s1] sm:$0xff]  ;;  %v2712_v32 = vld [vmem:[%s3436_s1 + $0x8] sm:$0xff]  ;;  %v2234_v37 = vld [vmem:[%s3433_s2 + $0x30] sm:$0xff] }
   0x9   :  { %2217 = vmatmul.msk.f32.vlgmr.msra.gmra.mxu1 %vm42_vm0, %v2641_v6  ;;  %64 = vmatpush.msra.mxu0 %v34_v8  ;;  %v2233_v38 = vld [vmem:[%s3433_s2 + $0x28] sm:$0xff]  ;;  %v2232_v39 = vld [vmem:[%s3433_s2 + $0x20] sm:$0xff]  ;;  %v2249_v0 = vld [vmem:[%s3433_s2 + $0x138] sm:$0xff] }
   0xa   :  { %2210 = vmatmul.msk.f32.vlgmr.msra.gmra.mxu0 %vm42_vm0, %v2641_v6  ;;  %130 = vmatpush.msra.mxu2 %v2219_v23  ;;  %v2468_v44 = vld [vmem:[%s3435_s3 + $0x8] ss:$0 sm:$0xff]  ;;  %v2469_v56 = vld [vmem:[%s3435_s3 + $0x5] ss:$0 sm:$0xff]  ;;  %v2248_v1 = vld [vmem:[%s3433_s2 + $0x130] sm:$0xff] }
   0xb   :  { %2224 = vmatmul.msk.f32.vlgmr.msra.gmra.mxu2 %vm42_vm0, %v2641_v6  ;;  %255 = vmatpush.msrb.mxu1 %v2235_v36  ;;  %v2247_v3 = vld [vmem:[%s3433_s2 + $0x128] sm:$0xff]  ;;  %v2246_v5 = vld [vmem:[%s3433_s2 + $0x120] sm:$0xff] }
   0xc   :  { %288 = vmatpush.msrb.mxu2 %v2242_v24  ;;  %v2471_v23 = vld [vmem:[%s3435_s3 + $0x9] ss:$0 sm:$0xff] }
   0xd   :  { %256 = vmatpush.msrb.mxu1 %v2234_v37 }
   0xe   :  { %289 = vmatpush.msrb.mxu2 %v2241_v25 }
   0xf   :  { %257 = vmatpush.msrb.mxu1 %v2233_v38 }
  0x10   :  { %290 = vmatpush.msrb.mxu2 %v2240_v26 }
  0x11   :  { %2218 = vmatmul.msk.f32.gmra.mxu1 %vm42_vm0, %v2656_v9 }
  0x12   :  { %2211 = vmatmul.msk.f32.gmra.mxu0 %vm42_vm0, %v2656_v9  ;;  %291 = vmatpush.msrb.mxu2 %v2239_v27 }
  0x13   :  { %2225 = vmatmul.msk.f32.gmra.mxu2 %vm42_vm0, %v2656_v9  ;;  %258 = vmatpush.msrb.mxu1 %v2232_v39 }
  0x19   :  { %2237 = vmatmul.msk.f32.vlgmr.msrb.gmra.mxu1 %vm42_vm0, %v2641_v6 }
  0x1b   :  { %2244 = vmatmul.msk.f32.vlgmr.msrb.gmra.mxu2 %vm42_vm0, %v2641_v6 }
  0x21   :  { %2238 = vmatmul.msk.f32.gmra.mxu1 %vm42_vm0, %v2656_v9 }
  0x23   :  { %2245 = vmatmul.msk.f32.gmra.mxu2 %vm42_vm0, %v2656_v9 }
  0x86   :  { %v99_v10 = vpop.f32.mrf.mxu1 }
  0x87   :  { %v66_v14 = vpop.f32.mrf.mxu0  ;;  %v100_v16 = vadd.f32 %v2466_v11, %v99_v10 }
  0x88   :  { %v67_v17 = vadd.f32 %v2467_v15, %v66_v14 }
  0x8e   :  { %v102_v12 = vpop.f32.mrf.mxu1  ;;  %v132_v41 = vpop.f32.mrf.mxu2 }
  0x8f   :  { %v103_v13 = vadd.f32 %v2466_v11, %v102_v12  ;;  %v69_v18 = vpop.f32.mrf.mxu0  ;;  %v133_v54 = vadd.f32 %v2468_v44, %v132_v41 }
  0x90   :  { %v70_v19 = vadd.f32 %v2467_v15, %v69_v18  ;;  %v2470_v15 = vld [vmem:[%s3435_s3 + $0x1] ss:$0 sm:$0xff] }
  0x91   :  { %2226 = vmatpush.xpose.msk.msra.mxu3 %vm138_vm1, %v103_v13 }
  0x95   :  { %2227 = vmatpush.xpose.msk.msra.mxu3 %vm138_vm1, %v100_v16 }
  0x96   :  { %v135_v46 = vpop.f32.mrf.mxu2  ;;  %v260_v14 = vpop.f32.mrf.mxu1 }
  0x97   :  { %v136_v48 = vadd.f32 %v2468_v44, %v135_v46  ;;  %v261_v16 = vadd.f32 %v2470_v15, %v260_v14  ;;  %v2273_v46 = vld [vmem:[%s3433_s2 + $0xd0] sm:$0xff] }
  0x98   :  { %2228 = vmatmul.msk.f32.vlgmr.msra.gmra.mxu3 %vm138_vm1, %v67_v17 }
  0x99   :  { %223 = vmatpush.msrb.mxu0 %v136_v48  ;;  %321 = vmatpush.msrb.mxu3 %v2249_v0  ;;  %v2271_v48 = vld [vmem:[%s3433_s2 + $0xc0] sm:$0xff] }
  0x9b   :  { %224 = vmatpush.msrb.mxu0 %v133_v54  ;;  %322 = vmatpush.msrb.mxu3 %v2248_v1  ;;  %v2266_v54 = vld [vmem:[%s3433_s2 + $0x50] sm:$0xff]  ;;  %v2259_v1 = vld [vmem:[%s3437_s4 + $0x8] sm:$0xff] }
  0x9c   :  { %447 = vmatpush.msra.mxu2 %v2259_v1 }
  0x9d   :  { %323 = vmatpush.msrb.mxu3 %v2247_v3 }
  0x9e   :  { %v293_v55 = vpop.f32.mrf.mxu2  ;;  %v263_v17 = vpop.f32.mrf.mxu1 }
  0x9f   :  { %v294_v59 = vadd.f32 %v2469_v56, %v293_v55  ;;  %324 = vmatpush.msrb.mxu3 %v2246_v5  ;;  %v264_v18 = vadd.f32 %v2470_v15, %v263_v17  ;;  %v2265_v55 = vld [vmem:[%s3433_s2 + $0x48] sm:$0xff]  ;;  %v2472_v5 = vld [vmem:[%s3435_s3 + $0x6] ss:$0 sm:$0xff]  ;;  %v2280_v17 = vld [vmem:[%s3433_s2 + $0x150] sm:$0xff] }
  0xa0   :  { %2229 = vmatmul.msk.f32.gmra.mxu3 %vm138_vm1, %v70_v19  ;;  %v232_v19 = vld [vmem:[%s3437_s4] sm:$0xff] }
  0xa1   :  { %476 = vmatpush.msra.mxu3 %v232_v19  ;;  %v2279_v19 = vld [vmem:[%s3433_s2 + $0x148] sm:$0xff] }
  0xa6   :  { %v296_v57 = vpop.f32.mrf.mxu2 }
  0xa7   :  { %v297_v58 = vadd.f32 %v2469_v56, %v296_v57  ;;  %v2264_v57 = vld [vmem:[%s3433_s2 + $0x40] sm:$0xff] }
  0xa8   :  { %2251 = vmatmul.msk.f32.vlgmr.msrb.gmra.mxu3 %vm42_vm0, %v2641_v6 }
  0xa9   :  { %2253 = vmatpush.xpose.msk.msra.mxu0 %vm138_vm1, %v297_v58 }
  0xad   :  { %2254 = vmatpush.xpose.msk.msra.mxu0 %vm138_vm1, %v294_v59 }
  0xb0   :  { %2252 = vmatmul.msk.f32.gmra.mxu3 %vm42_vm0, %v2656_v9 }
 0x11b   :  { %v168_v29 = vpop.f32.mrf.mxu3 }
 0x11c   :  { %v169_v30 = vadd.f32 %v168_v29, %v2703_v28 }
 0x11e   :  { %v175_v31 = vsel %vm174_vm2, %v169_v30, -inf }
 0x11f   :  { %176 = vmax.xlane.f32.xlu0 %v175_v31 }
 0x123   :  { %v171_v33 = vpop.f32.mrf.mxu3 }
 0x124   :  { %v172_v34 = vadd.f32 %v171_v33, %v2712_v32 }
 0x126   :  { %v178_v35 = vsel %vm174_vm2, %v172_v34, -inf }
 0x127   :  { %179 = vmax.xlane.f32.xlu0 %v178_v35 }
 0x12b   :  { %v326_v21 = vpop.f32.mrf.mxu3 }
 0x12c   :  { %v327_v25 = vadd.f32 %v2471_v23, %v326_v21 }
 0x133   :  { %v329_v24 = vpop.f32.mrf.mxu3 }
 0x134   :  { %v330_v26 = vadd.f32 %v2471_v23, %v329_v24 }
 0x136   :  { %415 = vmatpush.msra.mxu1 %v330_v26 }
 0x138   :  { %416 = vmatpush.msra.mxu1 %v327_v25 }
 0x192   :  { %v177_v40 = vpop.xlane.xlu0 %176 }
 0x193   :  { %v181_v42 = vsub.f32 %v169_v30, %v177_v40 }
 0x195   :  { %v183_v43 = vmul.f32 1.442695, %v181_v42 }
 0x197   :  { %2490 = vpow2.f32 %v183_v43 }
 0x19a   :  { %v180_v45 = vpop.xlane.xlu0 %179 }
 0x19b   :  { %v182_v47 = vsub.f32 %v172_v34, %v180_v45  ;;  %v2274_v45 = vld [vmem:[%s3433_s2 + $0xd8] sm:$0xff] }
 0x19c   :  { %539 = vmatpush.msrb.mxu1 %v2274_v45 }
 0x19d   :  { %v2491_v49 = vpop.eup %2490  ;;  %v185_v50 = vmul.f32 1.442695, %v182_v47  ;;  %v2272_v47 = vld [vmem:[%s3433_s2 + $0xc8] sm:$0xff] }
 0x19e   :  { %v187_v51 = vsel %vm174_vm2, %v2491_v49, 0.0  ;;  %540 = vmatpush.msrb.mxu1 %v2273_v46 }
 0x19f   :  { %2492 = vpow2.f32 %v185_v50  ;;  %188 = vadd.xlane.f32.xlu1 %v187_v51  ;;  %v2267_v50 = vld [vmem:[%s3433_s2 + $0x58] sm:$0xff] }
 0x1a0   :  { %541 = vmatpush.msrb.mxu1 %v2272_v47 }
 0x1a2   :  { %542 = vmatpush.msrb.mxu1 %v2271_v48 }
 0x1a5   :  { %v2493_v52 = vpop.eup %2492 }
 0x1a6   :  { %v190_v53 = vsel %vm174_vm2, %v2493_v52, 0.0 }
 0x1a7   :  { %191 = vadd.xlane.f32.xlu1 %v190_v53 }
 0x212   :  { %v189_v60 = vpop.xlane.xlu1 %188 }
 0x213   :  { %2494 = vrcp.f32 %v189_v60 }
 0x219   :  { %v2495_v61 = vpop.eup %2494 }
 0x21a   :  { %v195_v62 = vmul.f32 %v2495_v61, %v189_v60  ;;  %v192_v63 = vpop.xlane.xlu1 %191 }
 0x21b   :  { %2496 = vrcp.f32 %v192_v63 }
 0x21c   :  { %v197_v2 = vsub.f32 2.0, %v195_v62 }
 0x21e   :  { %v199_v4 = vmul.f32 %v2495_v61, %v197_v2 }
 0x220   :  { %v201_v7 = vmul.f32 %v2491_v49, %v199_v4 }
 0x221   :  { %v2497_v8 = vpop.eup %2496 }
 0x222   :  { %v196_v10 = vmul.f32 %v2497_v8, %v192_v63  ;;  %2230 = vmatmul.msk.f32.vlgmr.msrb.gmra.mxu0 %vm174_vm2, %v201_v7 }
 0x223   :  { %506 = vmatpush.msrb.mxu0 %v2267_v50 }
 0x224   :  { %v198_v11 = vsub.f32 2.0, %v196_v10 }
 0x225   :  { %507 = vmatpush.msrb.mxu0 %v2266_v54  ;;  %v2294_v54 = vld [vmem:[%s3433_s2 + $0x60] sm:$0xff] }
 0x226   :  { %v200_v12 = vmul.f32 %v2497_v8, %v198_v11  ;;  %v2473_v11 = vld [vmem:[%s3435_s3 + $0x2] ss:$0 sm:$0xff] }
 0x227   :  { %508 = vmatpush.msrb.mxu0 %v2265_v55  ;;  %v2291_v55 = vld [vmem:[%s3437_s4 + $0x10] sm:$0xff] }
 0x228   :  { %v202_v13 = vmul.f32 %v2493_v52, %v200_v12 }
 0x229   :  { %509 = vmatpush.msrb.mxu0 %v2264_v57 }
 0x22a   :  { %2231 = vmatmul.msk.f32.gmra.mxu0 %vm174_vm2, %v202_v13 }
 0x232   :  { %2255 = vmatmul.msk.f32.vlgmr.msra.gmra.mxu0 %vm138_vm1, %v261_v16  ;;  %v2281_v16 = vld [vmem:[%s3433_s2 + $0x158] sm:$0xff] }
 0x233   :  { %572 = vmatpush.msrb.mxu2 %v2281_v16 }
 0x235   :  { %573 = vmatpush.msrb.mxu2 %v2280_v17 }
 0x237   :  { %574 = vmatpush.msrb.mxu2 %v2279_v19  ;;  %v2311_v19 = vld [vmem:[%s3433_s2 + $0x178] sm:$0xff] }
 0x23a   :  { %2256 = vmatmul.msk.f32.gmra.mxu0 %vm138_vm1, %v264_v18 }
 0x242   :  { %2269 = vmatmul.msk.f32.vlgmr.msrb.gmra.mxu0 %vm42_vm0, %v2641_v6 }
 0x24a   :  { %2270 = vmatmul.msk.f32.gmra.mxu0 %vm42_vm0, %v2656_v9 }
 0x29f   :  { %v226_v20 = vpop.f32.mrf.mxu0 }
 0x2a0   :  { %2262 = vmatmul.msk.f32.vlgmr.msra.gmra.mxu3 %vm138_vm1, %v226_v20  ;;  %v2278_v20 = vld [vmem:[%s3433_s2 + $0x140] sm:$0xff] }
 0x2a1   :  { %575 = vmatpush.msrb.mxu2 %v2278_v20  ;;  %v2310_v20 = vld [vmem:[%s3433_s2 + $0x170] sm:$0xff] }
 0x2a7   :  { %v229_v22 = vpop.f32.mrf.mxu0 }
 0x2a8   :  { %2263 = vmatmul.msk.f32.gmra.mxu3 %vm138_vm1, %v229_v22 }
 0x2af   :  { %v361_v27 = vpop.f32.mrf.mxu0 }
 0x2b0   :  { %v362_v29 = vadd.f32 %v361_v27, %v2703_v28 }
 0x2b2   :  { %v367_v30 = vsel %vm174_vm2, %v362_v29, -inf }
 0x2b3   :  { %368 = vmax.xlane.f32.xlu2 %v367_v30  ;;  %v2304_v30 = vld [vmem:[%s3433_s2 + $0xf8] sm:$0xff] }
 0x2b7   :  { %v364_v31 = vpop.f32.mrf.mxu0 }
 0x2b8   :  { %v365_v33 = vadd.f32 %v364_v31, %v2712_v32  ;;  %v2303_v31 = vld [vmem:[%s3433_s2 + $0xf0] sm:$0xff] }
 0x2ba   :  { %v370_v34 = vsel %vm174_vm2, %v365_v33, -inf }
 0x2bb   :  { %371 = vmax.xlane.f32.xlu2 %v370_v34 }
 0x2bf   :  { %v511_v10 = vpop.f32.mrf.mxu0 }
 0x2c0   :  { %v512_v13 = vadd.f32 %v2473_v11, %v511_v10 }
 0x2c7   :  { %v514_v14 = vpop.f32.mrf.mxu0 }
 0x2c8   :  { %v515_v15 = vadd.f32 %v2473_v11, %v514_v14  ;;  %v2476_v14 = vld [vmem:[%s3435_s3 + $0x3] ss:$0 sm:$0xff] }
 0x323   :  { %v2836_v18 = vpop.f32.mrf.mxu3 }
 0x326   :  { %v369_v35 = vpop.xlane.xlu2 %368 }
 0x327   :  { %v373_v36 = vsub.f32 %v362_v29, %v369_v35  ;;  %v2301_v35 = vld [vmem:[%s3433_s2 + $0xe0] sm:$0xff] }
 0x329   :  { %v375_v37 = vmul.f32 1.442695, %v373_v36 }
 0x32b   :  { %2498 = vpow2.f32 %v375_v37  ;;  %v2846_v21 = vpop.f32.mrf.mxu3 }
 0x32e   :  { %v372_v38 = vpop.xlane.xlu2 %371 }
 0x32f   :  { %v374_v39 = vsub.f32 %v365_v33, %v372_v38  ;;  %v2302_v33 = vld [vmem:[%s3433_s2 + $0xe8] sm:$0xff] }
 0x331   :  { %v2499_v40 = vpop.eup %2498  ;;  %v377_v41 = vmul.f32 1.442695, %v374_v39 }
 0x332   :  { %v379_v42 = vsel %vm174_vm2, %v2499_v40, 0.0 }
 0x333   :  { %2500 = vpow2.f32 %v377_v41  ;;  %380 = vadd.xlane.f32.xlu0 %v379_v42 }
 0x339   :  { %v2501_v43 = vpop.eup %2500 }
 0x33a   :  { %v382_v44 = vsel %vm174_vm2, %v2501_v43, 0.0 }
 0x33b   :  { %383 = vadd.xlane.f32.xlu1 %v382_v44 }
 0x3a6   :  { %v381_v49 = vpop.xlane.xlu0 %380 }
 0x3a7   :  { %2502 = vrcp.f32 %v381_v49 }
 0x3ad   :  { %v2503_v51 = vpop.eup %2502 }
 0x3ae   :  { %v387_v52 = vmul.f32 %v2503_v51, %v381_v49  ;;  %v384_v53 = vpop.xlane.xlu1 %383 }
 0x3af   :  { %2504 = vrcp.f32 %v384_v53 }
 0x3b0   :  { %v389_v56 = vsub.f32 2.0, %v387_v52  ;;  %v2296_v52 = vld [vmem:[%s3433_s2 + $0x70] sm:$0xff] }
 0x3b2   :  { %v391_v58 = vmul.f32 %v2503_v51, %v389_v56  ;;  %v2297_v51 = vld [vmem:[%s3433_s2 + $0x78] sm:$0xff] }
 0x3b4   :  { %v393_v59 = vmul.f32 %v2499_v40, %v391_v58  ;;  %v2474_v40 = vld [vmem:[%s3435_s3 + $0xa] ss:$0 sm:$0xff]  ;;  %v2475_v58 = vld [vmem:[%s3435_s3 + $0x7] ss:$0 sm:$0xff] }
 0x3b5   :  { %v2505_v60 = vpop.eup %2504 }
 0x3b6   :  { %v388_v61 = vmul.f32 %v2505_v60, %v384_v53  ;;  %2257 = vmatmul.msk.f32.vlgmr.msra.gmra.mxu1 %vm174_vm2, %v393_v59  ;;  %v2295_v53 = vld [vmem:[%s3433_s2 + $0x68] sm:$0xff] }
 0x3b7   :  { %698 = vmatpush.msra.mxu1 %v2291_v55 }
 0x3b8   :  { %v390_v62 = vsub.f32 2.0, %v388_v61 }
 0x3ba   :  { %v392_v63 = vmul.f32 %v2505_v60, %v390_v62 }
 0x3bc   :  { %v394_v0 = vmul.f32 %v2501_v43, %v392_v63 }
 0x3be   :  { %2258 = vmatmul.msk.f32.gmra.mxu1 %vm174_vm2, %v394_v0 }
 0x3c6   :  { %2276 = vmatmul.msk.f32.vlgmr.msrb.gmra.mxu1 %vm42_vm0, %v2641_v6 }
 0x3ce   :  { %2277 = vmatmul.msk.f32.gmra.mxu1 %vm42_vm0, %v2656_v9 }
 0x433   :  { %v418_v2 = vpop.f32.mrf.mxu1 }
 0x434   :  { %2260 = vmatmul.msk.f32.vlgmr.msra.gmra.mxu2 %vm138_vm1, %v418_v2 }
 0x435   :  { %730 = vmatpush.msra.mxu2 %v2297_v51 }
 0x437   :  { %731 = vmatpush.msra.mxu2 %v2296_v52 }
 0x439   :  { %732 = vmatpush.msra.mxu2 %v2295_v53 }
 0x43b   :  { %v421_v3 = vpop.f32.mrf.mxu1  ;;  %733 = vmatpush.msra.mxu2 %v2294_v54 }
 0x43c   :  { %2261 = vmatmul.msk.f32.gmra.mxu2 %vm138_vm1, %v421_v3 }
 0x443   :  { %v544_v4 = vpop.f32.mrf.mxu1 }
 0x444   :  { %v545_v12 = vadd.f32 %v2472_v5, %v544_v4  ;;  %2283 = vmatmul.msk.f32.vlgmr.msrb.gmra.mxu2 %vm42_vm0, %v2641_v6 }
 0x44b   :  { %v547_v7 = vpop.f32.mrf.mxu1 }
 0x44c   :  { %v548_v8 = vadd.f32 %v2472_v5, %v547_v7  ;;  %2284 = vmatmul.msk.f32.gmra.mxu2 %vm42_vm0, %v2656_v9 }
 0x44e   :  { %2285 = vmatpush.xpose.msk.msrb.mxu3 %vm138_vm1, %v548_v8 }
 0x452   :  { %2286 = vmatpush.xpose.msk.msrb.mxu3 %vm138_vm1, %v545_v12 }
 0x454   :  { %2299 = vmatmul.msk.f32.vlgmr.msra.gmra.mxu2 %vm42_vm0, %v2641_v6 }
 0x455   :  { %2287 = vmatmul.msk.f32.vlgmr.msrb.gmra.mxu3 %vm138_vm1, %v512_v13 }
 0x456   :  { %763 = vmatpush.msra.mxu3 %v2304_v30 }
 0x458   :  { %764 = vmatpush.msra.mxu3 %v2303_v31 }
 0x45a   :  { %765 = vmatpush.msra.mxu3 %v2302_v33 }
 0x45c   :  { %766 = vmatpush.msra.mxu3 %v2301_v35  ;;  %2300 = vmatmul.msk.f32.gmra.mxu2 %vm42_vm0, %v2656_v9 }
 0x45d   :  { %2288 = vmatmul.msk.f32.gmra.mxu3 %vm138_vm1, %v515_v15 }
 0x465   :  { %2306 = vmatmul.msk.f32.vlgmr.msra.gmra.mxu3 %vm42_vm0, %v2641_v6 }
 0x46d   :  { %2307 = vmatmul.msk.f32.gmra.mxu3 %vm42_vm0, %v2656_v9 }
 0x4b7   :  { %v2854_v29 = vpop.f32.mrf.mxu2 }
 0x4bf   :  { %v2865_v34 = vpop.f32.mrf.mxu2 }
 0x4c7   :  { %v577_v37 = vpop.f32.mrf.mxu2 }
 0x4c8   :  { %v578_v44 = vadd.f32 %v2474_v40, %v577_v37 }
 0x4cf   :  { %v580_v42 = vpop.f32.mrf.mxu2 }
 0x4d0   :  { %v581_v45 = vadd.f32 %v2474_v40, %v580_v42 }
 0x4d2   :  { %666 = vmatpush.msra.mxu0 %v581_v45 }
 0x4d4   :  { %667 = vmatpush.msra.mxu0 %v578_v44 }
 0x4d6   :  { %796 = vmatpush.msrb.mxu0 %v2311_v19 }
 0x4d7   :  { %v735_v13 = vpop.f32.mrf.mxu2 }
 0x4d8   :  { %v612_v22 = vpop.f32.mrf.mxu3  ;;  %v736_v15 = vadd.f32 %v2476_v14, %v735_v13  ;;  %797 = vmatpush.msrb.mxu0 %v2310_v20 }
 0x4d9   :  { %v613_v23 = vadd.f32 %v612_v22, %v2703_v28  ;;  %v2309_v22 = vld [vmem:[%s3433_s2 + $0x168] sm:$0xff] }
 0x4da   :  { %798 = vmatpush.msrb.mxu0 %v2309_v22 }
 0x4db   :  { %v618_v24 = vsel %vm174_vm2, %v613_v23, -inf }
 0x4dc   :  { %619 = vmax.xlane.f32.xlu2 %v618_v24 }
 0x4df   :  { %v738_v16 = vpop.f32.mrf.mxu2 }
 0x4e0   :  { %v615_v25 = vpop.f32.mrf.mxu3  ;;  %v739_v17 = vadd.f32 %v2476_v14, %v738_v16  ;;  %v2574_v14 = vmov 32.0  }
 0x4e1   :  { %v616_v26 = vadd.f32 %v615_v25, %v2712_v32  ;;  %v2308_v25 = vld [vmem:[%s3433_s2 + $0x160] sm:$0xff] }
 0x4e2   :  { %799 = vmatpush.msrb.mxu0 %v2308_v25 }
 0x4e3   :  { %v621_v27 = vsel %vm174_vm2, %v616_v26, -inf }
 0x4e4   :  { %622 = vmax.xlane.f32.xlu0 %v621_v27  ;;  %v482_v27 = vadd.f32 %v2846_v21, %v2865_v34  ;;  %v2477_v21 = vld [vmem:[%s3435_s3 + $0xb] ss:$0 sm:$0xff] }
 0x4e8   :  { %v768_v57 = vpop.f32.mrf.mxu3 }
 0x4e9   :  { %v769_v1 = vadd.f32 %v2475_v58, %v768_v57 }
 0x4f0   :  { %v771_v62 = vpop.f32.mrf.mxu3 }
 0x4f1   :  { %v772_v63 = vadd.f32 %v2475_v58, %v771_v62 }
 0x4f3   :  { %2315 = vmatpush.xpose.msk.msrb.mxu1 %vm138_vm1, %v772_v63 }
 0x4f7   :  { %2316 = vmatpush.xpose.msk.msrb.mxu1 %vm138_vm1, %v769_v1 }
 0x54f   :  { %v620_v36 = vpop.xlane.xlu2 %619 }
 0x550   :  { %v624_v38 = vsub.f32 %v613_v23, %v620_v36  ;;  %v479_v23 = vadd.f32 %v2836_v18, %v2854_v29 }
 0x552   :  { %v626_v39 = vmul.f32 1.442695, %v624_v38 }
 0x554   :  { %2506 = vpow2.f32 %v626_v39 }
 0x557   :  { %v623_v41 = vpop.xlane.xlu0 %622 }
 0x558   :  { %v625_v43 = vsub.f32 %v616_v26, %v623_v41 }
 0x55a   :  { %v2507_v46 = vpop.eup %2506  ;;  %v628_v47 = vmul.f32 1.442695, %v625_v43 }
 0x55b   :  { %v630_v48 = vsel %vm174_vm2, %v2507_v46, 0.0 }
 0x55c   :  { %2508 = vpow2.f32 %v628_v47  ;;  %631 = vadd.xlane.f32.xlu1 %v630_v48 }
 0x562   :  { %v2509_v49 = vpop.eup %2508 }
 0x563   :  { %v633_v50 = vsel %vm174_vm2, %v2509_v49, 0.0 }
 0x564   :  { %634 = vadd.xlane.f32.xlu2 %v633_v50 }
 0x5cf   :  { %v632_v56 = vpop.xlane.xlu1 %631 }
 0x5d0   :  { %2510 = vrcp.f32 %v632_v56 }
 0x5d6   :  { %v2511_v59 = vpop.eup %2510 }
 0x5d7   :  { %v638_v60 = vmul.f32 %v2511_v59, %v632_v56  ;;  %v635_v61 = vpop.xlane.xlu2 %634 }
 0x5d8   :  { %2512 = vrcp.f32 %v635_v61 }
 0x5d9   :  { %v640_v0 = vsub.f32 2.0, %v638_v60 }
 0x5db   :  { %v642_v2 = vmul.f32 %v2511_v59, %v640_v0  ;;  %v2955_v0 = vld [vmem:[%s3438_s7] sm:$0x7f] }
 0x5dc   :  { %v932_v1 = vperm.slane %v2955_v0, 0 }
 0x5dd   :  { %v644_v3 = vmul.f32 %v2507_v46, %v642_v2 }
 0x5de   :  { %v2513_v4 = vpop.eup %2512 }
 0x5df   :  { %v639_v5 = vmul.f32 %v2513_v4, %v635_v61  ;;  %2289 = vmatmul.msk.f32.vlgmr.msra.gmra.mxu0 %vm174_vm2, %v644_v3 }
 0x5e1   :  { %v641_v7 = vsub.f32 2.0, %v639_v5 }
 0x5e3   :  { %v643_v8 = vmul.f32 %v2513_v4, %v641_v7 }
 0x5e5   :  { %v645_v10 = vmul.f32 %v2509_v49, %v643_v8  ;;  %v2321_v49 = vld [vmem:[%s3437_s4 + $0x18] sm:$0xff] }
 0x5e6   :  { %922 = vmatpush.msrb.mxu3 %v2321_v49 }
 0x5e7   :  { %2290 = vmatmul.msk.f32.gmra.mxu0 %vm174_vm2, %v645_v10 }
 0x5ef   :  { %2313 = vmatmul.msk.f32.vlgmr.msrb.gmra.mxu0 %vm42_vm0, %v2641_v6 }
 0x5f7   :  { %2314 = vmatmul.msk.f32.gmra.mxu0 %vm42_vm0, %v2656_v9 }
 0x65c   :  { %v669_v11 = vpop.f32.mrf.mxu0 }
 0x65d   :  { %2292 = vmatmul.msk.f32.vlgmr.msra.gmra.mxu1 %vm138_vm1, %v669_v11 }
 0x664   :  { %v672_v12 = vpop.f32.mrf.mxu0 }
 0x665   :  { %2293 = vmatmul.msk.f32.gmra.mxu1 %vm138_vm1, %v672_v12 }
 0x66c   :  { %v801_v38 = vpop.f32.mrf.mxu0 }
 0x66d   :  { %2317 = vmatmul.msk.f32.vlgmr.msrb.gmra.mxu1 %vm138_vm1, %v736_v15  ;;  %v802_v42 = vadd.f32 %v2477_v21, %v801_v38 }
 0x674   :  { %v804_v40 = vpop.f32.mrf.mxu0 }
 0x675   :  { %2318 = vmatmul.msk.f32.gmra.mxu1 %vm138_vm1, %v739_v17 }
 0x6da   :  { %v700_v24 = vpop.f32.mrf.mxu1 }
 0x6db   :  { %v2926_v26 = vadd.f32 %v700_v24, %v479_v23 }
 0x6e2   :  { %v703_v30 = vpop.f32.mrf.mxu1 }
 0x6e3   :  { %v2932_v31 = vadd.f32 %v703_v30, %v482_v27 }
 0x6ea   :  { %v836_v18 = vpop.f32.mrf.mxu1 }
 0x6eb   :  { %v837_v29 = vadd.f32 %v836_v18, %v2703_v28  ;;  %v805_v28 = vadd.f32 %v2477_v21, %v804_v40  ;;  %v1035_v40 = vld [vmem:[%s3440_s6 + $0x28] sm:$0xff] }
 0x6ed   :  { %v842_v33 = vsel %vm174_vm2, %v837_v29, -inf  ;;  %890 = vmatpush.msrb.mxu2 %v805_v28  ;;  %v1034_v28 = vld [vmem:[%s3440_s6 + $0x20] sm:$0xff] }
 0x6ee   :  { %843 = vmax.xlane.f32.xlu0 %v842_v33  ;;  %v996_v33 = vld [vmem:[%s3439_s5 + $0x10] sm:$0xff] }
 0x6ef   :  { %891 = vmatpush.msrb.mxu2 %v802_v42 }
 0x6f2   :  { %v839_v35 = vpop.f32.mrf.mxu1 }
 0x6f3   :  { %v840_v36 = vadd.f32 %v839_v35, %v2712_v32  ;;  %v995_v35 = vld [vmem:[%s3439_s5 + $0x8] sm:$0xff] }
 0x6f5   :  { %v845_v37 = vsel %vm174_vm2, %v840_v36, -inf }
 0x6f6   :  { %846 = vmax.xlane.f32.xlu1 %v845_v37 }
 0x761   :  { %v844_v34 = vpop.xlane.xlu0 %843 }
 0x762   :  { %v848_v39 = vsub.f32 %v837_v29, %v844_v34  ;;  %v997_v29 = vld [vmem:[%s3439_s5 + $0x18] sm:$0xff] }
 0x763   :  { %1017 = vmatpush.msra.mxu0 %v997_v29  ;;  %v1037_v34 = vld [vmem:[%s3440_s6 + $0x38] sm:$0xff] }
 0x764   :  { %v850_v41 = vmul.f32 1.442695, %v848_v39  ;;  %v1036_v39 = vld [vmem:[%s3440_s6 + $0x30] sm:$0xff]  ;;  %1054 = vmatpush.msra.mxu1 %v1037_v34 }
 0x765   :  { %1018 = vmatpush.msra.mxu0 %v996_v33  ;;  %v2331_v34 = vld [vmem:[%s3433_s2 + $0x190] sm:$0xff] }
 0x766   :  { %2514 = vpow2.f32 %v850_v41  ;;  %1055 = vmatpush.msra.mxu1 %v1036_v39  ;;  %v2338_v39 = vld [vmem:[%s3433_s2 + $0x210] sm:$0xff] }
 0x767   :  { %1019 = vmatpush.msra.mxu0 %v995_v35 }
 0x768   :  { %1056 = vmatpush.msra.mxu1 %v1035_v40  ;;  %v2345_v40 = vld [vmem:[%s3433_s2 + $0x290] sm:$0xff] }
 0x769   :  { %v847_v43 = vpop.xlane.xlu1 %846 }
 0x76a   :  { %v849_v44 = vsub.f32 %v840_v36, %v847_v43  ;;  %v994_v36 = vld [vmem:[%s3439_s5] sm:$0xff]  ;;  %1057 = vmatpush.msra.mxu1 %v1034_v28  ;;  %v2344_v28 = vld [vmem:[%s3433_s2 + $0x288] sm:$0xff] }
 0x76b   :  { %1020 = vmatpush.msra.mxu0 %v994_v36 }
 0x76c   :  { %v2515_v32 = vpop.eup %2514  ;;  %v852_v45 = vmul.f32 1.442695, %v849_v44 }
 0x76d   :  { %v854_v46 = vsel %vm174_vm2, %v2515_v32, 0.0 }
 0x76e   :  { %2516 = vpow2.f32 %v852_v45  ;;  %855 = vadd.xlane.f32.xlu2 %v854_v46 }
 0x774   :  { %v2517_v47 = vpop.eup %2516 }
 0x775   :  { %v857_v48 = vsel %vm174_vm2, %v2517_v47, 0.0 }
 0x776   :  { %858 = vadd.xlane.f32.xlu0 %v857_v48 }
 0x7e1   :  { %v856_v50 = vpop.xlane.xlu2 %855 }
 0x7e2   :  { %2518 = vrcp.f32 %v856_v50 }
 0x7e8   :  { %v2519_v51 = vpop.eup %2518 }
 0x7e9   :  { %v862_v52 = vmul.f32 %v2519_v51, %v856_v50  ;;  %v859_v53 = vpop.xlane.xlu0 %858 }
 0x7ea   :  { %2520 = vrcp.f32 %v859_v53 }
 0x7eb   :  { %v864_v54 = vsub.f32 2.0, %v862_v52  ;;  %2522 = vrcp.f32 %v2574_v14  ;;  %v988_v52 = vperm.slane %v2955_v0, 3 }
 0x7ed   :  { %v866_v55 = vmul.f32 %v2519_v51, %v864_v54 }
 0x7ef   :  { %v868_v56 = vmul.f32 %v2515_v32, %v866_v55  ;;  %v1033_v32 = vld [vmem:[%s3440_s6 + $0x18] sm:$0xff] }
 0x7f0   :  { %v2521_v57 = vpop.eup %2520  ;;  %1058 = vmatpush.msra.mxu1 %v1033_v32  ;;  %v2343_v32 = vld [vmem:[%s3433_s2 + $0x280] sm:$0xff] }
 0x7f1   :  { %v863_v58 = vmul.f32 %v2521_v57, %v859_v53  ;;  %2319 = vmatmul.msk.f32.vlgmr.msrb.gmra.mxu2 %vm174_vm2, %v868_v56  ;;  %v2523_v15 = vpop.eup %2522  ;;  %v991_v56 = vperm.slane %v2955_v0, 4 }
 0x7f2   :  { %v944_v16 = vmul.f32 32.0, %v2523_v15  ;;  %vm948_vm3 = vweird.f32 %v2523_v15 }
 0x7f3   :  { %v865_v59 = vsub.f32 2.0, %v863_v58 }
 0x7f4   :  { %v945_v17 = vsub.f32 1.0, %v944_v16 }
 0x7f5   :  { %v867_v60 = vmul.f32 %v2521_v57, %v865_v59 }
 0x7f6   :  { %v946_v19 = vmul.f32 %v2523_v15, %v945_v17 }
 0x7f7   :  { %v869_v61 = vmul.f32 %v2517_v47, %v867_v60 }
 0x7f8   :  { %v947_v20 = vadd.f32 %v2523_v15, %v946_v19 }
 0x7f9   :  { %2320 = vmatmul.msk.f32.gmra.mxu2 %vm174_vm2, %v869_v61 }
 0x874   :  { %v893_v62 = vpop.f32.mrf.mxu2 }
 0x875   :  { %2322 = vmatmul.msk.f32.vlgmr.msrb.gmra.mxu3 %vm138_vm1, %v893_v62 }
 0x87c   :  { %v896_v63 = vpop.f32.mrf.mxu2 }
 0x87d   :  { %2323 = vmatmul.msk.f32.gmra.mxu3 %vm138_vm1, %v896_v63 }
 0x8f8   :  { %v924_v2 = vpop.f32.mrf.mxu3 }
 0x8f9   :  { %v930_v3 = vadd.f32 %v924_v2, %v2926_v26 }
 0x8fb   :  { %v933_v4 = vadd.f32 %v932_v1, %v930_v3  ;;  %v1032_v3 = vld [vmem:[%s3440_s6 + $0x10] sm:$0xff] }
 0x8fc   :  { %1059 = vmatpush.msra.mxu1 %v1032_v3 }
 0x8fd   :  { %v935_v5 = vadd.f32 %v933_v4, %v2641_v6  ;;  %v2964_v6 = vsel %vm948_vm3, %v2523_v15, %v947_v20  ;;  %v1031_v4 = vld [vmem:[%s3440_s6 + $0x8] sm:$0xff]  ;;  %v1038_v15 = vperm.slane %v2955_v0, 2 }
 0x8fe   :  { %1060 = vmatpush.msra.mxu1 %v1031_v4  ;;  %v1115_v4 = vperm.slane %v2955_v0, 5 }
 0x8ff   :  { %v937_v7 = vsel %vm42_vm0, %v935_v5, 0.0 }
 0x900   :  { %938 = vadd.xlane.f32.xlu1 %v937_v7  ;;  %v927_v8 = vpop.f32.mrf.mxu3  ;;  %v998_v7 = vperm.slane %v2955_v0, 1 }
 0x901   :  { %v931_v10 = vadd.f32 %v927_v8, %v2932_v31 }
 0x903   :  { %v934_v11 = vadd.f32 %v932_v1, %v931_v10 }
 0x905   :  { %v936_v12 = vadd.f32 %v934_v11, %v2656_v9 }
 0x907   :  { %v940_v13 = vsel %vm42_vm0, %v936_v12, 0.0 }
 0x908   :  { %941 = vadd.xlane.f32.xlu2 %v940_v13 }
 0x973   :  { %v939_v22 = vpop.xlane.xlu1 %938 }
 0x974   :  { %v950_v23 = vmul.f32 %v2964_v6, %v939_v22 }
 0x976   :  { %v952_v24 = vsub.f32 %v935_v5, %v950_v23  ;;  %v1030_v5 = vld [vmem:[%s3440_s6] sm:$0xff] }
 0x977   :  { %1061 = vmatpush.msra.mxu1 %v1030_v5 }
 0x978   :  { %v954_v25 = vmul.f32 %v952_v24, %v952_v24 }
 0x97a   :  { %v956_v9 = vsel %vm42_vm0, %v954_v25, 0.0 }
 0x97b   :  { %957 = vadd.xlane.f32.xlu0 %v956_v9  ;;  %v942_v26 = vpop.xlane.xlu2 %941 }
 0x97c   :  { %v951_v27 = vmul.f32 %v2964_v6, %v942_v26 }
 0x97e   :  { %v953_v30 = vsub.f32 %v936_v12, %v951_v27 }
 0x980   :  { %v955_v31 = vmul.f32 %v953_v30, %v953_v30 }
 0x982   :  { %v959_v18 = vsel %vm42_vm0, %v955_v31, 0.0 }
 0x983   :  { %960 = vadd.xlane.f32.xlu1 %v959_v18 }
 0x9ee   :  { %v958_v37 = vpop.xlane.xlu0 %957 }
 0x9ef   :  { %v962_v38 = vmul.f32 %v958_v37, %v2964_v6  ;;  %v2332_v37 = vld [vmem:[%s3433_s2 + $0x198] sm:$0xff] }
 0x9f0   :  { %1151 = vmatpush.msra.mxu2 %v2332_v37  ;;  %v2373_v37 = vld [vmem:[%s3433_s2 + $0x2b0] sm:$0xff] }
 0x9f1   :  { %v964_v21 = vadd.f32 1e-05, %v962_v38  ;;  %v2339_v38 = vld [vmem:[%s3433_s2 + $0x218] sm:$0xff] }
 0x9f2   :  { %1184 = vmatpush.msra.mxu3 %v2339_v38  ;;  %1152 = vmatpush.msra.mxu2 %v2331_v34  ;;  %v2481_v38 = vld [vmem:[%s3435_s3 + $0x11] ss:$0 sm:$0xff] }
 0x9f3   :  { %2524 = vrsqrt.f32 %v964_v21  ;;  %vm972_vm5 = vweird.f32 %v964_v21 }
 0x9f4   :  { %1185 = vmatpush.msra.mxu3 %v2338_v39 }
 0x9f6   :  { %v961_v41 = vpop.xlane.xlu1 %960 }
 0x9f7   :  { %v963_v42 = vmul.f32 %v961_v41, %v2964_v6  ;;  %v2330_v41 = vld [vmem:[%s3433_s2 + $0x188] sm:$0xff] }
 0x9f8   :  { %1153 = vmatpush.msra.mxu2 %v2330_v41 }
 0x9f9   :  { %v2525_v43 = vpop.eup %2524  ;;  %v965_v44 = vadd.f32 1e-05, %v963_v42  ;;  %v2337_v42 = vld [vmem:[%s3433_s2 + $0x208] sm:$0xff] }
 0x9fa   :  { %v967_v45 = vmul.f32 %v2525_v43, %v964_v21  ;;  %vm973_vm4 = vweird.f32 %v2525_v43  ;;  %v2346_v21 = vld [vmem:[%s3433_s2 + $0x298] sm:$0xff]  ;;  %1186 = vmatpush.msra.mxu3 %v2337_v42 }
 0x9fb   :  { %2526 = vrsqrt.f32 %v965_v44  ;;  %vm974_vm6 = vmor %vm972_vm5, %vm973_vm4  ;;  %vm982_vm8 = vweird.f32 %v965_v44  ;;  %1217 = vmatpush.msrb.mxu0 %v2346_v21  ;;  %v2372_v21 = vld [vmem:[%s3433_s2 + $0x2a8] sm:$0xff] }
 0x9fc   :  { %v968_v46 = vmul.f32 %v2525_v43, %v967_v45 }
 0x9fd   :  { %1218 = vmatpush.msrb.mxu0 %v2345_v40  ;;  %v2371_v40 = vld [vmem:[%s3433_s2 + $0x2a0] sm:$0xff] }
 0x9fe   :  { %v969_v47 = vmul.f32 0.5, %v968_v46 }
 0x9ff   :  { %1219 = vmatpush.msrb.mxu0 %v2344_v28 }
 0xa00   :  { %v970_v48 = vsub.f32 1.5, %v969_v47 }
 0xa01   :  { %v2527_v49 = vpop.eup %2526  ;;  %1220 = vmatpush.msrb.mxu0 %v2343_v32 }
 0xa02   :  { %v971_v50 = vmul.f32 %v2525_v43, %v970_v48  ;;  %v977_v51 = vmul.f32 %v2527_v49, %v965_v44  ;;  %vm983_vm7 = vweird.f32 %v2527_v49  ;;  %v2336_v44 = vld [vmem:[%s3433_s2 + $0x200] sm:$0xff]  ;;  %v2360_v48 = vld [vmem:[%s3433_s2 + $0x1b8] sm:$0xff] }
 0xa03   :  { %vm984_vm9 = vmor %vm982_vm8, %vm983_vm7  ;;  %1187 = vmatpush.msra.mxu3 %v2336_v44  ;;  %v3157_v44 = vld [vmem:[%s3436_s1] sm:$0xff] }
 0xa04   :  { %v975_v53 = vsel %vm974_vm6, %v2525_v43, %v971_v50  ;;  %v978_v54 = vmul.f32 %v2527_v49, %v977_v51  ;;  %v2329_v43 = vld [vmem:[%s3433_s2 + $0x180] sm:$0xff]  ;;  %v2359_v50 = vld [vmem:[%s3433_s2 + $0x1b0] sm:$0xff] }
 0xa05   :  { %v986_v55 = vmul.f32 %v975_v53, %v952_v24  ;;  %1154 = vmatpush.msra.mxu2 %v2329_v43  ;;  %1344 = vmatpush.msrb.mxu3 %v2360_v48  ;;  %v2366_v51 = vld [vmem:[%s3433_s2 + $0x230] sm:$0xff]  ;;  %v2358_v53 = vld [vmem:[%s3433_s2 + $0x1a8] sm:$0xff] }
 0xa06   :  { %v979_v57 = vmul.f32 0.5, %v978_v54  ;;  %v2365_v54 = vld [vmem:[%s3433_s2 + $0x228] sm:$0xff] }
 0xa07   :  { %v989_v58 = vmul.f32 %v988_v52, %v986_v55  ;;  %1345 = vmatpush.msrb.mxu3 %v2359_v50 }
 0xa08   :  { %v980_v59 = vsub.f32 1.5, %v979_v57  ;;  %v2364_v57 = vld [vmem:[%s3433_s2 + $0x220] sm:$0xff] }
 0xa09   :  { %v992_v60 = vadd.f32 %v991_v56, %v989_v58  ;;  %1346 = vmatpush.msrb.mxu3 %v2358_v53 }
 0xa0a   :  { %v981_v61 = vmul.f32 %v2527_v49, %v980_v59 }
 0xa0b   :  { %2324 = vmatmul.msk.f32.vlgmr.msra.gmra.mxu0 %vm42_vm0, %v992_v60 }
 0xa0c   :  { %v985_v62 = vsel %vm984_vm9, %v2527_v49, %v981_v61  ;;  %v2367_v49 = vld [vmem:[%s3433_s2 + $0x238] sm:$0xff] }
 0xa0d   :  { %v987_v63 = vmul.f32 %v985_v62, %v953_v30  ;;  %1377 = vmatpush.msra.mxu0 %v2367_v49 }
 0xa0f   :  { %v990_v1 = vmul.f32 %v988_v52, %v987_v63  ;;  %1378 = vmatpush.msra.mxu0 %v2366_v51  ;;  %v2483_v51 = vld [vmem:[%s3435_s3 + $0x15] ss:$0 sm:$0xff] }
 0xa11   :  { %v993_v2 = vadd.f32 %v991_v56, %v990_v1  ;;  %v2357_v56 = vld [vmem:[%s3433_s2 + $0x1a0] sm:$0xff]  ;;  %1379 = vmatpush.msra.mxu0 %v2365_v54 }
 0xa12   :  { %1347 = vmatpush.msrb.mxu3 %v2357_v56 }
 0xa13   :  { %2325 = vmatmul.msk.f32.gmra.mxu0 %vm42_vm0, %v993_v2 }
 0xa14   :  { %1380 = vmatpush.msra.mxu0 %v2364_v57 }
 0xa88   :  { %v1022_v8 = vpop.f32.mrf.mxu0 }
 0xa89   :  { %v1023_v10 = vadd.f32 %v1022_v8, %v998_v7  ;;  %v1118_v8 = vperm.slane %v2955_v0, 6 }
 0xa8b   :  { %v1028_v11 = vmax.f32 %v1023_v10, 0.0 }
 0xa8d   :  { %2326 = vmatmul.msk.f32.vlgmr.msra.gmra.mxu1 %vm1039_vm10, %v1028_v11 }
 0xa90   :  { %v1025_v12 = vpop.f32.mrf.mxu0 }
 0xa91   :  { %v1026_v13 = vadd.f32 %v1025_v12, %v998_v7 }
 0xa93   :  { %v1029_v14 = vmax.f32 %v1026_v13, 0.0 }
 0xa95   :  { %2327 = vmatmul.msk.f32.gmra.mxu1 %vm1039_vm10, %v1029_v14 }
 0xb0a   :  { %v1063_v16 = vpop.f32.mrf.mxu1 }
 0xb0b   :  { %v1064_v17 = vadd.f32 %v1063_v16, %v1038_v15 }
 0xb0d   :  { %v1069_v19 = vadd.f32 %v1064_v17, %v992_v60 }
 0xb0f   :  { %v1071_v20 = vsel %vm42_vm0, %v1069_v19, 0.0 }
 0xb10   :  { %1072 = vadd.xlane.f32.xlu2 %v1071_v20 }
 0xb12   :  { %v1066_v22 = vpop.f32.mrf.mxu1 }
 0xb13   :  { %v1067_v23 = vadd.f32 %v1066_v22, %v1038_v15 }
 0xb15   :  { %v1070_v24 = vadd.f32 %v1067_v23, %v993_v2  ;;  %v2478_v23 = vld [vmem:[%s3435_s3 + $0x14] ss:$0 sm:$0xff] }
 0xb17   :  { %v1074_v25 = vsel %vm42_vm0, %v1070_v24, 0.0 }
 0xb18   :  { %1075 = vadd.xlane.f32.xlu0 %v1074_v25 }
 0xb83   :  { %v1073_v9 = vpop.xlane.xlu2 %1072 }
 0xb84   :  { %v1077_v26 = vmul.f32 %v1073_v9, %v2964_v6 }
 0xb86   :  { %v3019_v27 = vsub.f32 %v1069_v19, %v1077_v26  ;;  %v2480_v26 = vld [vmem:[%s3435_s3 + $0x10] ss:$0 sm:$0xff] }
 0xb88   :  { %v1081_v30 = vmul.f32 %v3019_v27, %v3019_v27 }
 0xb8a   :  { %v1083_v31 = vsel %vm42_vm0, %v1081_v30, 0.0 }
 0xb8b   :  { %v1076_v18 = vpop.xlane.xlu0 %1075  ;;  %1084 = vadd.xlane.f32.xlu1 %v1083_v31 }
 0xb8c   :  { %v1078_v29 = vmul.f32 %v1076_v18, %v2964_v6 }
 0xb8e   :  { %v3025_v33 = vsub.f32 %v1070_v24, %v1078_v29  ;;  %v2479_v29 = vld [vmem:[%s3435_s3 + $0xc] ss:$0 sm:$0xff] }
 0xb90   :  { %v1082_v35 = vmul.f32 %v3025_v33, %v3025_v33 }
 0xb92   :  { %v1086_v36 = vsel %vm42_vm0, %v1082_v35, 0.0  ;;  %v2374_v35 = vld [vmem:[%s3433_s2 + $0x2b8] sm:$0xff] }
 0xb93   :  { %1087 = vadd.xlane.f32.xlu2 %v1086_v36 }
 0xbfe   :  { %v1085_v45 = vpop.xlane.xlu1 %1084 }
 0xbff   :  { %v1089_v46 = vmul.f32 %v1085_v45, %v2964_v6 }
 0xc01   :  { %v1091_v47 = vadd.f32 1e-05, %v1089_v46 }
 0xc03   :  { %2528 = vrsqrt.f32 %v1091_v47  ;;  %vm1099_vm12 = vweird.f32 %v1091_v47 }
 0xc06   :  { %v1088_v52 = vpop.xlane.xlu2 %1087 }
 0xc07   :  { %v1090_v55 = vmul.f32 %v1088_v52, %v2964_v6 }
 0xc09   :  { %v2529_v58 = vpop.eup %2528  ;;  %v1092_v59 = vadd.f32 1e-05, %v1090_v55 }
 0xc0a   :  { %v1094_v60 = vmul.f32 %v2529_v58, %v1091_v47  ;;  %vm1100_vm11 = vweird.f32 %v2529_v58  ;;  %v3164_v47 = vld [vmem:[%s3436_s1 + $0x8] sm:$0xff] }
 0xc0b   :  { %2530 = vrsqrt.f32 %v1092_v59  ;;  %vm1101_vm13 = vmor %vm1099_vm12, %vm1100_vm11  ;;  %vm1109_vm15 = vweird.f32 %v1092_v59 }
 0xc0c   :  { %v1095_v61 = vmul.f32 %v2529_v58, %v1094_v60 }
 0xc0e   :  { %v1096_v62 = vmul.f32 0.5, %v1095_v61 }
 0xc10   :  { %v1097_v63 = vsub.f32 1.5, %v1096_v62 }
 0xc11   :  { %v2531_v1 = vpop.eup %2530 }
 0xc12   :  { %v1098_v2 = vmul.f32 %v2529_v58, %v1097_v63  ;;  %v1104_v3 = vmul.f32 %v2531_v1, %v1092_v59  ;;  %vm1110_vm14 = vweird.f32 %v2531_v1 }
 0xc13   :  { %vm1111_vm3 = vmor %vm1109_vm15, %vm1110_vm14 }
 0xc14   :  { %v1102_v5 = vsel %vm1101_vm13, %v2529_v58, %v1098_v2  ;;  %v1105_v7 = vmul.f32 %v2531_v1, %v1104_v3 }
 0xc15   :  { %v1113_v10 = vmul.f32 %v1102_v5, %v3019_v27 }
 0xc16   :  { %v1106_v11 = vmul.f32 0.5, %v1105_v7 }
 0xc17   :  { %v1116_v12 = vmul.f32 %v1115_v4, %v1113_v10 }
 0xc18   :  { %v1107_v13 = vsub.f32 1.5, %v1106_v11  ;;  %v2392_v11 = vld [vmem:[%s3433_s2 + $0x1d8] sm:$0xff] }
 0xc19   :  { %v3095_v14 = vadd.f32 %v1118_v8, %v1116_v12 }
 0xc1a   :  { %v1108_v15 = vmul.f32 %v2531_v1, %v1107_v13 }
 0xc1b   :  { %2334 = vmatmul.msk.f32.vlgmr.msra.gmra.mxu2 %vm42_vm0, %v3095_v14  ;;  %2341 = vmatmul.msk.f32.vlgmr.msra.gmra.mxu3 %vm42_vm0, %v3095_v14 }
 0xc1c   :  { %v1112_v16 = vsel %vm1111_vm3, %v2531_v1, %v1108_v15  ;;  %2348 = vmatmul.msk.f32.vlgmr.msrb.gmra.mxu0 %vm42_vm0, %v3095_v14  ;;  %v2391_v15 = vld [vmem:[%s3433_s2 + $0x1d0] sm:$0xff] }
 0xc1d   :  { %v1114_v0 = vmul.f32 %v1112_v16, %v3025_v33 }
 0xc1f   :  { %v1117_v17 = vmul.f32 %v1115_v4, %v1114_v0  ;;  %v2390_v0 = vld [vmem:[%s3433_s2 + $0x1c8] sm:$0xff] }
 0xc21   :  { %v3104_v19 = vadd.f32 %v1118_v8, %v1117_v17 }
 0xc23   :  { %2335 = vmatmul.msk.f32.gmra.mxu2 %vm42_vm0, %v3104_v19  ;;  %2342 = vmatmul.msk.f32.gmra.mxu3 %vm42_vm0, %v3104_v19 }
 0xc24   :  { %2349 = vmatmul.msk.f32.gmra.mxu0 %vm42_vm0, %v3104_v19 }
 0xc2b   :  { %2362 = vmatmul.msk.f32.vlgmr.msrb.gmra.mxu3 %vm42_vm0, %v3095_v14 }
 0xc2c   :  { %2369 = vmatmul.msk.f32.vlgmr.msra.gmra.mxu0 %vm42_vm0, %v3095_v14 }
 0xc33   :  { %2363 = vmatmul.msk.f32.gmra.mxu3 %vm42_vm0, %v3104_v19 }
 0xc34   :  { %2370 = vmatmul.msk.f32.gmra.mxu0 %vm42_vm0, %v3104_v19 }
 0xc99   :  { %v1222_v20 = vpop.f32.mrf.mxu0 }
 0xc9a   :  { %v1223_v9 = vadd.f32 %v2478_v23, %v1222_v20  ;;  %v2389_v20 = vld [vmem:[%s3433_s2 + $0x1c0] sm:$0xff] }
 0xc9e   :  { %v1189_v22 = vpop.f32.mrf.mxu3  ;;  %v1156_v31 = vpop.f32.mrf.mxu2 }
 0xc9f   :  { %v1190_v33 = vadd.f32 %v2480_v26, %v1189_v22  ;;  %v1157_v36 = vadd.f32 %v2479_v29, %v1156_v31 }
 0xca1   :  { %v1225_v24 = vpop.f32.mrf.mxu0 }
 0xca2   :  { %v1226_v25 = vadd.f32 %v2478_v23, %v1225_v24  ;;  %v2482_v24 = vld [vmem:[%s3435_s3 + $0xd] ss:$0 sm:$0xff] }
 0xca4   :  { %1311 = vmatpush.msrb.mxu2 %v1226_v25 }
 0xca6   :  { %1312 = vmatpush.msrb.mxu2 %v1223_v9  ;;  %v1192_v27 = vpop.f32.mrf.mxu3  ;;  %v1159_v41 = vpop.f32.mrf.mxu2 }
 0xca7   :  { %v1193_v30 = vadd.f32 %v2480_v26, %v1192_v27  ;;  %v1160_v42 = vadd.f32 %v2479_v29, %v1159_v41  ;;  %v2356_v27 = vld [vmem:[%s3437_s4 + $0x20] sm:$0xff] }
 0xca9   :  { %v1382_v18 = vpop.f32.mrf.mxu0  ;;  %2350 = vmatpush.xpose.msk.msrb.mxu1 %vm138_vm1, %v1193_v30 }
 0xcaa   :  { %v1383_v28 = vadd.f32 %v2481_v38, %v1382_v18 }
 0xcad   :  { %2351 = vmatpush.xpose.msk.msrb.mxu1 %vm138_vm1, %v1190_v33 }
 0xcae   :  { %v1349_v23 = vpop.f32.mrf.mxu3 }
 0xcaf   :  { %v1350_v25 = vadd.f32 %v2482_v24, %v1349_v23 }
 0xcb0   :  { %2352 = vmatmul.msk.f32.vlgmr.msrb.gmra.mxu1 %vm138_vm1, %v1157_v36 }
 0xcb1   :  { %1410 = vmatpush.msra.mxu1 %v2374_v35  ;;  %v1385_v34 = vpop.f32.mrf.mxu0 }
 0xcb2   :  { %v1386_v39 = vadd.f32 %v2481_v38, %v1385_v34 }
 0xcb3   :  { %1411 = vmatpush.msra.mxu1 %v2373_v37 }
 0xcb4   :  { %2378 = vmatpush.xpose.msk.msra.mxu2 %vm138_vm1, %v1386_v39 }
 0xcb5   :  { %1412 = vmatpush.msra.mxu1 %v2372_v21 }
 0xcb6   :  { %v1352_v9 = vpop.f32.mrf.mxu3 }
 0xcb7   :  { %1413 = vmatpush.msra.mxu1 %v2371_v40  ;;  %v1353_v26 = vadd.f32 %v2482_v24, %v1352_v9  ;;  %v2428_v24 = vld [vmem:[%s3433_s2 + $0x270] sm:$0xff]  ;;  %v2426_v9 = vld [vmem:[%s3433_s2 + $0x260] sm:$0xff] }
 0xcb8   :  { %2379 = vmatpush.xpose.msk.msra.mxu2 %vm138_vm1, %v1383_v28  ;;  %2353 = vmatmul.msk.f32.gmra.mxu1 %vm138_vm1, %v1160_v42 }
 0xcb9   :  { %1565 = vmatpush.msrb.mxu1 %v2356_v27 }
 0xcc0   :  { %2376 = vmatmul.msk.f32.vlgmr.msra.gmra.mxu1 %vm42_vm0, %v3095_v14 }
 0xcc8   :  { %2377 = vmatmul.msk.f32.gmra.mxu1 %vm42_vm0, %v3104_v19 }
 0xd2d   :  { %v1257_v43 = vpop.f32.mrf.mxu1 }
 0xd2e   :  { %v1258_v32 = vadd.f32 %v3157_v44, %v1257_v43 }
 0xd30   :  { %v1263_v45 = vsel %vm174_vm2, %v1258_v32, -inf }
 0xd31   :  { %1264 = vmax.xlane.f32.xlu0 %v1263_v45  ;;  %v2399_v45 = vld [vmem:[%s3433_s2 + $0x258] sm:$0xff] }
 0xd35   :  { %v1260_v46 = vpop.f32.mrf.mxu1 }
 0xd36   :  { %v1261_v48 = vadd.f32 %v3164_v47, %v1260_v46  ;;  %v2398_v46 = vld [vmem:[%s3433_s2 + $0x250] sm:$0xff] }
 0xd38   :  { %v1266_v49 = vsel %vm174_vm2, %v1261_v48, -inf }
 0xd39   :  { %1267 = vmax.xlane.f32.xlu1 %v1266_v49  ;;  %v2396_v49 = vld [vmem:[%s3433_s2 + $0x240] sm:$0xff] }
 0xd3d   :  { %v1415_v50 = vpop.f32.mrf.mxu1 }
 0xd3e   :  { %v1416_v54 = vadd.f32 %v2483_v51, %v1415_v50 }
 0xd45   :  { %v1418_v52 = vpop.f32.mrf.mxu1 }
 0xd46   :  { %v1419_v53 = vadd.f32 %v2483_v51, %v1418_v52 }
 0xd48   :  { %1504 = vmatpush.msra.mxu3 %v1419_v53 }
 0xd4a   :  { %1505 = vmatpush.msra.mxu3 %v1416_v54 }
 0xd4c   :  { %1628 = vmatpush.msrb.mxu3 %v2399_v45  ;;  %v2488_v45 = vld [vmem:[%s3435_s3 + $0x13] ss:$0 sm:$0xff] }
 0xd4e   :  { %1629 = vmatpush.msrb.mxu3 %v2398_v46 }
 0xda4   :  { %v1265_v55 = vpop.xlane.xlu0 %1264 }
 0xda5   :  { %v1269_v56 = vsub.f32 %v1258_v32, %v1265_v55 }
 0xda7   :  { %v1271_v57 = vmul.f32 1.442695, %v1269_v56 }
 0xda9   :  { %2532 = vpow2.f32 %v1271_v57 }
 0xdac   :  { %v1268_v58 = vpop.xlane.xlu1 %1267 }
 0xdad   :  { %v1270_v59 = vsub.f32 %v1261_v48, %v1268_v58  ;;  %v2397_v48 = vld [vmem:[%s3433_s2 + $0x248] sm:$0xff] }
 0xdae   :  { %1630 = vmatpush.msrb.mxu3 %v2397_v48 }
 0xdaf   :  { %v2533_v60 = vpop.eup %2532  ;;  %v1273_v61 = vmul.f32 1.442695, %v1270_v59 }
 0xdb0   :  { %v1275_v62 = vsel %vm174_vm2, %v2533_v60, 0.0  ;;  %1631 = vmatpush.msrb.mxu3 %v2396_v49 }
 0xdb1   :  { %2534 = vpow2.f32 %v1273_v61  ;;  %1276 = vadd.xlane.f32.xlu2 %v1275_v62  ;;  %v2384_v62 = vld [vmem:[%s3437_s4 + $0x28] sm:$0xff] }
 0xdb2   :  { %1536 = vmatpush.msrb.mxu0 %v2384_v62  ;;  %v2434_v62 = vld [vmem:[%s3433_s2 + $0x2e8] sm:$0xff] }
 0xdb7   :  { %v2535_v63 = vpop.eup %2534 }
 0xdb8   :  { %v1278_v1 = vsel %vm174_vm2, %v2535_v63, 0.0 }
 0xdb9   :  { %1279 = vadd.xlane.f32.xlu0 %v1278_v1  ;;  %v2405_v1 = vld [vmem:[%s3433_s2 + $0x2d0] sm:$0xff] }
 0xe24   :  { %v1277_v2 = vpop.xlane.xlu2 %1276 }
 0xe25   :  { %2536 = vrcp.f32 %v1277_v2 }
 0xe2b   :  { %v2537_v3 = vpop.eup %2536 }
 0xe2c   :  { %v1283_v4 = vmul.f32 %v2537_v3, %v1277_v2  ;;  %v1280_v5 = vpop.xlane.xlu0 %1279  ;;  %v2404_v2 = vld [vmem:[%s3433_s2 + $0x2c8] sm:$0xff] }
 0xe2d   :  { %2538 = vrcp.f32 %v1280_v5 }
 0xe2e   :  { %v1285_v7 = vsub.f32 2.0, %v1283_v4  ;;  %v2422_v4 = vld [vmem:[%s3433_s2 + $0x1f8] sm:$0xff] }
 0xe30   :  { %v1287_v8 = vmul.f32 %v2537_v3, %v1285_v7  ;;  %v2403_v3 = vld [vmem:[%s3433_s2 + $0x2c0] sm:$0xff]  ;;  %v2421_v7 = vld [vmem:[%s3433_s2 + $0x1f0] sm:$0xff] }
 0xe32   :  { %v1289_v10 = vmul.f32 %v2533_v60, %v1287_v8  ;;  %v2420_v8 = vld [vmem:[%s3433_s2 + $0x1e8] sm:$0xff] }
 0xe33   :  { %v2539_v12 = vpop.eup %2538 }
 0xe34   :  { %v1284_v13 = vmul.f32 %v2539_v12, %v1280_v5  ;;  %2354 = vmatmul.msk.f32.vlgmr.msrb.gmra.mxu2 %vm174_vm2, %v1289_v10  ;;  %v2419_v10 = vld [vmem:[%s3433_s2 + $0x1e0] sm:$0xff] }
 0xe35   :  { %1595 = vmatpush.msrb.mxu2 %v2392_v11 }
 0xe36   :  { %v1286_v16 = vsub.f32 2.0, %v1284_v13  ;;  %v2485_v13 = vld [vmem:[%s3435_s3 + $0x12] ss:$0 sm:$0xff] }
 0xe37   :  { %1596 = vmatpush.msrb.mxu2 %v2391_v15 }
 0xe38   :  { %v1288_v17 = vmul.f32 %v2539_v12, %v1286_v16 }
 0xe39   :  { %1597 = vmatpush.msrb.mxu2 %v2390_v0 }
 0xe3a   :  { %v1290_v22 = vmul.f32 %v2535_v63, %v1288_v17  ;;  %v2406_v63 = vld [vmem:[%s3433_s2 + $0x2d8] sm:$0xff]  ;;  %v2484_v17 = vld [vmem:[%s3435_s3 + $0xe] ss:$0 sm:$0xff] }
 0xe3b   :  { %1598 = vmatpush.msrb.mxu2 %v2389_v20  ;;  %1661 = vmatpush.msra.mxu0 %v2406_v63  ;;  %v2433_v63 = vld [vmem:[%s3433_s2 + $0x2e0] sm:$0xff] }
 0xe3c   :  { %2355 = vmatmul.msk.f32.gmra.mxu2 %vm174_vm2, %v1290_v22  ;;  %v2429_v22 = vld [vmem:[%s3433_s2 + $0x278] sm:$0xff] }
 0xe3d   :  { %1662 = vmatpush.msra.mxu0 %v2405_v1 }
 0xe3f   :  { %1663 = vmatpush.msra.mxu0 %v2404_v2 }
 0xe41   :  { %1664 = vmatpush.msra.mxu0 %v2403_v3 }
 0xe44   :  { %2380 = vmatmul.msk.f32.vlgmr.msra.gmra.mxu2 %vm138_vm1, %v1350_v25  ;;  %v2427_v25 = vld [vmem:[%s3433_s2 + $0x268] sm:$0xff] }
 0xe4c   :  { %2381 = vmatmul.msk.f32.gmra.mxu2 %vm138_vm1, %v1353_v26 }
 0xe54   :  { %2394 = vmatmul.msk.f32.vlgmr.msrb.gmra.mxu2 %vm42_vm0, %v3095_v14 }
 0xe5c   :  { %2395 = vmatmul.msk.f32.gmra.mxu2 %vm42_vm0, %v3104_v19 }
 0xeb7   :  { %v1314_v30 = vpop.f32.mrf.mxu2 }
 0xeb8   :  { %2387 = vmatmul.msk.f32.vlgmr.msrb.gmra.mxu1 %vm138_vm1, %v1314_v30 }
 0xebf   :  { %v1317_v31 = vpop.f32.mrf.mxu2 }
 0xec0   :  { %2388 = vmatmul.msk.f32.gmra.mxu1 %vm138_vm1, %v1317_v31 }
 0xec7   :  { %v1450_v18 = vpop.f32.mrf.mxu2 }
 0xec8   :  { %v1451_v29 = vadd.f32 %v3157_v44, %v1450_v18 }
 0xeca   :  { %v1456_v33 = vsel %vm174_vm2, %v1451_v29, -inf }
 0xecb   :  { %1457 = vmax.xlane.f32.xlu1 %v1456_v33 }
 0xecf   :  { %v1453_v35 = vpop.f32.mrf.mxu2 }
 0xed0   :  { %v1454_v36 = vadd.f32 %v3164_v47, %v1453_v35 }
 0xed2   :  { %v1459_v37 = vsel %vm174_vm2, %v1454_v36, -inf }
 0xed3   :  { %1460 = vmax.xlane.f32.xlu2 %v1459_v37 }
 0xed7   :  { %v1600_v0 = vpop.f32.mrf.mxu2 }
 0xed8   :  { %v1601_v23 = vadd.f32 %v2484_v17, %v1600_v0 }
 0xedf   :  { %v1603_v26 = vpop.f32.mrf.mxu2 }
 0xee0   :  { %v1604_v27 = vadd.f32 %v2484_v17, %v1603_v26 }
 0xf35   :  { %v3288_v30 = vpop.f32.mrf.mxu1 }
 0xf3d   :  { %v1570_v18 = vpop.f32.mrf.mxu1 }
 0xf3e   :  { %v1458_v38 = vpop.xlane.xlu1 %1457 }
 0xf3f   :  { %v1462_v21 = vsub.f32 %v1451_v29, %v1458_v38 }
 0xf41   :  { %v1464_v34 = vmul.f32 1.442695, %v1462_v21  ;;  %v2416_v21 = vld [vmem:[%s3437_s4 + $0x30] sm:$0xff] }
 0xf43   :  { %2540 = vpow2.f32 %v1464_v34 }
 0xf46   :  { %v1461_v39 = vpop.xlane.xlu2 %1460 }
 0xf47   :  { %v1463_v40 = vsub.f32 %v1454_v36, %v1461_v39  ;;  %v2486_v36 = vld [vmem:[%s3435_s3 + $0x16] ss:$0 sm:$0xff] }
 0xf49   :  { %v2541_v41 = vpop.eup %2540  ;;  %v1466_v42 = vmul.f32 1.442695, %v1463_v40 }
 0xf4a   :  { %v1468_v28 = vsel %vm174_vm2, %v2541_v41, 0.0 }
 0xf4b   :  { %2542 = vpow2.f32 %v1466_v42  ;;  %1469 = vadd.xlane.f32.xlu0 %v1468_v28 }
 0xf51   :  { %v2543_v43 = vpop.eup %2542 }
 0xf52   :  { %v1471_v32 = vsel %vm174_vm2, %v2543_v43, 0.0 }
 0xf53   :  { %1472 = vadd.xlane.f32.xlu1 %v1471_v32 }
 0xfbe   :  { %v1470_v50 = vpop.xlane.xlu0 %1469 }
 0xfbf   :  { %2544 = vrcp.f32 %v1470_v50 }
 0xfc5   :  { %v2545_v51 = vpop.eup %2544 }
 0xfc6   :  { %v1476_v52 = vmul.f32 %v2545_v51, %v1470_v50  ;;  %v1473_v53 = vpop.xlane.xlu1 %1472 }
 0xfc7   :  { %2546 = vrcp.f32 %v1473_v53 }
 0xfc8   :  { %v1478_v54 = vsub.f32 2.0, %v1476_v52 }
 0xfca   :  { %v1480_v55 = vmul.f32 %v2545_v51, %v1478_v54 }
 0xfcc   :  { %v1482_v56 = vmul.f32 %v2541_v41, %v1480_v55 }
 0xfcd   :  { %v2547_v57 = vpop.eup %2546 }
 0xfce   :  { %v1477_v58 = vmul.f32 %v2547_v57, %v1473_v53  ;;  %2382 = vmatmul.msk.f32.vlgmr.msra.gmra.mxu3 %vm174_vm2, %v1482_v56 }
 0xfcf   :  { %1787 = vmatpush.msra.mxu3 %v2416_v21 }
 0xfd0   :  { %v1479_v59 = vsub.f32 2.0, %v1477_v58 }
 0xfd2   :  { %v1481_v60 = vmul.f32 %v2547_v57, %v1479_v59 }
 0xfd4   :  { %v1483_v61 = vmul.f32 %v2543_v43, %v1481_v60  ;;  %v2436_v60 = vld [vmem:[%s3433_s2 + $0x2f8] sm:$0xff] }
 0xfd6   :  { %2383 = vmatmul.msk.f32.gmra.mxu3 %vm174_vm2, %v1483_v61  ;;  %v2435_v61 = vld [vmem:[%s3433_s2 + $0x2f0] sm:$0xff] }
 0xfde   :  { %2401 = vmatmul.msk.f32.vlgmr.msrb.gmra.mxu3 %vm42_vm0, %v3095_v14 }
 0xfe6   :  { %2402 = vmatmul.msk.f32.gmra.mxu3 %vm42_vm0, %v3104_v19 }
0x1051   :  { %v1507_v5 = vpop.f32.mrf.mxu3 }
0x1052   :  { %2385 = vmatmul.msk.f32.vlgmr.msrb.gmra.mxu0 %vm138_vm1, %v1507_v5 }
0x1053   :  { %1819 = vmatpush.msrb.mxu0 %v2422_v4 }
0x1055   :  { %1820 = vmatpush.msrb.mxu0 %v2421_v7 }
0x1057   :  { %1821 = vmatpush.msrb.mxu0 %v2420_v8 }
0x1059   :  { %v1510_v11 = vpop.f32.mrf.mxu3  ;;  %1822 = vmatpush.msrb.mxu0 %v2419_v10 }
0x105a   :  { %2386 = vmatmul.msk.f32.gmra.mxu0 %vm138_vm1, %v1510_v11 }
0x1061   :  { %v1633_v12 = vpop.f32.mrf.mxu3 }
0x1062   :  { %2408 = vmatmul.msk.f32.vlgmr.msra.gmra.mxu0 %vm42_vm0, %v3095_v14  ;;  %v1634_v20 = vadd.f32 %v2485_v13, %v1633_v12 }
0x1069   :  { %v1636_v15 = vpop.f32.mrf.mxu3 }
0x106a   :  { %v1637_v16 = vadd.f32 %v2485_v13, %v1636_v15  ;;  %2409 = vmatmul.msk.f32.gmra.mxu0 %vm42_vm0, %v3104_v19 }
0x106c   :  { %2410 = vmatpush.xpose.msk.msra.mxu1 %vm138_vm1, %v1637_v16 }
0x1070   :  { %2411 = vmatpush.xpose.msk.msra.mxu1 %vm138_vm1, %v1634_v20  ;;  %v2487_v20 = vld [vmem:[%s3435_s3 + $0xf] ss:$0 sm:$0xff] }
0x1072   :  { %2424 = vmatmul.msk.f32.vlgmr.msrb.gmra.mxu0 %vm42_vm0, %v3095_v14 }
0x1073   :  { %2412 = vmatmul.msk.f32.vlgmr.msra.gmra.mxu1 %vm138_vm1, %v1601_v23 }
0x1074   :  { %1852 = vmatpush.msrb.mxu1 %v2429_v22 }
0x1076   :  { %1853 = vmatpush.msrb.mxu1 %v2428_v24 }
0x1078   :  { %1854 = vmatpush.msrb.mxu1 %v2427_v25 }
0x107a   :  { %1855 = vmatpush.msrb.mxu1 %v2426_v9  ;;  %2425 = vmatmul.msk.f32.gmra.mxu0 %vm42_vm0, %v3104_v19  ;;  %v2489_v9 = vld [vmem:[%s3435_s3 + $0x17] ss:$0 sm:$0xff] }
0x107b   :  { %2413 = vmatmul.msk.f32.gmra.mxu1 %vm138_vm1, %v1604_v27 }
0x1083   :  { %2431 = vmatmul.msk.f32.vlgmr.msrb.gmra.mxu1 %vm42_vm0, %v3095_v14 }
0x108b   :  { %2432 = vmatmul.msk.f32.gmra.mxu1 %vm42_vm0, %v3104_v19 }
0x10cf   :  { %v3290_v31 = vpop.f32.mrf.mxu0 }
0x10d7   :  { %v1541_v29 = vpop.f32.mrf.mxu0 }
0x10d8   :  { %v3292_v33 = vadd.f32 %v1570_v18, %v1541_v29  ;;  %v1568_v29 = vadd.f32 %v3288_v30, %v3290_v31 }
0x10df   :  { %v1666_v35 = vpop.f32.mrf.mxu0 }
0x10e0   :  { %v1667_v34 = vadd.f32 %v2486_v36, %v1666_v35 }
0x10e7   :  { %v1669_v37 = vpop.f32.mrf.mxu0 }
0x10e8   :  { %v1670_v38 = vadd.f32 %v2486_v36, %v1669_v37 }
0x10ea   :  { %1755 = vmatpush.msra.mxu2 %v1670_v38 }
0x10ec   :  { %1756 = vmatpush.msra.mxu2 %v1667_v34 }
0x10ee   :  { %1885 = vmatpush.msrb.mxu2 %v2436_v60 }
0x10ef   :  { %v1824_v17 = vpop.f32.mrf.mxu0 }
0x10f0   :  { %v1701_v39 = vpop.f32.mrf.mxu1  ;;  %1886 = vmatpush.msrb.mxu2 %v2435_v61  ;;  %v1825_v22 = vadd.f32 %v2487_v20, %v1824_v17 }
0x10f1   :  { %v1702_v40 = vadd.f32 %v3157_v44, %v1701_v39 }
0x10f2   :  { %1887 = vmatpush.msrb.mxu2 %v2434_v62 }
0x10f3   :  { %v1707_v41 = vsel %vm174_vm2, %v1702_v40, -inf }
0x10f4   :  { %1708 = vmax.xlane.f32.xlu2 %v1707_v41  ;;  %1888 = vmatpush.msrb.mxu2 %v2433_v63  ;;  %v3358_v63 = vld [vmem:[%s3438_s7 + $0x8] sm:$0x7f] }
0x10f7   :  { %v1827_v24 = vpop.f32.mrf.mxu0 }
0x10f8   :  { %v1704_v42 = vpop.f32.mrf.mxu1  ;;  %v1828_v25 = vadd.f32 %v2487_v20, %v1827_v24 }
0x10f9   :  { %v1705_v28 = vadd.f32 %v3164_v47, %v1704_v42 }
0x10fb   :  { %v1710_v43 = vsel %vm174_vm2, %v1705_v28, -inf }
0x10fc   :  { %1711 = vmax.xlane.f32.xlu0 %v1710_v43 }
0x1100   :  { %v1857_v32 = vpop.f32.mrf.mxu1 }
0x1101   :  { %v1858_v49 = vadd.f32 %v2488_v45, %v1857_v32 }
0x1108   :  { %v1860_v46 = vpop.f32.mrf.mxu1 }
0x1109   :  { %v1861_v48 = vadd.f32 %v2488_v45, %v1860_v46 }
0x110b   :  { %2440 = vmatpush.xpose.msk.msrb.mxu3 %vm138_vm1, %v1861_v48 }
0x110f   :  { %2441 = vmatpush.xpose.msk.msrb.mxu3 %vm138_vm1, %v1858_v49 }
0x1167   :  { %v1709_v50 = vpop.xlane.xlu2 %1708 }
0x1168   :  { %v1713_v51 = vsub.f32 %v1702_v40, %v1709_v50 }
0x116a   :  { %v1715_v52 = vmul.f32 1.442695, %v1713_v51 }
0x116c   :  { %2548 = vpow2.f32 %v1715_v52 }
0x116f   :  { %v1712_v53 = vpop.xlane.xlu0 %1711 }
0x1170   :  { %v1714_v54 = vsub.f32 %v1705_v28, %v1712_v53 }
0x1172   :  { %v2549_v55 = vpop.eup %2548  ;;  %v1717_v56 = vmul.f32 1.442695, %v1714_v54 }
0x1173   :  { %v1719_v57 = vsel %vm174_vm2, %v2549_v55, 0.0 }
0x1174   :  { %2550 = vpow2.f32 %v1717_v56  ;;  %1720 = vadd.xlane.f32.xlu1 %v1719_v57 }
0x117a   :  { %v2551_v58 = vpop.eup %2550 }
0x117b   :  { %v1722_v59 = vsel %vm174_vm2, %v2551_v58, 0.0 }
0x117c   :  { %1723 = vadd.xlane.f32.xlu2 %v1722_v59 }
0x11e7   :  { %v1721_v1 = vpop.xlane.xlu1 %1720 }
0x11e8   :  { %2552 = vrcp.f32 %v1721_v1 }
0x11ee   :  { %v2553_v2 = vpop.eup %2552 }
0x11ef   :  { %v1727_v3 = vmul.f32 %v2553_v2, %v1721_v1  ;;  %v1724_v4 = vpop.xlane.xlu2 %1723  ;;  %v2021_v1 = vperm.slane %v3358_v63, 0 }
0x11f0   :  { %2554 = vrcp.f32 %v1724_v4 }
0x11f1   :  { %v1729_v5 = vsub.f32 2.0, %v1727_v3 }
0x11f3   :  { %v1731_v7 = vmul.f32 %v2553_v2, %v1729_v5 }
0x11f5   :  { %v1733_v8 = vmul.f32 %v2549_v55, %v1731_v7 }
0x11f6   :  { %v2555_v10 = vpop.eup %2554 }
0x11f7   :  { %v1728_v11 = vmul.f32 %v2555_v10, %v1724_v4  ;;  %2414 = vmatmul.msk.f32.vlgmr.msra.gmra.mxu2 %vm174_vm2, %v1733_v8 }
0x11f9   :  { %v1730_v12 = vsub.f32 2.0, %v1728_v11 }
0x11fb   :  { %v1732_v13 = vmul.f32 %v2555_v10, %v1730_v12 }
0x11fd   :  { %v1734_v15 = vmul.f32 %v2551_v58, %v1732_v13 }
0x11ff   :  { %2415 = vmatmul.msk.f32.gmra.mxu2 %vm174_vm2, %v1734_v15 }
0x1207   :  { %2438 = vmatmul.msk.f32.vlgmr.msrb.gmra.mxu2 %vm42_vm0, %v3095_v14 }
0x120f   :  { %2439 = vmatmul.msk.f32.gmra.mxu2 %vm42_vm0, %v3104_v19 }
0x127a   :  { %v1758_v16 = vpop.f32.mrf.mxu2 }
0x127b   :  { %2417 = vmatmul.msk.f32.vlgmr.msra.gmra.mxu3 %vm138_vm1, %v1758_v16 }
0x1282   :  { %v1761_v0 = vpop.f32.mrf.mxu2 }
0x1283   :  { %2418 = vmatmul.msk.f32.gmra.mxu3 %vm138_vm1, %v1761_v0 }
0x128a   :  { %v1890_v23 = vpop.f32.mrf.mxu2 }
0x128b   :  { %2442 = vmatmul.msk.f32.vlgmr.msrb.gmra.mxu3 %vm138_vm1, %v1825_v22  ;;  %v1891_v18 = vadd.f32 %v2489_v9, %v1890_v23 }
0x1292   :  { %v1893_v26 = vpop.f32.mrf.mxu2 }
0x1293   :  { %v1894_v27 = vadd.f32 %v2489_v9, %v1893_v26  ;;  %2443 = vmatmul.msk.f32.gmra.mxu3 %vm138_vm1, %v1828_v25  ;;  %v2451_v9 = vld [vmem:[%s3439_s5 + $0x30] sm:$0xff]  ;;  %v2450_v26 = vld [vmem:[%s3439_s5 + $0x28] sm:$0xff] }
0x1295   :  { %1979 = vmatpush.msra.mxu0 %v1894_v27  ;;  %v2449_v27 = vld [vmem:[%s3439_s5 + $0x20] sm:$0xff] }
0x1297   :  { %1980 = vmatpush.msra.mxu0 %v1891_v18 }
0x12fe   :  { %v1789_v35 = vpop.f32.mrf.mxu3 }
0x12ff   :  { %v1795_v36 = vadd.f32 %v1789_v35, %v1568_v29 }
0x1306   :  { %v1792_v37 = vpop.f32.mrf.mxu3 }
0x1307   :  { %v1796_v38 = vadd.f32 %v1792_v37, %v3292_v33  ;;  %v2461_v37 = vld [vmem:[%s3440_s6 + $0x70] sm:$0xff] }
0x130e   :  { %v1925_v21 = vpop.f32.mrf.mxu3 }
0x130f   :  { %v1926_v34 = vadd.f32 %v3157_v44, %v1925_v21 }
0x1311   :  { %v1931_v39 = vsel %vm174_vm2, %v1926_v34, -inf }
0x1312   :  { %1932 = vmax.xlane.f32.xlu0 %v1931_v39  ;;  %v2459_v39 = vld [vmem:[%s3440_s6 + $0x60] sm:$0xff] }
0x1316   :  { %v1928_v40 = vpop.f32.mrf.mxu3 }
0x1317   :  { %v1929_v41 = vadd.f32 %v3164_v47, %v1928_v40  ;;  %v2446_v47 = vld [vmem:[%s3437_s4 + $0x38] sm:$0xff] }
0x1318   :  { %2011 = vmatpush.msra.mxu1 %v2446_v47  ;;  %v2073_v47 = vperm.slane %v3358_v63, 4 }
0x1319   :  { %v1934_v42 = vsel %vm174_vm2, %v1929_v41, -inf }
0x131a   :  { %1935 = vmax.xlane.f32.xlu1 %v1934_v42  ;;  %v2458_v42 = vld [vmem:[%s3440_s6 + $0x58] sm:$0xff] }
0x1385   :  { %v1933_v28 = vpop.xlane.xlu0 %1932 }
0x1386   :  { %v1937_v43 = vsub.f32 %v1926_v34, %v1933_v28 }
0x1388   :  { %v1939_v30 = vmul.f32 1.442695, %v1937_v43 }
0x138a   :  { %2556 = vpow2.f32 %v1939_v30 }
0x138d   :  { %v1936_v31 = vpop.xlane.xlu1 %1935 }
0x138e   :  { %v1938_v32 = vsub.f32 %v1929_v41, %v1936_v31 }
0x1390   :  { %v2557_v45 = vpop.eup %2556  ;;  %v1941_v33 = vmul.f32 1.442695, %v1938_v32 }
0x1391   :  { %v1943_v46 = vsel %vm174_vm2, %v2557_v45, 0.0 }
0x1392   :  { %2558 = vpow2.f32 %v1941_v33  ;;  %1944 = vadd.xlane.f32.xlu2 %v1943_v46  ;;  %v2070_v46 = vperm.slane %v3358_v63, 3 }
0x1398   :  { %v2559_v44 = vpop.eup %2558 }
0x1399   :  { %v1946_v48 = vsel %vm174_vm2, %v2559_v44, 0.0 }
0x139a   :  { %1947 = vadd.xlane.f32.xlu0 %v1946_v48 }
0x1405   :  { %v1945_v49 = vpop.xlane.xlu2 %1944 }
0x1406   :  { %2560 = vrcp.f32 %v1945_v49 }
0x140c   :  { %v2561_v50 = vpop.eup %2560 }
0x140d   :  { %v1951_v51 = vmul.f32 %v2561_v50, %v1945_v49  ;;  %v1948_v52 = vpop.xlane.xlu0 %1947 }
0x140e   :  { %2562 = vrcp.f32 %v1948_v52 }
0x140f   :  { %v1953_v53 = vsub.f32 2.0, %v1951_v51 }
0x1411   :  { %v1955_v54 = vmul.f32 %v2561_v50, %v1953_v53 }
0x1413   :  { %v1957_v55 = vmul.f32 %v2557_v45, %v1955_v54 }
0x1414   :  { %v2563_v56 = vpop.eup %2562 }
0x1415   :  { %v1952_v57 = vmul.f32 %v2563_v56, %v1948_v52  ;;  %2444 = vmatmul.msk.f32.vlgmr.msra.gmra.mxu0 %vm174_vm2, %v1957_v55 }
0x1417   :  { %v1954_v58 = vsub.f32 2.0, %v1952_v57 }
0x1419   :  { %v1956_v59 = vmul.f32 %v2563_v56, %v1954_v58 }
0x141b   :  { %v1958_v60 = vmul.f32 %v2559_v44, %v1956_v59  ;;  %v2457_v59 = vld [vmem:[%s3440_s6 + $0x50] sm:$0xff] }
0x141d   :  { %2445 = vmatmul.msk.f32.gmra.mxu0 %vm174_vm2, %v1958_v60  ;;  %v2456_v60 = vld [vmem:[%s3440_s6 + $0x48] sm:$0xff] }
0x1492   :  { %v1982_v61 = vpop.f32.mrf.mxu0 }
0x1493   :  { %2447 = vmatmul.msk.f32.vlgmr.msra.gmra.mxu1 %vm138_vm1, %v1982_v61  ;;  %v2455_v61 = vld [vmem:[%s3440_s6 + $0x40] sm:$0xff] }
0x149a   :  { %v1985_v62 = vpop.f32.mrf.mxu0 }
0x149b   :  { %2448 = vmatmul.msk.f32.gmra.mxu1 %vm138_vm1, %v1985_v62  ;;  %v2081_v62 = vperm.slane %v3358_v63, 1 }
0x1510   :  { %v2013_v2 = vpop.f32.mrf.mxu1 }
0x1511   :  { %v2019_v3 = vadd.f32 %v2013_v2, %v1795_v36  ;;  %v2462_v36 = vld [vmem:[%s3440_s6 + $0x78] sm:$0xff] }
0x1512   :  { %2137 = vmatpush.msra.mxu3 %v2462_v36 }
0x1513   :  { %v2022_v4 = vadd.f32 %v2021_v1, %v2019_v3 }
0x1514   :  { %2138 = vmatpush.msra.mxu3 %v2461_v37 }
0x1515   :  { %v2024_v5 = vadd.f32 %v2022_v4, %v3095_v14 }
0x1517   :  { %v2026_v7 = vsel %vm42_vm0, %v2024_v5, 0.0 }
0x1518   :  { %2027 = vadd.xlane.f32.xlu1 %v2026_v7  ;;  %v2016_v8 = vpop.f32.mrf.mxu1 }
0x1519   :  { %v2020_v10 = vadd.f32 %v2016_v8, %v1796_v38  ;;  %v2460_v38 = vld [vmem:[%s3440_s6 + $0x68] sm:$0xff]  ;;  %v2122_v8 = vperm.slane %v3358_v63, 2 }
0x151a   :  { %2139 = vmatpush.msra.mxu3 %v2460_v38 }
0x151b   :  { %v2023_v11 = vadd.f32 %v2021_v1, %v2020_v10 }
0x151c   :  { %2140 = vmatpush.msra.mxu3 %v2459_v39 }
0x151d   :  { %v2025_v12 = vadd.f32 %v2023_v11, %v3104_v19  ;;  %v2452_v19 = vld [vmem:[%s3439_s5 + $0x38] sm:$0xff] }
0x151e   :  { %2100 = vmatpush.msra.mxu2 %v2452_v19  ;;  %2141 = vmatpush.msra.mxu3 %v2458_v42 }
0x151f   :  { %v2029_v13 = vsel %vm42_vm0, %v2025_v12, 0.0 }
0x1520   :  { %2030 = vadd.xlane.f32.xlu2 %v2029_v13  ;;  %2101 = vmatpush.msra.mxu2 %v2451_v9 }
0x1521   :  { %2142 = vmatpush.msra.mxu3 %v2457_v59 }
0x1522   :  { %2102 = vmatpush.msra.mxu2 %v2450_v26 }
0x1523   :  { %2143 = vmatpush.msra.mxu3 %v2456_v60 }
0x1524   :  { %2103 = vmatpush.msra.mxu2 %v2449_v27 }
0x1525   :  { %2144 = vmatpush.msra.mxu3 %v2455_v61 }
0x158b   :  { %v2028_v15 = vpop.xlane.xlu1 %2027 }
0x158c   :  { %v2032_v16 = vmul.f32 %v2028_v15, %v2964_v6 }
0x158e   :  { %v2034_v0 = vsub.f32 %v2024_v5, %v2032_v16 }
0x1590   :  { %v2036_v17 = vmul.f32 %v2034_v0, %v2034_v0 }
0x1592   :  { %v2038_v20 = vsel %vm42_vm0, %v2036_v17, 0.0 }
0x1593   :  { %2039 = vadd.xlane.f32.xlu0 %v2038_v20  ;;  %v2031_v14 = vpop.xlane.xlu2 %2030 }
0x1594   :  { %v2033_v22 = vmul.f32 %v2031_v14, %v2964_v6 }
0x1596   :  { %v2035_v23 = vsub.f32 %v2025_v12, %v2033_v22 }
0x1598   :  { %v2037_v24 = vmul.f32 %v2035_v23, %v2035_v23 }
0x159a   :  { %v2041_v25 = vsel %vm42_vm0, %v2037_v24, 0.0 }
0x159b   :  { %2042 = vadd.xlane.f32.xlu1 %v2041_v25 }
0x1606   :  { %v2040_v18 = vpop.xlane.xlu0 %2039 }
0x1607   :  { %v2044_v29 = vmul.f32 %v2040_v18, %v2964_v6 }
0x1609   :  { %v2046_v35 = vadd.f32 1e-05, %v2044_v29 }
0x160b   :  { %2564 = vrsqrt.f32 %v2046_v35  ;;  %vm2054_vm2 = vweird.f32 %v2046_v35 }
0x160e   :  { %v2043_v21 = vpop.xlane.xlu1 %2042 }
0x160f   :  { %v2045_v34 = vmul.f32 %v2043_v21, %v2964_v6 }
0x1611   :  { %v2565_v40 = vpop.eup %2564  ;;  %v2047_v41 = vadd.f32 1e-05, %v2045_v34 }
0x1612   :  { %v2049_v28 = vmul.f32 %v2565_v40, %v2046_v35  ;;  %vm2055_vm1 = vweird.f32 %v2565_v40 }
0x1613   :  { %2566 = vrsqrt.f32 %v2047_v41  ;;  %vm2056_vm4 = vmor %vm2054_vm2, %vm2055_vm1  ;;  %vm2064_vm6 = vweird.f32 %v2047_v41 }
0x1614   :  { %v2050_v43 = vmul.f32 %v2565_v40, %v2049_v28 }
0x1616   :  { %v2051_v30 = vmul.f32 0.5, %v2050_v43 }
0x1618   :  { %v2052_v31 = vsub.f32 1.5, %v2051_v30  ;;  %v2198_v30 = vperm.slane %v3358_v63, 5 }
0x1619   :  { %v2567_v32 = vpop.eup %2566 }
0x161a   :  { %v2053_v45 = vmul.f32 %v2565_v40, %v2052_v31  ;;  %v2059_v33 = vmul.f32 %v2567_v32, %v2047_v41  ;;  %vm2065_vm5 = vweird.f32 %v2567_v32 }
0x161b   :  { %vm2066_vm7 = vmor %vm2064_vm6, %vm2065_vm5 }
0x161c   :  { %v2057_v44 = vsel %vm2056_vm4, %v2565_v40, %v2053_v45  ;;  %v2060_v48 = vmul.f32 %v2567_v32, %v2059_v33  ;;  %v2201_v45 = vperm.slane %v3358_v63, 6 }
0x161d   :  { %v2068_v49 = vmul.f32 %v2057_v44, %v2034_v0 }
0x161e   :  { %v2061_v50 = vmul.f32 0.5, %v2060_v48 }
0x161f   :  { %v2071_v51 = vmul.f32 %v2070_v46, %v2068_v49 }
0x1620   :  { %v2062_v52 = vsub.f32 1.5, %v2061_v50 }
0x1621   :  { %v2074_v53 = vadd.f32 %v2073_v47, %v2071_v51 }
0x1622   :  { %v2063_v54 = vmul.f32 %v2567_v32, %v2062_v52 }
0x1623   :  { %2453 = vmatmul.msk.f32.vlgmr.msra.gmra.mxu2 %vm42_vm0, %v2074_v53 }
0x1624   :  { %v2067_v55 = vsel %vm2066_vm7, %v2567_v32, %v2063_v54 }
0x1625   :  { %v2069_v56 = vmul.f32 %v2067_v55, %v2035_v23 }
0x1627   :  { %v2072_v57 = vmul.f32 %v2070_v46, %v2069_v56 }
0x1629   :  { %v2075_v58 = vadd.f32 %v2073_v47, %v2072_v57 }
0x162b   :  { %2454 = vmatmul.msk.f32.gmra.mxu2 %vm42_vm0, %v2075_v58 }
0x16a6   :  { %v2105_v1 = vpop.f32.mrf.mxu2 }
0x16a7   :  { %v2106_v2 = vadd.f32 %v2105_v1, %v2081_v62 }
0x16a9   :  { %v2111_v3 = vmax.f32 %v2106_v2, 0.0 }
0x16ab   :  { %2463 = vmatmul.msk.f32.vlgmr.msra.gmra.mxu3 %vm1039_vm10, %v2111_v3 }
0x16ae   :  { %v2108_v4 = vpop.f32.mrf.mxu2 }
0x16af   :  { %v2109_v5 = vadd.f32 %v2108_v4, %v2081_v62 }
0x16b1   :  { %v2112_v7 = vmax.f32 %v2109_v5, 0.0 }
0x16b3   :  { %2464 = vmatmul.msk.f32.gmra.mxu3 %vm1039_vm10, %v2112_v7 }
0x172e   :  { %v2146_v10 = vpop.f32.mrf.mxu3 }
0x172f   :  { %v2147_v11 = vadd.f32 %v2146_v10, %v2122_v8 }
0x1731   :  { %v2152_v12 = vadd.f32 %v2147_v11, %v2074_v53 }
0x1733   :  { %v2154_v13 = vsel %vm42_vm0, %v2152_v12, 0.0 }
0x1734   :  { %2155 = vadd.xlane.f32.xlu2 %v2154_v13 }
0x1736   :  { %v2149_v15 = vpop.f32.mrf.mxu3 }
0x1737   :  { %v2150_v16 = vadd.f32 %v2149_v15, %v2122_v8 }
0x1739   :  { %v2153_v0 = vadd.f32 %v2150_v16, %v2075_v58 }
0x173b   :  { %v2157_v17 = vsel %vm42_vm0, %v2153_v0, 0.0 }
0x173c   :  { %2158 = vadd.xlane.f32.xlu0 %v2157_v17 }
0x17a7   :  { %v2156_v20 = vpop.xlane.xlu2 %2155 }
0x17a8   :  { %v2160_v14 = vmul.f32 %v2156_v20, %v2964_v6 }
0x17aa   :  { %v2162_v22 = vsub.f32 %v2152_v12, %v2160_v14 }
0x17ac   :  { %v2164_v23 = vmul.f32 %v2162_v22, %v2162_v22 }
0x17ae   :  { %v2166_v24 = vsel %vm42_vm0, %v2164_v23, 0.0 }
0x17af   :  { %v2159_v25 = vpop.xlane.xlu0 %2158  ;;  %2167 = vadd.xlane.f32.xlu1 %v2166_v24 }
0x17b0   :  { %v2161_v19 = vmul.f32 %v2159_v25, %v2964_v6 }
0x17b2   :  { %v2163_v9 = vsub.f32 %v2153_v0, %v2161_v19 }
0x17b4   :  { %v2165_v26 = vmul.f32 %v2163_v9, %v2163_v9 }
0x17b6   :  { %v2169_v27 = vsel %vm42_vm0, %v2165_v26, 0.0 }
0x17b7   :  { %2170 = vadd.xlane.f32.xlu2 %v2169_v27 }
0x1822   :  { %v2168_v18 = vpop.xlane.xlu1 %2167 }
0x1823   :  { %v2172_v29 = vmul.f32 %v2168_v18, %v2964_v6 }
0x1825   :  { %v2174_v35 = vadd.f32 1e-05, %v2172_v29 }
0x1827   :  { %2568 = vrsqrt.f32 %v2174_v35  ;;  %vm2182_vm9 = vweird.f32 %v2174_v35 }
0x182a   :  { %v2171_v36 = vpop.xlane.xlu2 %2170 }
0x182b   :  { %v2173_v37 = vmul.f32 %v2171_v36, %v2964_v6 }
0x182d   :  { %v2569_v38 = vpop.eup %2568  ;;  %v2175_v21 = vadd.f32 1e-05, %v2173_v37 }
0x182e   :  { %v2177_v34 = vmul.f32 %v2569_v38, %v2174_v35  ;;  %vm2183_vm8 = vweird.f32 %v2569_v38 }
0x182f   :  { %2570 = vrsqrt.f32 %v2175_v21  ;;  %vm2184_vm10 = vmor %vm2182_vm9, %vm2183_vm8  ;;  %vm2192_vm12 = vweird.f32 %v2175_v21 }
0x1830   :  { %v2178_v39 = vmul.f32 %v2569_v38, %v2177_v34 }
0x1832   :  { %v2179_v40 = vmul.f32 0.5, %v2178_v39 }
0x1834   :  { %v2180_v41 = vsub.f32 1.5, %v2179_v40 }
0x1835   :  { %v2571_v42 = vpop.eup %2570 }
0x1836   :  { %v2181_v28 = vmul.f32 %v2569_v38, %v2180_v41  ;;  %v2187_v43 = vmul.f32 %v2571_v42, %v2175_v21  ;;  %vm2193_vm11 = vweird.f32 %v2571_v42 }
0x1837   :  { %vm2194_vm13 = vmor %vm2192_vm12, %vm2193_vm11 }
0x1838   :  { %v2185_v31 = vsel %vm2184_vm10, %v2569_v38, %v2181_v28  ;;  %v2188_v32 = vmul.f32 %v2571_v42, %v2187_v43 }
0x1839   :  { %v2196_v6 = vmul.f32 %v2185_v31, %v2162_v22 }
0x183a   :  { %v2189_v33 = vmul.f32 0.5, %v2188_v32 }
0x183b   :  { %v2199_v46 = vmul.f32 %v2198_v30, %v2196_v6 }
0x183c   :  { %v2190_v44 = vsub.f32 1.5, %v2189_v33 }
0x183d   :  { %v2202_v48 = vadd.f32 %v2201_v45, %v2199_v46 }
0x183e   :  { %v2191_v47 = vmul.f32 %v2571_v42, %v2190_v44 }
0x183f   :  { %2204 = vst.msk [vmem:[%s3441_s8] sm:$0xff] %vm42_vm0, %v2202_v48 }
0x1840   :  { %v2195_v49 = vsel %vm2194_vm13, %v2571_v42, %v2191_v47 }
0x1841   :  { %v2197_v50 = vmul.f32 %v2195_v49, %v2163_v9 }
0x1843   :  { %v2200_v51 = vmul.f32 %v2198_v30, %v2197_v50 }
0x1845   :  { %v2203_v52 = vadd.f32 %v2201_v45, %v2200_v51 }
0x1847   :  { %2205 = vst.msk [vmem:[%s3441_s8 + $0x8] sm:$0xff] %vm42_vm0, %v2203_v52 }

</bundles_post_ra>
